<compile_context>
chip_gen: v7x
topology: tpu7x:2x2x1
jax: 0.10.0
libtpu: 0.0.40
codegen_flags: <defaults>
</compile_context>

<pallas_src>
import math

import jax
import jax.numpy as jnp
from jax.experimental import pallas as pl
from jax.experimental.pallas import tpu as pltpu

# ---------------------------------------------------------------------------
# Synthetic model config (small, but structurally identical to a BERT encoder)
# ---------------------------------------------------------------------------
VOCAB = 64          # vocab size
H = 32              # hidden size            -> Encoder.output_dim
NH = 2              # attention heads
DH = H // NH        # head dim
INTER = 64          # FFN intermediate size
LAYERS = 2          # num_hidden_layers      -> Encoder.num_layers = LAYERS + 1
MAXPOS = 16         # max_position_embeddings -> Encoder.max_positions
LN_EPS = 1e-12      # BERT LayerNorm eps

# ---- lane-dense padded sizes ----------------------------------------------
HP = 128            # hidden padded to one full lane group
IP = 128            # FFN intermediate padded
HL = 128            # per-head lane slab width
QW = NH * HL        # lanes per fused projection section (q | k | v)
NEG = -1e9


# ---------------------------------------------------------------------------
# In-kernel helpers
# ---------------------------------------------------------------------------
def _ln(x, gamma, beta):
    """LayerNorm over the real H lanes of a zero-padded (.., HP) activation.

    Padded lanes are identically zero, so sums over HP equal sums over H;
    gamma/beta are zero-padded so padded output lanes stay zero.
    """
    mu = jnp.sum(x, axis=-1, keepdims=True) * (1.0 / H)
    ex2 = jnp.sum(x * x, axis=-1, keepdims=True) * (1.0 / H)
    var = jnp.maximum(ex2 - mu * mu, 0.0)
    return (x - mu) * jax.lax.rsqrt(var + LN_EPS) * gamma + beta


def _gelu(x):
    # TODO(synk): HF BERT uses the exact erf GELU; tanh approximation is used
    # here for robust Mosaic lowering (EUP tanh).  gelu(0)=0 keeps pads zero.
    c = math.sqrt(2.0 / math.pi)
    return 0.5 * x * (1.0 + jnp.tanh(c * (x + 0.044715 * x * x * x)))


def _bf16(x):
    return x.astype(jnp.bfloat16)


# ---------------------------------------------------------------------------
# Single fused encoder kernel
# ---------------------------------------------------------------------------
def encoder_kernel(ids_ref, mask_ref, wemb_ref, postype_ref, embln_ref,
                   wqkv_ref, bqkv_ref, wo_ref, w1_ref, w2_ref,
                   vech_ref, b1_ref, o_ref, emb_scratch):
    """Full encoder forward for all tokens (B*S flattened, lane-padded).

    ids_ref     : (BS,) int32 SMEM    scalar-prefetched token ids
    mask_ref    : (1, BS) f32         attention mask (1 keep / 0 masked key)
    wemb_ref    : (VOCAB, 1, HP) f32  word embedding table (padded lanes zero)
    postype_ref : (S, HP) f32         position + type-0 embedding table
    embln_ref   : (2, HP) f32         embedding LayerNorm [gamma; beta]
    wqkv_ref    : (L, HP, 3*QW) bf16  per-head 128-lane-slab Q|K|V weights
    bqkv_ref    : (L, 1, 3*QW) f32    Q|K|V bias
    wo_ref      : (L, NH, HL, HP) bf16  per-head output projection
    w1_ref      : (L, HP, IP) bf16    FFN up projection
    w2_ref      : (L, IP, HP) bf16    FFN down projection
    vech_ref    : (L, 6, HP) f32      [bo, ln1_g, ln1_b, b2, ln2_g, ln2_b]
    b1_ref      : (L, 1, IP) f32      FFN up bias
    o_ref       : (L+1, BS, HP)       every hidden state (embedding LN + layers)
    emb_scratch : (BS, HP) f32 VMEM   gathered embeddings
    """
    seq = postype_ref.shape[0]
    bs = mask_ref.shape[1]
    nbatch = bs // seq

    # --- fused embedding gather (ids come from scalar prefetch) -------------
    for t in range(bs):                       # static, BS small
        tid = ids_ref[t]
        row = wemb_ref[tid] + postype_ref[pl.ds(t % seq, 1), :]
        emb_scratch[pl.ds(t, 1), :] = row

    hidden = _ln(emb_scratch[...], embln_ref[0:1, :], embln_ref[1:2, :])
    o_ref[0] = hidden

    # --- block-diagonal attention bias, hoisted out of all loops ------------
    rowi = jax.lax.broadcasted_iota(jnp.int32, (bs, bs), 0)
    coli = jax.lax.broadcasted_iota(jnp.int32, (bs, bs), 1)
    inside = jnp.zeros((bs, bs), jnp.float32)
    for b in range(nbatch):                   # static, tiny
        r_in = jnp.where((rowi >= b * seq) & (rowi < (b + 1) * seq), 1.0, 0.0)
        c_in = jnp.where((coli >= b * seq) & (coli < (b + 1) * seq), 1.0, 0.0)
        inside = inside + r_in * c_in
    keep = inside * mask_ref[0:1, :]          # (BS, BS)
    attn_bias = (1.0 - keep) * NEG

    scale = 1.0 / math.sqrt(DH)

    for li in range(LAYERS):                  # static: fully fused
        x = hidden                            # (BS, HP) f32, padded lanes zero

        # --- fused QKV projection (single MXU matmul, 128-lane head slabs) --
        qkv = jnp.dot(_bf16(x), wqkv_ref[li],
                      preferred_element_type=jnp.float32) + bqkv_ref[li]
        qb = _bf16(qkv[:, 0:QW] * scale)      # one cast per operand slab
        kb = _bf16(qkv[:, QW:2 * QW])
        vb = _bf16(qkv[:, 2 * QW:3 * QW])

        # --- multi-head attention: per-head project-then-accumulate ---------
        attn = jnp.zeros((bs, HP), jnp.float32)
        for h in range(NH):                   # static (NH small)
            lo = h * HL
            qh = qb[:, lo:lo + HL]            # (BS, 128) lane-aligned slices
            kh = kb[:, lo:lo + HL]
            vh = vb[:, lo:lo + HL]
            # all batches at once; cross-batch entries killed by attn_bias
            sc = jax.lax.dot_general(qh, kh, (((1,), (1,)), ((), ())),
                                     preferred_element_type=jnp.float32)
            sc = sc + attn_bias
            sc = sc - jnp.max(sc, axis=-1, keepdims=True)
            p = jnp.exp(sc)
            p = p * pl.reciprocal(jnp.sum(p, axis=-1, keepdims=True),
                                  approx=False)
            ctx = jnp.dot(_bf16(p), vh, preferred_element_type=jnp.float32)
            attn = attn + jnp.dot(_bf16(ctx), wo_ref[li, h],
                                  preferred_element_type=jnp.float32)

        attn = attn + vech_ref[li, 0:1, :]    # bo
        h1 = _ln(x + attn, vech_ref[li, 1:2, :], vech_ref[li, 2:3, :])

        # --- feed-forward ----------------------------------------------------
        ff = jnp.dot(_bf16(h1), w1_ref[li],
                     preferred_element_type=jnp.float32) + b1_ref[li]
        ff = _gelu(ff)
        ff = jnp.dot(_bf16(ff), w2_ref[li],
                     preferred_element_type=jnp.float32) + vech_ref[li, 3:4, :]

        hidden = _ln(h1 + ff, vech_ref[li, 4:5, :], vech_ref[li, 5:6, :])
        o_ref[li + 1] = hidden


# ---------------------------------------------------------------------------
# pallas_call wrapper
# ---------------------------------------------------------------------------
def _whole(shape):
    """BlockSpec covering the entire array (single grid step, +prefetch arg)."""
    nd = len(shape)
    return pl.BlockSpec(shape, lambda i, ids, _nd=nd: (0,) * _nd)


def run_encoder(ids_flat, mask_flat, postype, packed):
    bs = ids_flat.shape[0]
    args = (mask_flat, packed["word_emb"], postype, packed["embln"],
            packed["wqkv"], packed["bqkv"], packed["wo"], packed["w1"],
            packed["w2"], packed["vech"], packed["b1"])
    out_shape = jax.ShapeDtypeStruct((LAYERS + 1, bs, HP), jnp.float32)

    flops_layer = (2 * bs * HP * 3 * QW                       # QKV
                   + NH * (4 * bs * bs * HL + 2 * bs * HL * HP)  # attn + proj
                   + 2 * bs * HP * IP + 2 * bs * IP * HP)      # FFN
    cost = pl.CostEstimate(
        flops=LAYERS * flops_layer,
        transcendentals=LAYERS * (NH * bs * bs + bs * IP),
        bytes_accessed=int(sum(a.size * a.dtype.itemsize for a in args)
                           + ids_flat.size * 4
                           + (LAYERS + 1) * bs * HP * 4))

    return pl.pallas_call(
        encoder_kernel,
        out_shape=out_shape,
        grid_spec=pltpu.PrefetchScalarGridSpec(
            num_scalar_prefetch=1,
            grid=(1,),
            in_specs=[_whole(a.shape) for a in args],
            out_specs=_whole((LAYERS + 1, bs, HP)),
            scratch_shapes=[pltpu.VMEM((bs, HP), jnp.float32)],
        ),
        compiler_params=pltpu.CompilerParams(
            dimension_semantics=("arbitrary",)),
        cost_estimate=cost,
    )(ids_flat, *args)


# ---------------------------------------------------------------------------
# Parameter construction (deterministic, synthetic) + lane-dense packing
# ---------------------------------------------------------------------------
def init_params(key):
    def nrm(k, shape, scale=0.02):
        return scale * jax.random.normal(k, shape, dtype=jnp.float32)

    keys = jax.random.split(key, 4 + LAYERS)
    params = {
        "word_emb": nrm(keys[0], (VOCAB, H)),
        "pos_emb": nrm(keys[1], (MAXPOS, H)),
        "type_emb": nrm(keys[2], (2, H)),
        "emb_ln_g": jnp.ones((H,), jnp.float32),
        "emb_ln_b": jnp.zeros((H,), jnp.float32),
        "layers": [],
    }
    for li in range(LAYERS):
        lk = jax.random.split(keys[4 + li], 6)
        params["layers"].append({
            "wq": nrm(lk[0], (H, H)), "bq": jnp.zeros((H,), jnp.float32),
            "wk": nrm(lk[1], (H, H)), "bk": jnp.zeros((H,), jnp.float32),
            "wv": nrm(lk[2], (H, H)), "bv": jnp.zeros((H,), jnp.float32),
            "wo": nrm(lk[3], (H, H)), "bo": jnp.zeros((H,), jnp.float32),
            "ln1_g": jnp.ones((H,), jnp.float32),
            "ln1_b": jnp.zeros((H,), jnp.float32),
            "w1": nrm(lk[4], (H, INTER)), "b1": jnp.zeros((INTER,), jnp.float32),
            "w2": nrm(lk[5], (INTER, H)), "b2": jnp.zeros((H,), jnp.float32),
            "ln2_g": jnp.ones((H,), jnp.float32),
            "ln2_b": jnp.zeros((H,), jnp.float32),
        })
    return params


def _pad2(a, rows, cols):
    return jnp.zeros((rows, cols), jnp.float32).at[:a.shape[0], :a.shape[1]].set(a)


def _pad1(a, cols):
    return jnp.zeros((cols,), jnp.float32).at[:a.shape[0]].set(a)


def pack_params(params):
    """Stack per-layer weights into lane-dense (128-padded) slabs; bf16 matmuls."""
    ls = params["layers"]
    wqkv, bqkv, wo, w1, w2, vech, b1 = [], [], [], [], [], [], []
    for l in ls:
        wqkv_l = jnp.zeros((HP, 3 * QW), jnp.float32)
        bqkv_l = jnp.zeros((1, 3 * QW), jnp.float32)
        for pi, (w, b) in enumerate([(l["wq"], l["bq"]), (l["wk"], l["bk"]),
                                     (l["wv"], l["bv"])]):
            for h in range(NH):
                col = pi * QW + h * HL
                wqkv_l = wqkv_l.at[:H, col:col + DH].set(w[:, h * DH:(h + 1) * DH])
                bqkv_l = bqkv_l.at[0, col:col + DH].set(b[h * DH:(h + 1) * DH])
        wqkv.append(wqkv_l)
        bqkv.append(bqkv_l)

        wo_l = jnp.zeros((NH, HL, HP), jnp.float32)
        for h in range(NH):
            wo_l = wo_l.at[h, :DH, :H].set(l["wo"][h * DH:(h + 1) * DH, :])
        wo.append(wo_l)

        w1.append(_pad2(l["w1"], HP, IP))
        b1.append(_pad1(l["b1"], IP)[None, :])
        w2.append(_pad2(l["w2"], IP, HP))
        vech.append(jnp.stack([_pad1(l["bo"], HP), _pad1(l["ln1_g"], HP),
                               _pad1(l["ln1_b"], HP), _pad1(l["b2"], HP),
                               _pad1(l["ln2_g"], HP), _pad1(l["ln2_b"], HP)]))

    word_emb_p = _pad2(params["word_emb"], VOCAB, HP)[:, None, :]   # (VOCAB,1,HP)
    # TODO(synk): token_type_ids are assumed all-zero (matches the PyTorch call
    # path), so the type-0 embedding row is folded into the position table.
    postype = _pad2(params["pos_emb"], MAXPOS, HP) + _pad1(params["type_emb"][0], HP)[None, :]

    return {
        "word_emb": word_emb_p,
        "postype": postype,                                          # (MAXPOS, HP)
        "embln": jnp.stack([_pad1(params["emb_ln_g"], HP),
                            _pad1(params["emb_ln_b"], HP)]),          # (2, HP)
        "wqkv": jnp.stack(wqkv).astype(jnp.bfloat16),                 # (L, HP, 3*QW)
        "bqkv": jnp.stack(bqkv),                                      # (L, 1, 3*QW)
        "wo": jnp.stack(wo).astype(jnp.bfloat16),                     # (L, NH, HL, HP)
        "w1": jnp.stack(w1).astype(jnp.bfloat16),                     # (L, HP, IP)
        "w2": jnp.stack(w2).astype(jnp.bfloat16),                     # (L, IP, HP)
        "vech": jnp.stack(vech),                                      # (L, 6, HP)
        "b1": jnp.stack(b1),                                          # (L, 1, IP)
    }


# ---------------------------------------------------------------------------
# Encoder.forward equivalent
# ---------------------------------------------------------------------------
def encoder_forward(packed, input_ids, attention_mask):
    B, S = input_ids.shape
    bs = B * S
    ids_flat = input_ids.reshape(bs).astype(jnp.int32)
    mask_flat = attention_mask.astype(jnp.float32).reshape(1, bs)
    postype = packed["postype"][:S]                                  # (S, HP)

    stacked = run_encoder(ids_flat, mask_flat, postype, packed)      # (L+1, bs, HP)
    hiddens = stacked[:, :, :H].reshape(LAYERS + 1, B, S, H)

    last_hidden = hiddens[-1]
    return {
        "sentemb": last_hidden[:, 0, :],
        "wordemb": last_hidden,
        "all_layers": tuple(hiddens[i] for i in range(LAYERS + 1)),
        "attention_mask": attention_mask,
    }


# ---------------------------------------------------------------------------
if __name__ == "__main__":
    key = jax.random.PRNGKey(0)
    pkey, dkey = jax.random.split(key)
    params = init_params(pkey)
    packed = pack_params(params)

    B, S = 2, 8
    input_ids = jax.random.randint(dkey, (B, S), 0, VOCAB, dtype=jnp.int32)
    attention_mask = jnp.ones((B, S), jnp.int32).at[1, 6:].set(0)

    fwd = jax.jit(encoder_forward)
    out = fwd(packed, input_ids, attention_mask)

    jax.block_until_ready(out["wordemb"])
    jax.block_until_ready(out["sentemb"])
    for hl in out["all_layers"]:
        jax.block_until_ready(hl)

    assert out["sentemb"].shape == (B, H)
    assert out["wordemb"].shape == (B, S, H)
    assert len(out["all_layers"]) == LAYERS + 1
    assert out["attention_mask"].shape == (B, S)
    assert bool(jnp.all(jnp.isfinite(out["wordemb"])))
    print("KERNEL_OK")
</pallas_src>

<mosaic_0001>
module attributes {stable_mosaic.version = 11 : i64} {
  func.func @encoder_kernel(%arg0: i32, %arg1: memref<16xi32, #tpu.memory_space<smem>>, %arg2: memref<1x16xf32, #tpu.memory_space<vmem>>, %arg3: memref<64x1x128xf32, #tpu.memory_space<vmem>>, %arg4: memref<8x128xf32, #tpu.memory_space<vmem>>, %arg5: memref<2x128xf32, #tpu.memory_space<vmem>>, %arg6: memref<2x128x768xbf16, #tpu.memory_space<vmem>>, %arg7: memref<2x1x768xf32, #tpu.memory_space<vmem>>, %arg8: memref<2x2x128x128xbf16, #tpu.memory_space<vmem>>, %arg9: memref<2x128x128xbf16, #tpu.memory_space<vmem>>, %arg10: memref<2x128x128xbf16, #tpu.memory_space<vmem>>, %arg11: memref<2x6x128xf32, #tpu.memory_space<vmem>>, %arg12: memref<2x1x128xf32, #tpu.memory_space<vmem>>, %arg13: memref<3x16x128xf32, #tpu.memory_space<vmem>>, %arg14: memref<16x128xf32, #tpu.memory_space<vmem>>) attributes {dimension_semantics = [#tpu.dimension_semantics<arbitrary>], iteration_bounds = array<i64: 1>, scalar_prefetch = 1 : i64, scratch_operands = 1 : i64, tpu.core_type = #tpu.core_type<tc>, window_params = [{pipeline_mode = #tpu.pipeline_mode<synchronous>, transform_indices = @transform_0, window_bounds = array<i64: 1, 16>}, {pipeline_mode = #tpu.pipeline_mode<synchronous>, transform_indices = @transform_1, window_bounds = array<i64: 64, 1, 128>}, {pipeline_mode = #tpu.pipeline_mode<synchronous>, transform_indices = @transform_2, window_bounds = array<i64: 8, 128>}, {pipeline_mode = #tpu.pipeline_mode<synchronous>, transform_indices = @transform_3, window_bounds = array<i64: 2, 128>}, {pipeline_mode = #tpu.pipeline_mode<synchronous>, transform_indices = @transform_4, window_bounds = array<i64: 2, 128, 768>}, {pipeline_mode = #tpu.pipeline_mode<synchronous>, transform_indices = @transform_5, window_bounds = array<i64: 2, 1, 768>}, {pipeline_mode = #tpu.pipeline_mode<synchronous>, transform_indices = @transform_6, window_bounds = array<i64: 2, 2, 128, 128>}, {pipeline_mode = #tpu.pipeline_mode<synchronous>, transform_indices = @transform_7, window_bounds = array<i64: 2, 128, 128>}, {pipeline_mode = #tpu.pipeline_mode<synchronous>, transform_indices = @transform_8, window_bounds = array<i64: 2, 128, 128>}, {pipeline_mode = #tpu.pipeline_mode<synchronous>, transform_indices = @transform_9, window_bounds = array<i64: 2, 6, 128>}, {pipeline_mode = #tpu.pipeline_mode<synchronous>, transform_indices = @transform_10, window_bounds = array<i64: 2, 1, 128>}, {pipeline_mode = #tpu.pipeline_mode<synchronous>, transform_indices = @transform_11, window_bounds = array<i64: 3, 16, 128>}]} {
    %c0 = arith.constant 0 : index
    %0 = memref.load %arg1[%c0] : memref<16xi32, #tpu.memory_space<smem>>
    %1 = arith.index_cast %0 : i32 to index
    %c0_0 = arith.constant 0 : index
    %c0_1 = arith.constant 0 : index
    %2 = vector.load %arg3[%1, %c0_0, %c0_1] : memref<64x1x128xf32, #tpu.memory_space<vmem>>, vector<1x1x128xf32>
    %3 = vector.shape_cast %2 : vector<1x1x128xf32> to vector<1x128xf32>
    %c0_2 = arith.constant 0 : index
    %c0_3 = arith.constant 0 : index
    %4 = vector.load %arg4[%c0_2, %c0_3] : memref<8x128xf32, #tpu.memory_space<vmem>>, vector<1x128xf32>
    %5 = arith.addf %3, %4 : vector<1x128xf32>
    %c0_4 = arith.constant 0 : index
    %c0_5 = arith.constant 0 : index
    %6 = vector.load %arg14[%c0_4, %c0_5] : memref<16x128xf32, #tpu.memory_space<vmem>>, vector<1x128xf32>
    tpu.vector_store %arg14[%c0_4, %c0_5], %5 {strides = array<i32>} : memref<16x128xf32, #tpu.memory_space<vmem>>, vector<1x128xf32>,
    %c1 = arith.constant 1 : index
    %7 = memref.load %arg1[%c1] : memref<16xi32, #tpu.memory_space<smem>>
    %8 = arith.index_cast %7 : i32 to index
    %c0_6 = arith.constant 0 : index
    %c0_7 = arith.constant 0 : index
    %9 = vector.load %arg3[%8, %c0_6, %c0_7] : memref<64x1x128xf32, #tpu.memory_space<vmem>>, vector<1x1x128xf32>
    %10 = vector.shape_cast %9 : vector<1x1x128xf32> to vector<1x128xf32>
    %c1_8 = arith.constant 1 : index
    %c0_9 = arith.constant 0 : index
    %11 = vector.load %arg4[%c1_8, %c0_9] : memref<8x128xf32, #tpu.memory_space<vmem>>, vector<1x128xf32>
    %12 = arith.addf %10, %11 : vector<1x128xf32>
    %c1_10 = arith.constant 1 : index
    %c0_11 = arith.constant 0 : index
    %13 = vector.load %arg14[%c1_10, %c0_11] : memref<16x128xf32, #tpu.memory_space<vmem>>, vector<1x128xf32>
    tpu.vector_store %arg14[%c1_10, %c0_11], %12 {strides = array<i32>} : memref<16x128xf32, #tpu.memory_space<vmem>>, vector<1x128xf32>,
    %c2 = arith.constant 2 : index
    %14 = memref.load %arg1[%c2] : memref<16xi32, #tpu.memory_space<smem>>
    %15 = arith.index_cast %14 : i32 to index
    %c0_12 = arith.constant 0 : index
    %c0_13 = arith.constant 0 : index
    %16 = vector.load %arg3[%15, %c0_12, %c0_13] : memref<64x1x128xf32, #tpu.memory_space<vmem>>, vector<1x1x128xf32>
    %17 = vector.shape_cast %16 : vector<1x1x128xf32> to vector<1x128xf32>
    %c2_14 = arith.constant 2 : index
    %c0_15 = arith.constant 0 : index
    %18 = vector.load %arg4[%c2_14, %c0_15] : memref<8x128xf32, #tpu.memory_space<vmem>>, vector<1x128xf32>
    %19 = arith.addf %17, %18 : vector<1x128xf32>
    %c2_16 = arith.constant 2 : index
    %c0_17 = arith.constant 0 : index
    %20 = vector.load %arg14[%c2_16, %c0_17] : memref<16x128xf32, #tpu.memory_space<vmem>>, vector<1x128xf32>
    tpu.vector_store %arg14[%c2_16, %c0_17], %19 {strides = array<i32>} : memref<16x128xf32, #tpu.memory_space<vmem>>, vector<1x128xf32>,
    %c3 = arith.constant 3 : index
    %21 = memref.load %arg1[%c3] : memref<16xi32, #tpu.memory_space<smem>>
    %22 = arith.index_cast %21 : i32 to index
    %c0_18 = arith.constant 0 : index
    %c0_19 = arith.constant 0 : index
    %23 = vector.load %arg3[%22, %c0_18, %c0_19] : memref<64x1x128xf32, #tpu.memory_space<vmem>>, vector<1x1x128xf32>
    %24 = vector.shape_cast %23 : vector<1x1x128xf32> to vector<1x128xf32>
    %c3_20 = arith.constant 3 : index
    %c0_21 = arith.constant 0 : index
    %25 = vector.load %arg4[%c3_20, %c0_21] : memref<8x128xf32, #tpu.memory_space<vmem>>, vector<1x128xf32>
    %26 = arith.addf %24, %25 : vector<1x128xf32>
    %c3_22 = arith.constant 3 : index
    %c0_23 = arith.constant 0 : index
    %27 = vector.load %arg14[%c3_22, %c0_23] : memref<16x128xf32, #tpu.memory_space<vmem>>, vector<1x128xf32>
    tpu.vector_store %arg14[%c3_22, %c0_23], %26 {strides = array<i32>} : memref<16x128xf32, #tpu.memory_space<vmem>>, vector<1x128xf32>,
    %c4 = arith.constant 4 : index
    %28 = memref.load %arg1[%c4] : memref<16xi32, #tpu.memory_space<smem>>
    %29 = arith.index_cast %28 : i32 to index
    %c0_24 = arith.constant 0 : index
    %c0_25 = arith.constant 0 : index
    %30 = vector.load %arg3[%29, %c0_24, %c0_25] : memref<64x1x128xf32, #tpu.memory_space<vmem>>, vector<1x1x128xf32>
    %31 = vector.shape_cast %30 : vector<1x1x128xf32> to vector<1x128xf32>
    %c4_26 = arith.constant 4 : index
    %c0_27 = arith.constant 0 : index
    %32 = vector.load %arg4[%c4_26, %c0_27] : memref<8x128xf32, #tpu.memory_space<vmem>>, vector<1x128xf32>
    %33 = arith.addf %31, %32 : vector<1x128xf32>
    %c4_28 = arith.constant 4 : index
    %c0_29 = arith.constant 0 : index
    %34 = vector.load %arg14[%c4_28, %c0_29] : memref<16x128xf32, #tpu.memory_space<vmem>>, vector<1x128xf32>
    tpu.vector_store %arg14[%c4_28, %c0_29], %33 {strides = array<i32>} : memref<16x128xf32, #tpu.memory_space<vmem>>, vector<1x128xf32>,
    %c5 = arith.constant 5 : index
    %35 = memref.load %arg1[%c5] : memref<16xi32, #tpu.memory_space<smem>>
    %36 = arith.index_cast %35 : i32 to index
    %c0_30 = arith.constant 0 : index
    %c0_31 = arith.constant 0 : index
    %37 = vector.load %arg3[%36, %c0_30, %c0_31] : memref<64x1x128xf32, #tpu.memory_space<vmem>>, vector<1x1x128xf32>
    %38 = vector.shape_cast %37 : vector<1x1x128xf32> to vector<1x128xf32>
    %c5_32 = arith.constant 5 : index
    %c0_33 = arith.constant 0 : index
    %39 = vector.load %arg4[%c5_32, %c0_33] : memref<8x128xf32, #tpu.memory_space<vmem>>, vector<1x128xf32>
    %40 = arith.addf %38, %39 : vector<1x128xf32>
    %c5_34 = arith.constant 5 : index
    %c0_35 = arith.constant 0 : index
    %41 = vector.load %arg14[%c5_34, %c0_35] : memref<16x128xf32, #tpu.memory_space<vmem>>, vector<1x128xf32>
    tpu.vector_store %arg14[%c5_34, %c0_35], %40 {strides = array<i32>} : memref<16x128xf32, #tpu.memory_space<vmem>>, vector<1x128xf32>,
    %c6 = arith.constant 6 : index
    %42 = memref.load %arg1[%c6] : memref<16xi32, #tpu.memory_space<smem>>
    %43 = arith.index_cast %42 : i32 to index
    %c0_36 = arith.constant 0 : index
    %c0_37 = arith.constant 0 : index
    %44 = vector.load %arg3[%43, %c0_36, %c0_37] : memref<64x1x128xf32, #tpu.memory_space<vmem>>, vector<1x1x128xf32>
    %45 = vector.shape_cast %44 : vector<1x1x128xf32> to vector<1x128xf32>
    %c6_38 = arith.constant 6 : index
    %c0_39 = arith.constant 0 : index
    %46 = vector.load %arg4[%c6_38, %c0_39] : memref<8x128xf32, #tpu.memory_space<vmem>>, vector<1x128xf32>
    %47 = arith.addf %45, %46 : vector<1x128xf32>
    %c6_40 = arith.constant 6 : index
    %c0_41 = arith.constant 0 : index
    %48 = vector.load %arg14[%c6_40, %c0_41] : memref<16x128xf32, #tpu.memory_space<vmem>>, vector<1x128xf32>
    tpu.vector_store %arg14[%c6_40, %c0_41], %47 {strides = array<i32>} : memref<16x128xf32, #tpu.memory_space<vmem>>, vector<1x128xf32>,
    %c7 = arith.constant 7 : index
    %49 = memref.load %arg1[%c7] : memref<16xi32, #tpu.memory_space<smem>>
    %50 = arith.index_cast %49 : i32 to index
    %c0_42 = arith.constant 0 : index
    %c0_43 = arith.constant 0 : index
    %51 = vector.load %arg3[%50, %c0_42, %c0_43] : memref<64x1x128xf32, #tpu.memory_space<vmem>>, vector<1x1x128xf32>
    %52 = vector.shape_cast %51 : vector<1x1x128xf32> to vector<1x128xf32>
    %c7_44 = arith.constant 7 : index
    %c0_45 = arith.constant 0 : index
    %53 = vector.load %arg4[%c7_44, %c0_45] : memref<8x128xf32, #tpu.memory_space<vmem>>, vector<1x128xf32>
    %54 = arith.addf %52, %53 : vector<1x128xf32>
    %c7_46 = arith.constant 7 : index
    %c0_47 = arith.constant 0 : index
    %55 = vector.load %arg14[%c7_46, %c0_47] : memref<16x128xf32, #tpu.memory_space<vmem>>, vector<1x128xf32>
    tpu.vector_store %arg14[%c7_46, %c0_47], %54 {strides = array<i32>} : memref<16x128xf32, #tpu.memory_space<vmem>>, vector<1x128xf32>,
    %c8 = arith.constant 8 : index
    %56 = memref.load %arg1[%c8] : memref<16xi32, #tpu.memory_space<smem>>
    %57 = arith.index_cast %56 : i32 to index
    %c0_48 = arith.constant 0 : index
    %c0_49 = arith.constant 0 : index
    %58 = vector.load %arg3[%57, %c0_48, %c0_49] : memref<64x1x128xf32, #tpu.memory_space<vmem>>, vector<1x1x128xf32>
    %59 = vector.shape_cast %58 : vector<1x1x128xf32> to vector<1x128xf32>
    %c0_50 = arith.constant 0 : index
    %c0_51 = arith.constant 0 : index
    %60 = vector.load %arg4[%c0_50, %c0_51] : memref<8x128xf32, #tpu.memory_space<vmem>>, vector<1x128xf32>
    %61 = arith.addf %59, %60 : vector<1x128xf32>
    %c8_52 = arith.constant 8 : index
    %c0_53 = arith.constant 0 : index
    %62 = vector.load %arg14[%c8_52, %c0_53] : memref<16x128xf32, #tpu.memory_space<vmem>>, vector<1x128xf32>
    tpu.vector_store %arg14[%c8_52, %c0_53], %61 {strides = array<i32>} : memref<16x128xf32, #tpu.memory_space<vmem>>, vector<1x128xf32>,
    %c9 = arith.constant 9 : index
    %63 = memref.load %arg1[%c9] : memref<16xi32, #tpu.memory_space<smem>>
    %64 = arith.index_cast %63 : i32 to index
    %c0_54 = arith.constant 0 : index
    %c0_55 = arith.constant 0 : index
    %65 = vector.load %arg3[%64, %c0_54, %c0_55] : memref<64x1x128xf32, #tpu.memory_space<vmem>>, vector<1x1x128xf32>
    %66 = vector.shape_cast %65 : vector<1x1x128xf32> to vector<1x128xf32>
    %c1_56 = arith.constant 1 : index
    %c0_57 = arith.constant 0 : index
    %67 = vector.load %arg4[%c1_56, %c0_57] : memref<8x128xf32, #tpu.memory_space<vmem>>, vector<1x128xf32>
    %68 = arith.addf %66, %67 : vector<1x128xf32>
    %c9_58 = arith.constant 9 : index
    %c0_59 = arith.constant 0 : index
    %69 = vector.load %arg14[%c9_58, %c0_59] : memref<16x128xf32, #tpu.memory_space<vmem>>, vector<1x128xf32>
    tpu.vector_store %arg14[%c9_58, %c0_59], %68 {strides = array<i32>} : memref<16x128xf32, #tpu.memory_space<vmem>>, vector<1x128xf32>,
    %c10 = arith.constant 10 : index
    %70 = memref.load %arg1[%c10] : memref<16xi32, #tpu.memory_space<smem>>
    %71 = arith.index_cast %70 : i32 to index
    %c0_60 = arith.constant 0 : index
    %c0_61 = arith.constant 0 : index
    %72 = vector.load %arg3[%71, %c0_60, %c0_61] : memref<64x1x128xf32, #tpu.memory_space<vmem>>, vector<1x1x128xf32>
    %73 = vector.shape_cast %72 : vector<1x1x128xf32> to vector<1x128xf32>
    %c2_62 = arith.constant 2 : index
    %c0_63 = arith.constant 0 : index
    %74 = vector.load %arg4[%c2_62, %c0_63] : memref<8x128xf32, #tpu.memory_space<vmem>>, vector<1x128xf32>
    %75 = arith.addf %73, %74 : vector<1x128xf32>
    %c10_64 = arith.constant 10 : index
    %c0_65 = arith.constant 0 : index
    %76 = vector.load %arg14[%c10_64, %c0_65] : memref<16x128xf32, #tpu.memory_space<vmem>>, vector<1x128xf32>
    tpu.vector_store %arg14[%c10_64, %c0_65], %75 {strides = array<i32>} : memref<16x128xf32, #tpu.memory_space<vmem>>, vector<1x128xf32>,
    %c11 = arith.constant 11 : index
    %77 = memref.load %arg1[%c11] : memref<16xi32, #tpu.memory_space<smem>>
    %78 = arith.index_cast %77 : i32 to index
    %c0_66 = arith.constant 0 : index
    %c0_67 = arith.constant 0 : index
    %79 = vector.load %arg3[%78, %c0_66, %c0_67] : memref<64x1x128xf32, #tpu.memory_space<vmem>>, vector<1x1x128xf32>
    %80 = vector.shape_cast %79 : vector<1x1x128xf32> to vector<1x128xf32>
    %c3_68 = arith.constant 3 : index
    %c0_69 = arith.constant 0 : index
    %81 = vector.load %arg4[%c3_68, %c0_69] : memref<8x128xf32, #tpu.memory_space<vmem>>, vector<1x128xf32>
    %82 = arith.addf %80, %81 : vector<1x128xf32>
    %c11_70 = arith.constant 11 : index
    %c0_71 = arith.constant 0 : index
    %83 = vector.load %arg14[%c11_70, %c0_71] : memref<16x128xf32, #tpu.memory_space<vmem>>, vector<1x128xf32>
    tpu.vector_store %arg14[%c11_70, %c0_71], %82 {strides = array<i32>} : memref<16x128xf32, #tpu.memory_space<vmem>>, vector<1x128xf32>,
    %c12 = arith.constant 12 : index
    %84 = memref.load %arg1[%c12] : memref<16xi32, #tpu.memory_space<smem>>
    %85 = arith.index_cast %84 : i32 to index
    %c0_72 = arith.constant 0 : index
    %c0_73 = arith.constant 0 : index
    %86 = vector.load %arg3[%85, %c0_72, %c0_73] : memref<64x1x128xf32, #tpu.memory_space<vmem>>, vector<1x1x128xf32>
    %87 = vector.shape_cast %86 : vector<1x1x128xf32> to vector<1x128xf32>
    %c4_74 = arith.constant 4 : index
    %c0_75 = arith.constant 0 : index
    %88 = vector.load %arg4[%c4_74, %c0_75] : memref<8x128xf32, #tpu.memory_space<vmem>>, vector<1x128xf32>
    %89 = arith.addf %87, %88 : vector<1x128xf32>
    %c12_76 = arith.constant 12 : index
    %c0_77 = arith.constant 0 : index
    %90 = vector.load %arg14[%c12_76, %c0_77] : memref<16x128xf32, #tpu.memory_space<vmem>>, vector<1x128xf32>
    tpu.vector_store %arg14[%c12_76, %c0_77], %89 {strides = array<i32>} : memref<16x128xf32, #tpu.memory_space<vmem>>, vector<1x128xf32>,
    %c13 = arith.constant 13 : index
    %91 = memref.load %arg1[%c13] : memref<16xi32, #tpu.memory_space<smem>>
    %92 = arith.index_cast %91 : i32 to index
    %c0_78 = arith.constant 0 : index
    %c0_79 = arith.constant 0 : index
    %93 = vector.load %arg3[%92, %c0_78, %c0_79] : memref<64x1x128xf32, #tpu.memory_space<vmem>>, vector<1x1x128xf32>
    %94 = vector.shape_cast %93 : vector<1x1x128xf32> to vector<1x128xf32>
    %c5_80 = arith.constant 5 : index
    %c0_81 = arith.constant 0 : index
    %95 = vector.load %arg4[%c5_80, %c0_81] : memref<8x128xf32, #tpu.memory_space<vmem>>, vector<1x128xf32>
    %96 = arith.addf %94, %95 : vector<1x128xf32>
    %c13_82 = arith.constant 13 : index
    %c0_83 = arith.constant 0 : index
    %97 = vector.load %arg14[%c13_82, %c0_83] : memref<16x128xf32, #tpu.memory_space<vmem>>, vector<1x128xf32>
    tpu.vector_store %arg14[%c13_82, %c0_83], %96 {strides = array<i32>} : memref<16x128xf32, #tpu.memory_space<vmem>>, vector<1x128xf32>,
    %c14 = arith.constant 14 : index
    %98 = memref.load %arg1[%c14] : memref<16xi32, #tpu.memory_space<smem>>
    %99 = arith.index_cast %98 : i32 to index
    %c0_84 = arith.constant 0 : index
    %c0_85 = arith.constant 0 : index
    %100 = vector.load %arg3[%99, %c0_84, %c0_85] : memref<64x1x128xf32, #tpu.memory_space<vmem>>, vector<1x1x128xf32>
    %101 = vector.shape_cast %100 : vector<1x1x128xf32> to vector<1x128xf32>
    %c6_86 = arith.constant 6 : index
    %c0_87 = arith.constant 0 : index
    %102 = vector.load %arg4[%c6_86, %c0_87] : memref<8x128xf32, #tpu.memory_space<vmem>>, vector<1x128xf32>
    %103 = arith.addf %101, %102 : vector<1x128xf32>
    %c14_88 = arith.constant 14 : index
    %c0_89 = arith.constant 0 : index
    %104 = vector.load %arg14[%c14_88, %c0_89] : memref<16x128xf32, #tpu.memory_space<vmem>>, vector<1x128xf32>
    tpu.vector_store %arg14[%c14_88, %c0_89], %103 {strides = array<i32>} : memref<16x128xf32, #tpu.memory_space<vmem>>, vector<1x128xf32>,
    %c15 = arith.constant 15 : index
    %105 = memref.load %arg1[%c15] : memref<16xi32, #tpu.memory_space<smem>>
    %106 = arith.index_cast %105 : i32 to index
    %c0_90 = arith.constant 0 : index
    %c0_91 = arith.constant 0 : index
    %107 = vector.load %arg3[%106, %c0_90, %c0_91] : memref<64x1x128xf32, #tpu.memory_space<vmem>>, vector<1x1x128xf32>
    %108 = vector.shape_cast %107 : vector<1x1x128xf32> to vector<1x128xf32>
    %c7_92 = arith.constant 7 : index
    %c0_93 = arith.constant 0 : index
    %109 = vector.load %arg4[%c7_92, %c0_93] : memref<8x128xf32, #tpu.memory_space<vmem>>, vector<1x128xf32>
    %110 = arith.addf %108, %109 : vector<1x128xf32>
    %c15_94 = arith.constant 15 : index
    %c0_95 = arith.constant 0 : index
    %111 = vector.load %arg14[%c15_94, %c0_95] : memref<16x128xf32, #tpu.memory_space<vmem>>, vector<1x128xf32>
    tpu.vector_store %arg14[%c15_94, %c0_95], %110 {strides = array<i32>} : memref<16x128xf32, #tpu.memory_space<vmem>>, vector<1x128xf32>,
    %c0_96 = arith.constant 0 : index
    %c0_97 = arith.constant 0 : index
    %112 = vector.load %arg14[%c0_96, %c0_97] : memref<16x128xf32, #tpu.memory_space<vmem>>, vector<16x128xf32>
    %c0_98 = arith.constant 0 : index
    %c0_99 = arith.constant 0 : index
    %113 = vector.load %arg5[%c0_98, %c0_99] : memref<2x128xf32, #tpu.memory_space<vmem>>, vector<1x128xf32>
    %c1_100 = arith.constant 1 : index
    %c0_101 = arith.constant 0 : index
    %114 = vector.load %arg5[%c1_100, %c0_101] : memref<2x128xf32, #tpu.memory_space<vmem>>, vector<1x128xf32>
    %cst = arith.constant dense<0.000000e+00> : vector<16xf32>
    %115 = vector.multi_reduction <add>, %112, %cst [1] : vector<16x128xf32> to vector<16xf32>
    %116 = vector.shape_cast %115 : vector<16xf32> to vector<16x1xf32>
    %cst_102 = arith.constant 3.125000e-02 : f32
    %117 = vector.broadcast %cst_102 : f32 to vector<16x1xf32>
    %118 = arith.mulf %116, %117 : vector<16x1xf32>
    %119 = arith.mulf %112, %112 : vector<16x128xf32>
    %cst_103 = arith.constant dense<0.000000e+00> : vector<16xf32>
    %120 = vector.multi_reduction <add>, %119, %cst_103 [1] : vector<16x128xf32> to vector<16xf32>
    %121 = vector.shape_cast %120 : vector<16xf32> to vector<16x1xf32>
    %cst_104 = arith.constant 3.125000e-02 : f32
    %122 = vector.broadcast %cst_104 : f32 to vector<16x1xf32>
    %123 = arith.mulf %121, %122 : vector<16x1xf32>
    %124 = arith.mulf %118, %118 : vector<16x1xf32>
    %125 = arith.subf %123, %124 : vector<16x1xf32>
    %cst_105 = arith.constant 0.000000e+00 : f32
    %126 = vector.broadcast %cst_105 : f32 to vector<16x1xf32>
    %127 = arith.maximumf %125, %126 : vector<16x1xf32>
    %128 = vector.broadcast %118 : vector<16x1xf32> to vector<16x128xf32>
    %129 = arith.subf %112, %128 : vector<16x128xf32>
    %cst_106 = arith.constant 9.99999996E-13 : f32
    %130 = vector.broadcast %cst_106 : f32 to vector<16x1xf32>
    %131 = arith.addf %127, %130 : vector<16x1xf32>
    %132 = math.rsqrt %131 : vector<16x1xf32>
    %133 = vector.broadcast %132 : vector<16x1xf32> to vector<16x128xf32>
    %134 = arith.mulf %129, %133 : vector<16x128xf32>
    %135 = vector.broadcast %113 : vector<1x128xf32> to vector<16x128xf32>
    %136 = arith.mulf %134, %135 : vector<16x128xf32>
    %137 = vector.broadcast %114 : vector<1x128xf32> to vector<16x128xf32>
    %138 = arith.addf %136, %137 : vector<16x128xf32>
    %c0_107 = arith.constant 0 : index
    %c0_108 = arith.constant 0 : index
    %c0_109 = arith.constant 0 : index
    %139 = vector.load %arg13[%c0_107, %c0_108, %c0_109] : memref<3x16x128xf32, #tpu.memory_space<vmem>>, vector<1x16x128xf32>
    %140 = vector.shape_cast %139 : vector<1x16x128xf32> to vector<16x128xf32>
    %141 = vector.shape_cast %138 : vector<16x128xf32> to vector<1x16x128xf32>
    tpu.vector_store %arg13[%c0_107, %c0_108, %c0_109], %141 {strides = array<i32>} : memref<3x16x128xf32, #tpu.memory_space<vmem>>, vector<1x16x128xf32>,
    %142 = tpu.iota {dimensions = array<i32: 0>} : vector<16x16xi32>
    %143 = tpu.iota {dimensions = array<i32: 1>} : vector<16x16xi32>
    %cst_110 = arith.constant 0.000000e+00 : f32
    %144 = vector.broadcast %cst_110 : f32 to vector<16x16xf32>
    %c0_i32 = arith.constant 0 : i32
    %145 = vector.broadcast %c0_i32 : i32 to vector<16x16xi32>
    %146 = arith.cmpi sge, %142, %145 : vector<16x16xi32>
    %c8_i32 = arith.constant 8 : i32
    %147 = vector.broadcast %c8_i32 : i32 to vector<16x16xi32>
    %148 = arith.cmpi slt, %142, %147 : vector<16x16xi32>
    %149 = arith.andi %146, %148 : vector<16x16xi1>
    %cst_111 = arith.constant 1.000000e+00 : f32
    %cst_112 = arith.constant 0.000000e+00 : f32
    %150 = vector.broadcast %cst_111 : f32 to vector<16x16xf32>
    %151 = vector.broadcast %cst_112 : f32 to vector<16x16xf32>
    %152 = arith.select %149, %150, %151 : vector<16x16xi1>, vector<16x16xf32>
    %c0_i32_113 = arith.constant 0 : i32
    %153 = vector.broadcast %c0_i32_113 : i32 to vector<16x16xi32>
    %154 = arith.cmpi sge, %143, %153 : vector<16x16xi32>
    %c8_i32_114 = arith.constant 8 : i32
    %155 = vector.broadcast %c8_i32_114 : i32 to vector<16x16xi32>
    %156 = arith.cmpi slt, %143, %155 : vector<16x16xi32>
    %157 = arith.andi %154, %156 : vector<16x16xi1>
    %cst_115 = arith.constant 1.000000e+00 : f32
    %cst_116 = arith.constant 0.000000e+00 : f32
    %158 = vector.broadcast %cst_115 : f32 to vector<16x16xf32>
    %159 = vector.broadcast %cst_116 : f32 to vector<16x16xf32>
    %160 = arith.select %157, %158, %159 : vector<16x16xi1>, vector<16x16xf32>
    %161 = arith.mulf %152, %160 : vector<16x16xf32>
    %162 = arith.addf %144, %161 : vector<16x16xf32>
    %c8_i32_117 = arith.constant 8 : i32
    %163 = vector.broadcast %c8_i32_117 : i32 to vector<16x16xi32>
    %164 = arith.cmpi sge, %142, %163 : vector<16x16xi32>
    %c16_i32 = arith.constant 16 : i32
    %165 = vector.broadcast %c16_i32 : i32 to vector<16x16xi32>
    %166 = arith.cmpi slt, %142, %165 : vector<16x16xi32>
    %167 = arith.andi %164, %166 : vector<16x16xi1>
    %cst_118 = arith.constant 1.000000e+00 : f32
    %cst_119 = arith.constant 0.000000e+00 : f32
    %168 = vector.broadcast %cst_118 : f32 to vector<16x16xf32>
    %169 = vector.broadcast %cst_119 : f32 to vector<16x16xf32>
    %170 = arith.select %167, %168, %169 : vector<16x16xi1>, vector<16x16xf32>
    %c8_i32_120 = arith.constant 8 : i32
    %171 = vector.broadcast %c8_i32_120 : i32 to vector<16x16xi32>
    %172 = arith.cmpi sge, %143, %171 : vector<16x16xi32>
    %c16_i32_121 = arith.constant 16 : i32
    %173 = vector.broadcast %c16_i32_121 : i32 to vector<16x16xi32>
    %174 = arith.cmpi slt, %143, %173 : vector<16x16xi32>
    %175 = arith.andi %172, %174 : vector<16x16xi1>
    %cst_122 = arith.constant 1.000000e+00 : f32
    %cst_123 = arith.constant 0.000000e+00 : f32
    %176 = vector.broadcast %cst_122 : f32 to vector<16x16xf32>
    %177 = vector.broadcast %cst_123 : f32 to vector<16x16xf32>
    %178 = arith.select %175, %176, %177 : vector<16x16xi1>, vector<16x16xf32>
    %179 = arith.mulf %170, %178 : vector<16x16xf32>
    %180 = arith.addf %162, %179 : vector<16x16xf32>
    %c0_124 = arith.constant 0 : index
    %c0_125 = arith.constant 0 : index
    %181 = vector.load %arg2[%c0_124, %c0_125] : memref<1x16xf32, #tpu.memory_space<vmem>>, vector<1x16xf32>
    %182 = vector.broadcast %181 : vector<1x16xf32> to vector<16x16xf32>
    %183 = arith.mulf %180, %182 : vector<16x16xf32>
    %cst_126 = arith.constant 1.000000e+00 : f32
    %184 = vector.broadcast %cst_126 : f32 to vector<16x16xf32>
    %185 = arith.subf %184, %183 : vector<16x16xf32>
    %cst_127 = arith.constant -1.000000e+09 : f32
    %186 = vector.broadcast %cst_127 : f32 to vector<16x16xf32>
    %187 = arith.mulf %185, %186 : vector<16x16xf32>
    %188 = arith.truncf %138 : vector<16x128xf32> to vector<16x128xbf16>
    %c0_128 = arith.constant 0 : index
    %c0_129 = arith.constant 0 : index
    %c0_130 = arith.constant 0 : index
    %189 = vector.load %arg6[%c0_128, %c0_129, %c0_130] : memref<2x128x768xbf16, #tpu.memory_space<vmem>>, vector<1x128x768xbf16>
    %190 = vector.shape_cast %189 : vector<1x128x768xbf16> to vector<128x768xbf16>
    %cst_131 = arith.constant dense<0.000000e+00> : vector<16x768xf32>
    %191 = tpu.matmul %188, %190, %cst_131 {dimension_numbers = #tpu.dot_dimension_numbers<[1], [0], [0], [1], [0, 0, 1, 1], [], []>} : vector<16x128xbf16>, vector<128x768xbf16>, vector<16x768xf32> -> vector<16x768xf32>
    %c0_132 = arith.constant 0 : index
    %c0_133 = arith.constant 0 : index
    %c0_134 = arith.constant 0 : index
    %192 = vector.load %arg7[%c0_132, %c0_133, %c0_134] : memref<2x1x768xf32, #tpu.memory_space<vmem>>, vector<1x1x768xf32>
    %193 = vector.shape_cast %192 : vector<1x1x768xf32> to vector<1x768xf32>
    %194 = vector.broadcast %193 : vector<1x768xf32> to vector<16x768xf32>
    %195 = arith.addf %191, %194 : vector<16x768xf32>
    %196 = vector.extract_strided_slice %195 {offsets = [0, 0], sizes = [16, 256], strides = [1, 1]} : vector<16x768xf32> to vector<16x256xf32>
    %cst_135 = arith.constant 2.500000e-01 : f32
    %197 = vector.broadcast %cst_135 : f32 to vector<16x256xf32>
    %198 = arith.mulf %196, %197 : vector<16x256xf32>
    %199 = arith.truncf %198 : vector<16x256xf32> to vector<16x256xbf16>
    %200 = vector.extract_strided_slice %195 {offsets = [0, 256], sizes = [16, 256], strides = [1, 1]} : vector<16x768xf32> to vector<16x256xf32>
    %201 = arith.truncf %200 : vector<16x256xf32> to vector<16x256xbf16>
    %202 = vector.extract_strided_slice %195 {offsets = [0, 512], sizes = [16, 256], strides = [1, 1]} : vector<16x768xf32> to vector<16x256xf32>
    %203 = arith.truncf %202 : vector<16x256xf32> to vector<16x256xbf16>
    %cst_136 = arith.constant 0.000000e+00 : f32
    %204 = vector.broadcast %cst_136 : f32 to vector<16x128xf32>
    %205 = vector.extract_strided_slice %199 {offsets = [0, 0], sizes = [16, 128], strides = [1, 1]} : vector<16x256xbf16> to vector<16x128xbf16>
    %206 = vector.extract_strided_slice %201 {offsets = [0, 0], sizes = [16, 128], strides = [1, 1]} : vector<16x256xbf16> to vector<16x128xbf16>
    %207 = vector.extract_strided_slice %203 {offsets = [0, 0], sizes = [16, 128], strides = [1, 1]} : vector<16x256xbf16> to vector<16x128xbf16>
    %cst_137 = arith.constant dense<0.000000e+00> : vector<16x16xf32>
    %208 = tpu.matmul %205, %206, %cst_137 {dimension_numbers = #tpu.dot_dimension_numbers<[1], [1], [0], [0], [0, 0, 1, 0], [], []>} : vector<16x128xbf16>, vector<16x128xbf16>, vector<16x16xf32> -> vector<16x16xf32>
    %209 = arith.addf %208, %187 : vector<16x16xf32>
    %cst_138 = arith.constant dense<0xFF800000> : vector<16xf32>
    %210 = vector.multi_reduction <maximumf>, %209, %cst_138 [1] : vector<16x16xf32> to vector<16xf32>
    %211 = vector.shape_cast %210 : vector<16xf32> to vector<16x1xf32>
    %212 = vector.broadcast %211 : vector<16x1xf32> to vector<16x16xf32>
    %213 = arith.subf %209, %212 : vector<16x16xf32>
    %214 = math.exp %213 : vector<16x16xf32>
    %cst_139 = arith.constant dense<0.000000e+00> : vector<16xf32>
    %215 = vector.multi_reduction <add>, %214, %cst_139 [1] : vector<16x16xf32> to vector<16xf32>
    %216 = vector.shape_cast %215 : vector<16xf32> to vector<16x1xf32>
    %217 = tpu.reciprocal %216 : vector<16x1xf32> -> vector<16x1xf32>
    %218 = vector.broadcast %217 : vector<16x1xf32> to vector<16x16xf32>
    %219 = arith.mulf %214, %218 : vector<16x16xf32>
    %220 = arith.truncf %219 : vector<16x16xf32> to vector<16x16xbf16>
    %cst_140 = arith.constant dense<0.000000e+00> : vector<16x128xf32>
    %221 = tpu.matmul %220, %207, %cst_140 {dimension_numbers = #tpu.dot_dimension_numbers<[1], [0], [0], [1], [0, 0, 1, 1], [], []>} : vector<16x16xbf16>, vector<16x128xbf16>, vector<16x128xf32> -> vector<16x128xf32>
    %222 = arith.truncf %221 : vector<16x128xf32> to vector<16x128xbf16>
    %c0_141 = arith.constant 0 : index
    %c0_142 = arith.constant 0 : index
    %c0_143 = arith.constant 0 : index
    %c0_144 = arith.constant 0 : index
    %223 = vector.load %arg8[%c0_141, %c0_142, %c0_143, %c0_144] : memref<2x2x128x128xbf16, #tpu.memory_space<vmem>>, vector<1x1x128x128xbf16>
    %224 = vector.shape_cast %223 : vector<1x1x128x128xbf16> to vector<128x128xbf16>
    %cst_145 = arith.constant dense<0.000000e+00> : vector<16x128xf32>
    %225 = tpu.matmul %222, %224, %cst_145 {dimension_numbers = #tpu.dot_dimension_numbers<[1], [0], [0], [1], [0, 0, 1, 1], [], []>} : vector<16x128xbf16>, vector<128x128xbf16>, vector<16x128xf32> -> vector<16x128xf32>
    %226 = arith.addf %204, %225 : vector<16x128xf32>
    %227 = vector.extract_strided_slice %199 {offsets = [0, 128], sizes = [16, 128], strides = [1, 1]} : vector<16x256xbf16> to vector<16x128xbf16>
    %228 = vector.extract_strided_slice %201 {offsets = [0, 128], sizes = [16, 128], strides = [1, 1]} : vector<16x256xbf16> to vector<16x128xbf16>
    %229 = vector.extract_strided_slice %203 {offsets = [0, 128], sizes = [16, 128], strides = [1, 1]} : vector<16x256xbf16> to vector<16x128xbf16>
    %cst_146 = arith.constant dense<0.000000e+00> : vector<16x16xf32>
    %230 = tpu.matmul %227, %228, %cst_146 {dimension_numbers = #tpu.dot_dimension_numbers<[1], [1], [0], [0], [0, 0, 1, 0], [], []>} : vector<16x128xbf16>, vector<16x128xbf16>, vector<16x16xf32> -> vector<16x16xf32>
    %231 = arith.addf %230, %187 : vector<16x16xf32>
    %cst_147 = arith.constant dense<0xFF800000> : vector<16xf32>
    %232 = vector.multi_reduction <maximumf>, %231, %cst_147 [1] : vector<16x16xf32> to vector<16xf32>
    %233 = vector.shape_cast %232 : vector<16xf32> to vector<16x1xf32>
    %234 = vector.broadcast %233 : vector<16x1xf32> to vector<16x16xf32>
    %235 = arith.subf %231, %234 : vector<16x16xf32>
    %236 = math.exp %235 : vector<16x16xf32>
    %cst_148 = arith.constant dense<0.000000e+00> : vector<16xf32>
    %237 = vector.multi_reduction <add>, %236, %cst_148 [1] : vector<16x16xf32> to vector<16xf32>
    %238 = vector.shape_cast %237 : vector<16xf32> to vector<16x1xf32>
    %239 = tpu.reciprocal %238 : vector<16x1xf32> -> vector<16x1xf32>
    %240 = vector.broadcast %239 : vector<16x1xf32> to vector<16x16xf32>
    %241 = arith.mulf %236, %240 : vector<16x16xf32>
    %242 = arith.truncf %241 : vector<16x16xf32> to vector<16x16xbf16>
    %cst_149 = arith.constant dense<0.000000e+00> : vector<16x128xf32>
    %243 = tpu.matmul %242, %229, %cst_149 {dimension_numbers = #tpu.dot_dimension_numbers<[1], [0], [0], [1], [0, 0, 1, 1], [], []>} : vector<16x16xbf16>, vector<16x128xbf16>, vector<16x128xf32> -> vector<16x128xf32>
    %244 = arith.truncf %243 : vector<16x128xf32> to vector<16x128xbf16>
    %c0_150 = arith.constant 0 : index
    %c1_151 = arith.constant 1 : index
    %c0_152 = arith.constant 0 : index
    %c0_153 = arith.constant 0 : index
    %245 = vector.load %arg8[%c0_150, %c1_151, %c0_152, %c0_153] : memref<2x2x128x128xbf16, #tpu.memory_space<vmem>>, vector<1x1x128x128xbf16>
    %246 = vector.shape_cast %245 : vector<1x1x128x128xbf16> to vector<128x128xbf16>
    %cst_154 = arith.constant dense<0.000000e+00> : vector<16x128xf32>
    %247 = tpu.matmul %244, %246, %cst_154 {dimension_numbers = #tpu.dot_dimension_numbers<[1], [0], [0], [1], [0, 0, 1, 1], [], []>} : vector<16x128xbf16>, vector<128x128xbf16>, vector<16x128xf32> -> vector<16x128xf32>
    %248 = arith.addf %226, %247 : vector<16x128xf32>
    %c0_155 = arith.constant 0 : index
    %c0_156 = arith.constant 0 : index
    %c0_157 = arith.constant 0 : index
    %249 = vector.load %arg11[%c0_155, %c0_156, %c0_157] : memref<2x6x128xf32, #tpu.memory_space<vmem>>, vector<1x1x128xf32>
    %250 = vector.shape_cast %249 : vector<1x1x128xf32> to vector<1x128xf32>
    %251 = vector.broadcast %250 : vector<1x128xf32> to vector<16x128xf32>
    %252 = arith.addf %248, %251 : vector<16x128xf32>
    %253 = arith.addf %138, %252 : vector<16x128xf32>
    %c0_158 = arith.constant 0 : index
    %c1_159 = arith.constant 1 : index
    %c0_160 = arith.constant 0 : index
    %254 = vector.load %arg11[%c0_158, %c1_159, %c0_160] : memref<2x6x128xf32, #tpu.memory_space<vmem>>, vector<1x1x128xf32>
    %255 = vector.shape_cast %254 : vector<1x1x128xf32> to vector<1x128xf32>
    %c0_161 = arith.constant 0 : index
    %c2_162 = arith.constant 2 : index
    %c0_163 = arith.constant 0 : index
    %256 = vector.load %arg11[%c0_161, %c2_162, %c0_163] : memref<2x6x128xf32, #tpu.memory_space<vmem>>, vector<1x1x128xf32>
    %257 = vector.shape_cast %256 : vector<1x1x128xf32> to vector<1x128xf32>
    %cst_164 = arith.constant dense<0.000000e+00> : vector<16xf32>
    %258 = vector.multi_reduction <add>, %253, %cst_164 [1] : vector<16x128xf32> to vector<16xf32>
    %259 = vector.shape_cast %258 : vector<16xf32> to vector<16x1xf32>
    %cst_165 = arith.constant 3.125000e-02 : f32
    %260 = vector.broadcast %cst_165 : f32 to vector<16x1xf32>
    %261 = arith.mulf %259, %260 : vector<16x1xf32>
    %262 = arith.mulf %253, %253 : vector<16x128xf32>
    %cst_166 = arith.constant dense<0.000000e+00> : vector<16xf32>
    %263 = vector.multi_reduction <add>, %262, %cst_166 [1] : vector<16x128xf32> to vector<16xf32>
    %264 = vector.shape_cast %263 : vector<16xf32> to vector<16x1xf32>
    %cst_167 = arith.constant 3.125000e-02 : f32
    %265 = vector.broadcast %cst_167 : f32 to vector<16x1xf32>
    %266 = arith.mulf %264, %265 : vector<16x1xf32>
    %267 = arith.mulf %261, %261 : vector<16x1xf32>
    %268 = arith.subf %266, %267 : vector<16x1xf32>
    %cst_168 = arith.constant 0.000000e+00 : f32
    %269 = vector.broadcast %cst_168 : f32 to vector<16x1xf32>
    %270 = arith.maximumf %268, %269 : vector<16x1xf32>
    %271 = vector.broadcast %261 : vector<16x1xf32> to vector<16x128xf32>
    %272 = arith.subf %253, %271 : vector<16x128xf32>
    %cst_169 = arith.constant 9.99999996E-13 : f32
    %273 = vector.broadcast %cst_169 : f32 to vector<16x1xf32>
    %274 = arith.addf %270, %273 : vector<16x1xf32>
    %275 = math.rsqrt %274 : vector<16x1xf32>
    %276 = vector.broadcast %275 : vector<16x1xf32> to vector<16x128xf32>
    %277 = arith.mulf %272, %276 : vector<16x128xf32>
    %278 = vector.broadcast %255 : vector<1x128xf32> to vector<16x128xf32>
    %279 = arith.mulf %277, %278 : vector<16x128xf32>
    %280 = vector.broadcast %257 : vector<1x128xf32> to vector<16x128xf32>
    %281 = arith.addf %279, %280 : vector<16x128xf32>
    %282 = arith.truncf %281 : vector<16x128xf32> to vector<16x128xbf16>
    %c0_170 = arith.constant 0 : index
    %c0_171 = arith.constant 0 : index
    %c0_172 = arith.constant 0 : index
    %283 = vector.load %arg9[%c0_170, %c0_171, %c0_172] : memref<2x128x128xbf16, #tpu.memory_space<vmem>>, vector<1x128x128xbf16>
    %284 = vector.shape_cast %283 : vector<1x128x128xbf16> to vector<128x128xbf16>
    %cst_173 = arith.constant dense<0.000000e+00> : vector<16x128xf32>
    %285 = tpu.matmul %282, %284, %cst_173 {dimension_numbers = #tpu.dot_dimension_numbers<[1], [0], [0], [1], [0, 0, 1, 1], [], []>} : vector<16x128xbf16>, vector<128x128xbf16>, vector<16x128xf32> -> vector<16x128xf32>
    %c0_174 = arith.constant 0 : index
    %c0_175 = arith.constant 0 : index
    %c0_176 = arith.constant 0 : index
    %286 = vector.load %arg12[%c0_174, %c0_175, %c0_176] : memref<2x1x128xf32, #tpu.memory_space<vmem>>, vector<1x1x128xf32>
    %287 = vector.shape_cast %286 : vector<1x1x128xf32> to vector<1x128xf32>
    %288 = vector.broadcast %287 : vector<1x128xf32> to vector<16x128xf32>
    %289 = arith.addf %285, %288 : vector<16x128xf32>
    %cst_177 = arith.constant 5.000000e-01 : f32
    %290 = vector.broadcast %cst_177 : f32 to vector<16x128xf32>
    %291 = arith.mulf %290, %289 : vector<16x128xf32>
    %cst_178 = arith.constant 4.471500e-02 : f32
    %292 = vector.broadcast %cst_178 : f32 to vector<16x128xf32>
    %293 = arith.mulf %292, %289 : vector<16x128xf32>
    %294 = arith.mulf %293, %289 : vector<16x128xf32>
    %295 = arith.mulf %294, %289 : vector<16x128xf32>
    %296 = arith.addf %289, %295 : vector<16x128xf32>
    %cst_179 = arith.constant 0.797884583 : f32
    %297 = vector.broadcast %cst_179 : f32 to vector<16x128xf32>
    %298 = arith.mulf %297, %296 : vector<16x128xf32>
    %299 = math.tanh %298 : vector<16x128xf32>
    %cst_180 = arith.constant 1.000000e+00 : f32
    %300 = vector.broadcast %cst_180 : f32 to vector<16x128xf32>
    %301 = arith.addf %300, %299 : vector<16x128xf32>
    %302 = arith.mulf %291, %301 : vector<16x128xf32>
    %303 = arith.truncf %302 : vector<16x128xf32> to vector<16x128xbf16>
    %c0_181 = arith.constant 0 : index
    %c0_182 = arith.constant 0 : index
    %c0_183 = arith.constant 0 : index
    %304 = vector.load %arg10[%c0_181, %c0_182, %c0_183] : memref<2x128x128xbf16, #tpu.memory_space<vmem>>, vector<1x128x128xbf16>
    %305 = vector.shape_cast %304 : vector<1x128x128xbf16> to vector<128x128xbf16>
    %cst_184 = arith.constant dense<0.000000e+00> : vector<16x128xf32>
    %306 = tpu.matmul %303, %305, %cst_184 {dimension_numbers = #tpu.dot_dimension_numbers<[1], [0], [0], [1], [0, 0, 1, 1], [], []>} : vector<16x128xbf16>, vector<128x128xbf16>, vector<16x128xf32> -> vector<16x128xf32>
    %c0_185 = arith.constant 0 : index
    %c3_186 = arith.constant 3 : index
    %c0_187 = arith.constant 0 : index
    %307 = vector.load %arg11[%c0_185, %c3_186, %c0_187] : memref<2x6x128xf32, #tpu.memory_space<vmem>>, vector<1x1x128xf32>
    %308 = vector.shape_cast %307 : vector<1x1x128xf32> to vector<1x128xf32>
    %309 = vector.broadcast %308 : vector<1x128xf32> to vector<16x128xf32>
    %310 = arith.addf %306, %309 : vector<16x128xf32>
    %311 = arith.addf %281, %310 : vector<16x128xf32>
    %c0_188 = arith.constant 0 : index
    %c4_189 = arith.constant 4 : index
    %c0_190 = arith.constant 0 : index
    %312 = vector.load %arg11[%c0_188, %c4_189, %c0_190] : memref<2x6x128xf32, #tpu.memory_space<vmem>>, vector<1x1x128xf32>
    %313 = vector.shape_cast %312 : vector<1x1x128xf32> to vector<1x128xf32>
    %c0_191 = arith.constant 0 : index
    %c5_192 = arith.constant 5 : index
    %c0_193 = arith.constant 0 : index
    %314 = vector.load %arg11[%c0_191, %c5_192, %c0_193] : memref<2x6x128xf32, #tpu.memory_space<vmem>>, vector<1x1x128xf32>
    %315 = vector.shape_cast %314 : vector<1x1x128xf32> to vector<1x128xf32>
    %cst_194 = arith.constant dense<0.000000e+00> : vector<16xf32>
    %316 = vector.multi_reduction <add>, %311, %cst_194 [1] : vector<16x128xf32> to vector<16xf32>
    %317 = vector.shape_cast %316 : vector<16xf32> to vector<16x1xf32>
    %cst_195 = arith.constant 3.125000e-02 : f32
    %318 = vector.broadcast %cst_195 : f32 to vector<16x1xf32>
    %319 = arith.mulf %317, %318 : vector<16x1xf32>
    %320 = arith.mulf %311, %311 : vector<16x128xf32>
    %cst_196 = arith.constant dense<0.000000e+00> : vector<16xf32>
    %321 = vector.multi_reduction <add>, %320, %cst_196 [1] : vector<16x128xf32> to vector<16xf32>
    %322 = vector.shape_cast %321 : vector<16xf32> to vector<16x1xf32>
    %cst_197 = arith.constant 3.125000e-02 : f32
    %323 = vector.broadcast %cst_197 : f32 to vector<16x1xf32>
    %324 = arith.mulf %322, %323 : vector<16x1xf32>
    %325 = arith.mulf %319, %319 : vector<16x1xf32>
    %326 = arith.subf %324, %325 : vector<16x1xf32>
    %cst_198 = arith.constant 0.000000e+00 : f32
    %327 = vector.broadcast %cst_198 : f32 to vector<16x1xf32>
    %328 = arith.maximumf %326, %327 : vector<16x1xf32>
    %329 = vector.broadcast %319 : vector<16x1xf32> to vector<16x128xf32>
    %330 = arith.subf %311, %329 : vector<16x128xf32>
    %cst_199 = arith.constant 9.99999996E-13 : f32
    %331 = vector.broadcast %cst_199 : f32 to vector<16x1xf32>
    %332 = arith.addf %328, %331 : vector<16x1xf32>
    %333 = math.rsqrt %332 : vector<16x1xf32>
    %334 = vector.broadcast %333 : vector<16x1xf32> to vector<16x128xf32>
    %335 = arith.mulf %330, %334 : vector<16x128xf32>
    %336 = vector.broadcast %313 : vector<1x128xf32> to vector<16x128xf32>
    %337 = arith.mulf %335, %336 : vector<16x128xf32>
    %338 = vector.broadcast %315 : vector<1x128xf32> to vector<16x128xf32>
    %339 = arith.addf %337, %338 : vector<16x128xf32>
    %c1_200 = arith.constant 1 : index
    %c0_201 = arith.constant 0 : index
    %c0_202 = arith.constant 0 : index
    %340 = vector.load %arg13[%c1_200, %c0_201, %c0_202] : memref<3x16x128xf32, #tpu.memory_space<vmem>>, vector<1x16x128xf32>
    %341 = vector.shape_cast %340 : vector<1x16x128xf32> to vector<16x128xf32>
    %342 = vector.shape_cast %339 : vector<16x128xf32> to vector<1x16x128xf32>
    tpu.vector_store %arg13[%c1_200, %c0_201, %c0_202], %342 {strides = array<i32>} : memref<3x16x128xf32, #tpu.memory_space<vmem>>, vector<1x16x128xf32>,
    %343 = arith.truncf %339 : vector<16x128xf32> to vector<16x128xbf16>
    %c1_203 = arith.constant 1 : index
    %c0_204 = arith.constant 0 : index
    %c0_205 = arith.constant 0 : index
    %344 = vector.load %arg6[%c1_203, %c0_204, %c0_205] : memref<2x128x768xbf16, #tpu.memory_space<vmem>>, vector<1x128x768xbf16>
    %345 = vector.shape_cast %344 : vector<1x128x768xbf16> to vector<128x768xbf16>
    %cst_206 = arith.constant dense<0.000000e+00> : vector<16x768xf32>
    %346 = tpu.matmul %343, %345, %cst_206 {dimension_numbers = #tpu.dot_dimension_numbers<[1], [0], [0], [1], [0, 0, 1, 1], [], []>} : vector<16x128xbf16>, vector<128x768xbf16>, vector<16x768xf32> -> vector<16x768xf32>
    %c1_207 = arith.constant 1 : index
    %c0_208 = arith.constant 0 : index
    %c0_209 = arith.constant 0 : index
    %347 = vector.load %arg7[%c1_207, %c0_208, %c0_209] : memref<2x1x768xf32, #tpu.memory_space<vmem>>, vector<1x1x768xf32>
    %348 = vector.shape_cast %347 : vector<1x1x768xf32> to vector<1x768xf32>
    %349 = vector.broadcast %348 : vector<1x768xf32> to vector<16x768xf32>
    %350 = arith.addf %346, %349 : vector<16x768xf32>
    %351 = vector.extract_strided_slice %350 {offsets = [0, 0], sizes = [16, 256], strides = [1, 1]} : vector<16x768xf32> to vector<16x256xf32>
    %cst_210 = arith.constant 2.500000e-01 : f32
    %352 = vector.broadcast %cst_210 : f32 to vector<16x256xf32>
    %353 = arith.mulf %351, %352 : vector<16x256xf32>
    %354 = arith.truncf %353 : vector<16x256xf32> to vector<16x256xbf16>
    %355 = vector.extract_strided_slice %350 {offsets = [0, 256], sizes = [16, 256], strides = [1, 1]} : vector<16x768xf32> to vector<16x256xf32>
    %356 = arith.truncf %355 : vector<16x256xf32> to vector<16x256xbf16>
    %357 = vector.extract_strided_slice %350 {offsets = [0, 512], sizes = [16, 256], strides = [1, 1]} : vector<16x768xf32> to vector<16x256xf32>
    %358 = arith.truncf %357 : vector<16x256xf32> to vector<16x256xbf16>
    %cst_211 = arith.constant 0.000000e+00 : f32
    %359 = vector.broadcast %cst_211 : f32 to vector<16x128xf32>
    %360 = vector.extract_strided_slice %354 {offsets = [0, 0], sizes = [16, 128], strides = [1, 1]} : vector<16x256xbf16> to vector<16x128xbf16>
    %361 = vector.extract_strided_slice %356 {offsets = [0, 0], sizes = [16, 128], strides = [1, 1]} : vector<16x256xbf16> to vector<16x128xbf16>
    %362 = vector.extract_strided_slice %358 {offsets = [0, 0], sizes = [16, 128], strides = [1, 1]} : vector<16x256xbf16> to vector<16x128xbf16>
    %cst_212 = arith.constant dense<0.000000e+00> : vector<16x16xf32>
    %363 = tpu.matmul %360, %361, %cst_212 {dimension_numbers = #tpu.dot_dimension_numbers<[1], [1], [0], [0], [0, 0, 1, 0], [], []>} : vector<16x128xbf16>, vector<16x128xbf16>, vector<16x16xf32> -> vector<16x16xf32>
    %364 = arith.addf %363, %187 : vector<16x16xf32>
    %cst_213 = arith.constant dense<0xFF800000> : vector<16xf32>
    %365 = vector.multi_reduction <maximumf>, %364, %cst_213 [1] : vector<16x16xf32> to vector<16xf32>
    %366 = vector.shape_cast %365 : vector<16xf32> to vector<16x1xf32>
    %367 = vector.broadcast %366 : vector<16x1xf32> to vector<16x16xf32>
    %368 = arith.subf %364, %367 : vector<16x16xf32>
    %369 = math.exp %368 : vector<16x16xf32>
    %cst_214 = arith.constant dense<0.000000e+00> : vector<16xf32>
    %370 = vector.multi_reduction <add>, %369, %cst_214 [1] : vector<16x16xf32> to vector<16xf32>
    %371 = vector.shape_cast %370 : vector<16xf32> to vector<16x1xf32>
    %372 = tpu.reciprocal %371 : vector<16x1xf32> -> vector<16x1xf32>
    %373 = vector.broadcast %372 : vector<16x1xf32> to vector<16x16xf32>
    %374 = arith.mulf %369, %373 : vector<16x16xf32>
    %375 = arith.truncf %374 : vector<16x16xf32> to vector<16x16xbf16>
    %cst_215 = arith.constant dense<0.000000e+00> : vector<16x128xf32>
    %376 = tpu.matmul %375, %362, %cst_215 {dimension_numbers = #tpu.dot_dimension_numbers<[1], [0], [0], [1], [0, 0, 1, 1], [], []>} : vector<16x16xbf16>, vector<16x128xbf16>, vector<16x128xf32> -> vector<16x128xf32>
    %377 = arith.truncf %376 : vector<16x128xf32> to vector<16x128xbf16>
    %c1_216 = arith.constant 1 : index
    %c0_217 = arith.constant 0 : index
    %c0_218 = arith.constant 0 : index
    %c0_219 = arith.constant 0 : index
    %378 = vector.load %arg8[%c1_216, %c0_217, %c0_218, %c0_219] : memref<2x2x128x128xbf16, #tpu.memory_space<vmem>>, vector<1x1x128x128xbf16>
    %379 = vector.shape_cast %378 : vector<1x1x128x128xbf16> to vector<128x128xbf16>
    %cst_220 = arith.constant dense<0.000000e+00> : vector<16x128xf32>
    %380 = tpu.matmul %377, %379, %cst_220 {dimension_numbers = #tpu.dot_dimension_numbers<[1], [0], [0], [1], [0, 0, 1, 1], [], []>} : vector<16x128xbf16>, vector<128x128xbf16>, vector<16x128xf32> -> vector<16x128xf32>
    %381 = arith.addf %359, %380 : vector<16x128xf32>
    %382 = vector.extract_strided_slice %354 {offsets = [0, 128], sizes = [16, 128], strides = [1, 1]} : vector<16x256xbf16> to vector<16x128xbf16>
    %383 = vector.extract_strided_slice %356 {offsets = [0, 128], sizes = [16, 128], strides = [1, 1]} : vector<16x256xbf16> to vector<16x128xbf16>
    %384 = vector.extract_strided_slice %358 {offsets = [0, 128], sizes = [16, 128], strides = [1, 1]} : vector<16x256xbf16> to vector<16x128xbf16>
    %cst_221 = arith.constant dense<0.000000e+00> : vector<16x16xf32>
    %385 = tpu.matmul %382, %383, %cst_221 {dimension_numbers = #tpu.dot_dimension_numbers<[1], [1], [0], [0], [0, 0, 1, 0], [], []>} : vector<16x128xbf16>, vector<16x128xbf16>, vector<16x16xf32> -> vector<16x16xf32>
    %386 = arith.addf %385, %187 : vector<16x16xf32>
    %cst_222 = arith.constant dense<0xFF800000> : vector<16xf32>
    %387 = vector.multi_reduction <maximumf>, %386, %cst_222 [1] : vector<16x16xf32> to vector<16xf32>
    %388 = vector.shape_cast %387 : vector<16xf32> to vector<16x1xf32>
    %389 = vector.broadcast %388 : vector<16x1xf32> to vector<16x16xf32>
    %390 = arith.subf %386, %389 : vector<16x16xf32>
    %391 = math.exp %390 : vector<16x16xf32>
    %cst_223 = arith.constant dense<0.000000e+00> : vector<16xf32>
    %392 = vector.multi_reduction <add>, %391, %cst_223 [1] : vector<16x16xf32> to vector<16xf32>
    %393 = vector.shape_cast %392 : vector<16xf32> to vector<16x1xf32>
    %394 = tpu.reciprocal %393 : vector<16x1xf32> -> vector<16x1xf32>
    %395 = vector.broadcast %394 : vector<16x1xf32> to vector<16x16xf32>
    %396 = arith.mulf %391, %395 : vector<16x16xf32>
    %397 = arith.truncf %396 : vector<16x16xf32> to vector<16x16xbf16>
    %cst_224 = arith.constant dense<0.000000e+00> : vector<16x128xf32>
    %398 = tpu.matmul %397, %384, %cst_224 {dimension_numbers = #tpu.dot_dimension_numbers<[1], [0], [0], [1], [0, 0, 1, 1], [], []>} : vector<16x16xbf16>, vector<16x128xbf16>, vector<16x128xf32> -> vector<16x128xf32>
    %399 = arith.truncf %398 : vector<16x128xf32> to vector<16x128xbf16>
    %c1_225 = arith.constant 1 : index
    %c1_226 = arith.constant 1 : index
    %c0_227 = arith.constant 0 : index
    %c0_228 = arith.constant 0 : index
    %400 = vector.load %arg8[%c1_225, %c1_226, %c0_227, %c0_228] : memref<2x2x128x128xbf16, #tpu.memory_space<vmem>>, vector<1x1x128x128xbf16>
    %401 = vector.shape_cast %400 : vector<1x1x128x128xbf16> to vector<128x128xbf16>
    %cst_229 = arith.constant dense<0.000000e+00> : vector<16x128xf32>
    %402 = tpu.matmul %399, %401, %cst_229 {dimension_numbers = #tpu.dot_dimension_numbers<[1], [0], [0], [1], [0, 0, 1, 1], [], []>} : vector<16x128xbf16>, vector<128x128xbf16>, vector<16x128xf32> -> vector<16x128xf32>
    %403 = arith.addf %381, %402 : vector<16x128xf32>
    %c1_230 = arith.constant 1 : index
    %c0_231 = arith.constant 0 : index
    %c0_232 = arith.constant 0 : index
    %404 = vector.load %arg11[%c1_230, %c0_231, %c0_232] : memref<2x6x128xf32, #tpu.memory_space<vmem>>, vector<1x1x128xf32>
    %405 = vector.shape_cast %404 : vector<1x1x128xf32> to vector<1x128xf32>
    %406 = vector.broadcast %405 : vector<1x128xf32> to vector<16x128xf32>
    %407 = arith.addf %403, %406 : vector<16x128xf32>
    %408 = arith.addf %339, %407 : vector<16x128xf32>
    %c1_233 = arith.constant 1 : index
    %c1_234 = arith.constant 1 : index
    %c0_235 = arith.constant 0 : index
    %409 = vector.load %arg11[%c1_233, %c1_234, %c0_235] : memref<2x6x128xf32, #tpu.memory_space<vmem>>, vector<1x1x128xf32>
    %410 = vector.shape_cast %409 : vector<1x1x128xf32> to vector<1x128xf32>
    %c1_236 = arith.constant 1 : index
    %c2_237 = arith.constant 2 : index
    %c0_238 = arith.constant 0 : index
    %411 = vector.load %arg11[%c1_236, %c2_237, %c0_238] : memref<2x6x128xf32, #tpu.memory_space<vmem>>, vector<1x1x128xf32>
    %412 = vector.shape_cast %411 : vector<1x1x128xf32> to vector<1x128xf32>
    %cst_239 = arith.constant dense<0.000000e+00> : vector<16xf32>
    %413 = vector.multi_reduction <add>, %408, %cst_239 [1] : vector<16x128xf32> to vector<16xf32>
    %414 = vector.shape_cast %413 : vector<16xf32> to vector<16x1xf32>
    %cst_240 = arith.constant 3.125000e-02 : f32
    %415 = vector.broadcast %cst_240 : f32 to vector<16x1xf32>
    %416 = arith.mulf %414, %415 : vector<16x1xf32>
    %417 = arith.mulf %408, %408 : vector<16x128xf32>
    %cst_241 = arith.constant dense<0.000000e+00> : vector<16xf32>
    %418 = vector.multi_reduction <add>, %417, %cst_241 [1] : vector<16x128xf32> to vector<16xf32>
    %419 = vector.shape_cast %418 : vector<16xf32> to vector<16x1xf32>
    %cst_242 = arith.constant 3.125000e-02 : f32
    %420 = vector.broadcast %cst_242 : f32 to vector<16x1xf32>
    %421 = arith.mulf %419, %420 : vector<16x1xf32>
    %422 = arith.mulf %416, %416 : vector<16x1xf32>
    %423 = arith.subf %421, %422 : vector<16x1xf32>
    %cst_243 = arith.constant 0.000000e+00 : f32
    %424 = vector.broadcast %cst_243 : f32 to vector<16x1xf32>
    %425 = arith.maximumf %423, %424 : vector<16x1xf32>
    %426 = vector.broadcast %416 : vector<16x1xf32> to vector<16x128xf32>
    %427 = arith.subf %408, %426 : vector<16x128xf32>
    %cst_244 = arith.constant 9.99999996E-13 : f32
    %428 = vector.broadcast %cst_244 : f32 to vector<16x1xf32>
    %429 = arith.addf %425, %428 : vector<16x1xf32>
    %430 = math.rsqrt %429 : vector<16x1xf32>
    %431 = vector.broadcast %430 : vector<16x1xf32> to vector<16x128xf32>
    %432 = arith.mulf %427, %431 : vector<16x128xf32>
    %433 = vector.broadcast %410 : vector<1x128xf32> to vector<16x128xf32>
    %434 = arith.mulf %432, %433 : vector<16x128xf32>
    %435 = vector.broadcast %412 : vector<1x128xf32> to vector<16x128xf32>
    %436 = arith.addf %434, %435 : vector<16x128xf32>
    %437 = arith.truncf %436 : vector<16x128xf32> to vector<16x128xbf16>
    %c1_245 = arith.constant 1 : index
    %c0_246 = arith.constant 0 : index
    %c0_247 = arith.constant 0 : index
    %438 = vector.load %arg9[%c1_245, %c0_246, %c0_247] : memref<2x128x128xbf16, #tpu.memory_space<vmem>>, vector<1x128x128xbf16>
    %439 = vector.shape_cast %438 : vector<1x128x128xbf16> to vector<128x128xbf16>
    %cst_248 = arith.constant dense<0.000000e+00> : vector<16x128xf32>
    %440 = tpu.matmul %437, %439, %cst_248 {dimension_numbers = #tpu.dot_dimension_numbers<[1], [0], [0], [1], [0, 0, 1, 1], [], []>} : vector<16x128xbf16>, vector<128x128xbf16>, vector<16x128xf32> -> vector<16x128xf32>
    %c1_249 = arith.constant 1 : index
    %c0_250 = arith.constant 0 : index
    %c0_251 = arith.constant 0 : index
    %441 = vector.load %arg12[%c1_249, %c0_250, %c0_251] : memref<2x1x128xf32, #tpu.memory_space<vmem>>, vector<1x1x128xf32>
    %442 = vector.shape_cast %441 : vector<1x1x128xf32> to vector<1x128xf32>
    %443 = vector.broadcast %442 : vector<1x128xf32> to vector<16x128xf32>
    %444 = arith.addf %440, %443 : vector<16x128xf32>
    %cst_252 = arith.constant 5.000000e-01 : f32
    %445 = vector.broadcast %cst_252 : f32 to vector<16x128xf32>
    %446 = arith.mulf %445, %444 : vector<16x128xf32>
    %cst_253 = arith.constant 4.471500e-02 : f32
    %447 = vector.broadcast %cst_253 : f32 to vector<16x128xf32>
    %448 = arith.mulf %447, %444 : vector<16x128xf32>
    %449 = arith.mulf %448, %444 : vector<16x128xf32>
    %450 = arith.mulf %449, %444 : vector<16x128xf32>
    %451 = arith.addf %444, %450 : vector<16x128xf32>
    %cst_254 = arith.constant 0.797884583 : f32
    %452 = vector.broadcast %cst_254 : f32 to vector<16x128xf32>
    %453 = arith.mulf %452, %451 : vector<16x128xf32>
    %454 = math.tanh %453 : vector<16x128xf32>
    %cst_255 = arith.constant 1.000000e+00 : f32
    %455 = vector.broadcast %cst_255 : f32 to vector<16x128xf32>
    %456 = arith.addf %455, %454 : vector<16x128xf32>
    %457 = arith.mulf %446, %456 : vector<16x128xf32>
    %458 = arith.truncf %457 : vector<16x128xf32> to vector<16x128xbf16>
    %c1_256 = arith.constant 1 : index
    %c0_257 = arith.constant 0 : index
    %c0_258 = arith.constant 0 : index
    %459 = vector.load %arg10[%c1_256, %c0_257, %c0_258] : memref<2x128x128xbf16, #tpu.memory_space<vmem>>, vector<1x128x128xbf16>
    %460 = vector.shape_cast %459 : vector<1x128x128xbf16> to vector<128x128xbf16>
    %cst_259 = arith.constant dense<0.000000e+00> : vector<16x128xf32>
    %461 = tpu.matmul %458, %460, %cst_259 {dimension_numbers = #tpu.dot_dimension_numbers<[1], [0], [0], [1], [0, 0, 1, 1], [], []>} : vector<16x128xbf16>, vector<128x128xbf16>, vector<16x128xf32> -> vector<16x128xf32>
    %c1_260 = arith.constant 1 : index
    %c3_261 = arith.constant 3 : index
    %c0_262 = arith.constant 0 : index
    %462 = vector.load %arg11[%c1_260, %c3_261, %c0_262] : memref<2x6x128xf32, #tpu.memory_space<vmem>>, vector<1x1x128xf32>
    %463 = vector.shape_cast %462 : vector<1x1x128xf32> to vector<1x128xf32>
    %464 = vector.broadcast %463 : vector<1x128xf32> to vector<16x128xf32>
    %465 = arith.addf %461, %464 : vector<16x128xf32>
    %466 = arith.addf %436, %465 : vector<16x128xf32>
    %c1_263 = arith.constant 1 : index
    %c4_264 = arith.constant 4 : index
    %c0_265 = arith.constant 0 : index
    %467 = vector.load %arg11[%c1_263, %c4_264, %c0_265] : memref<2x6x128xf32, #tpu.memory_space<vmem>>, vector<1x1x128xf32>
    %468 = vector.shape_cast %467 : vector<1x1x128xf32> to vector<1x128xf32>
    %c1_266 = arith.constant 1 : index
    %c5_267 = arith.constant 5 : index
    %c0_268 = arith.constant 0 : index
    %469 = vector.load %arg11[%c1_266, %c5_267, %c0_268] : memref<2x6x128xf32, #tpu.memory_space<vmem>>, vector<1x1x128xf32>
    %470 = vector.shape_cast %469 : vector<1x1x128xf32> to vector<1x128xf32>
    %cst_269 = arith.constant dense<0.000000e+00> : vector<16xf32>
    %471 = vector.multi_reduction <add>, %466, %cst_269 [1] : vector<16x128xf32> to vector<16xf32>
    %472 = vector.shape_cast %471 : vector<16xf32> to vector<16x1xf32>
    %cst_270 = arith.constant 3.125000e-02 : f32
    %473 = vector.broadcast %cst_270 : f32 to vector<16x1xf32>
    %474 = arith.mulf %472, %473 : vector<16x1xf32>
    %475 = arith.mulf %466, %466 : vector<16x128xf32>
    %cst_271 = arith.constant dense<0.000000e+00> : vector<16xf32>
    %476 = vector.multi_reduction <add>, %475, %cst_271 [1] : vector<16x128xf32> to vector<16xf32>
    %477 = vector.shape_cast %476 : vector<16xf32> to vector<16x1xf32>
    %cst_272 = arith.constant 3.125000e-02 : f32
    %478 = vector.broadcast %cst_272 : f32 to vector<16x1xf32>
    %479 = arith.mulf %477, %478 : vector<16x1xf32>
    %480 = arith.mulf %474, %474 : vector<16x1xf32>
    %481 = arith.subf %479, %480 : vector<16x1xf32>
    %cst_273 = arith.constant 0.000000e+00 : f32
    %482 = vector.broadcast %cst_273 : f32 to vector<16x1xf32>
    %483 = arith.maximumf %481, %482 : vector<16x1xf32>
    %484 = vector.broadcast %474 : vector<16x1xf32> to vector<16x128xf32>
    %485 = arith.subf %466, %484 : vector<16x128xf32>
    %cst_274 = arith.constant 9.99999996E-13 : f32
    %486 = vector.broadcast %cst_274 : f32 to vector<16x1xf32>
    %487 = arith.addf %483, %486 : vector<16x1xf32>
    %488 = math.rsqrt %487 : vector<16x1xf32>
    %489 = vector.broadcast %488 : vector<16x1xf32> to vector<16x128xf32>
    %490 = arith.mulf %485, %489 : vector<16x128xf32>
    %491 = vector.broadcast %468 : vector<1x128xf32> to vector<16x128xf32>
    %492 = arith.mulf %490, %491 : vector<16x128xf32>
    %493 = vector.broadcast %470 : vector<1x128xf32> to vector<16x128xf32>
    %494 = arith.addf %492, %493 : vector<16x128xf32>
    %c2_275 = arith.constant 2 : index
    %c0_276 = arith.constant 0 : index
    %c0_277 = arith.constant 0 : index
    %495 = vector.load %arg13[%c2_275, %c0_276, %c0_277] : memref<3x16x128xf32, #tpu.memory_space<vmem>>, vector<1x16x128xf32>
    %496 = vector.shape_cast %495 : vector<1x16x128xf32> to vector<16x128xf32>
    %497 = vector.shape_cast %494 : vector<16x128xf32> to vector<1x16x128xf32>
    tpu.vector_store %arg13[%c2_275, %c0_276, %c0_277], %497 {strides = array<i32>} : memref<3x16x128xf32, #tpu.memory_space<vmem>>, vector<1x16x128xf32>,
    return
  }
  func.func @transform_0(%arg0: i32, %arg1: memref<16xi32, #tpu.memory_space<smem>>) -> (i32, i32) {
    %c0_i32 = arith.constant 0 : i32
    %c0_i32_0 = arith.constant 0 : i32
    %c0_i32_1 = arith.constant 0 : i32
    return %c0_i32, %c0_i32_0 : i32, i32
  }
  func.func @transform_1(%arg0: i32, %arg1: memref<16xi32, #tpu.memory_space<smem>>) -> (i32, i32, i32) {
    %c0_i32 = arith.constant 0 : i32
    %c0_i32_0 = arith.constant 0 : i32
    %c0_i32_1 = arith.constant 0 : i32
    %c0_i32_2 = arith.constant 0 : i32
    return %c0_i32, %c0_i32_0, %c0_i32_1 : i32, i32, i32
  }
  func.func @transform_2(%arg0: i32, %arg1: memref<16xi32, #tpu.memory_space<smem>>) -> (i32, i32) {
    %c0_i32 = arith.constant 0 : i32
    %c0_i32_0 = arith.constant 0 : i32
    %c0_i32_1 = arith.constant 0 : i32
    return %c0_i32, %c0_i32_0 : i32, i32
  }
  func.func @transform_3(%arg0: i32, %arg1: memref<16xi32, #tpu.memory_space<smem>>) -> (i32, i32) {
    %c0_i32 = arith.constant 0 : i32
    %c0_i32_0 = arith.constant 0 : i32
    %c0_i32_1 = arith.constant 0 : i32
    return %c0_i32, %c0_i32_0 : i32, i32
  }
  func.func @transform_4(%arg0: i32, %arg1: memref<16xi32, #tpu.memory_space<smem>>) -> (i32, i32, i32) {
    %c0_i32 = arith.constant 0 : i32
    %c0_i32_0 = arith.constant 0 : i32
    %c0_i32_1 = arith.constant 0 : i32
    %c0_i32_2 = arith.constant 0 : i32
    return %c0_i32, %c0_i32_0, %c0_i32_1 : i32, i32, i32
  }
  func.func @transform_5(%arg0: i32, %arg1: memref<16xi32, #tpu.memory_space<smem>>) -> (i32, i32, i32) {
    %c0_i32 = arith.constant 0 : i32
    %c0_i32_0 = arith.constant 0 : i32
    %c0_i32_1 = arith.constant 0 : i32
    %c0_i32_2 = arith.constant 0 : i32
    return %c0_i32, %c0_i32_0, %c0_i32_1 : i32, i32, i32
  }
  func.func @transform_6(%arg0: i32, %arg1: memref<16xi32, #tpu.memory_space<smem>>) -> (i32, i32, i32, i32) {
    %c0_i32 = arith.constant 0 : i32
    %c0_i32_0 = arith.constant 0 : i32
    %c0_i32_1 = arith.constant 0 : i32
    %c0_i32_2 = arith.constant 0 : i32
    %c0_i32_3 = arith.constant 0 : i32
    return %c0_i32, %c0_i32_0, %c0_i32_1, %c0_i32_2 : i32, i32, i32, i32
  }
  func.func @transform_7(%arg0: i32, %arg1: memref<16xi32, #tpu.memory_space<smem>>) -> (i32, i32, i32) {
    %c0_i32 = arith.constant 0 : i32
    %c0_i32_0 = arith.constant 0 : i32
    %c0_i32_1 = arith.constant 0 : i32
    %c0_i32_2 = arith.constant 0 : i32
    return %c0_i32, %c0_i32_0, %c0_i32_1 : i32, i32, i32
  }
  func.func @transform_8(%arg0: i32, %arg1: memref<16xi32, #tpu.memory_space<smem>>) -> (i32, i32, i32) {
    %c0_i32 = arith.constant 0 : i32
    %c0_i32_0 = arith.constant 0 : i32
    %c0_i32_1 = arith.constant 0 : i32
    %c0_i32_2 = arith.constant 0 : i32
    return %c0_i32, %c0_i32_0, %c0_i32_1 : i32, i32, i32
  }
  func.func @transform_9(%arg0: i32, %arg1: memref<16xi32, #tpu.memory_space<smem>>) -> (i32, i32, i32) {
    %c0_i32 = arith.constant 0 : i32
    %c0_i32_0 = arith.constant 0 : i32
    %c0_i32_1 = arith.constant 0 : i32
    %c0_i32_2 = arith.constant 0 : i32
    return %c0_i32, %c0_i32_0, %c0_i32_1 : i32, i32, i32
  }
  func.func @transform_10(%arg0: i32, %arg1: memref<16xi32, #tpu.memory_space<smem>>) -> (i32, i32, i32) {
    %c0_i32 = arith.constant 0 : i32
    %c0_i32_0 = arith.constant 0 : i32
    %c0_i32_1 = arith.constant 0 : i32
    %c0_i32_2 = arith.constant 0 : i32
    return %c0_i32, %c0_i32_0, %c0_i32_1 : i32, i32, i32
  }
  func.func @transform_11(%arg0: i32, %arg1: memref<16xi32, #tpu.memory_space<smem>>) -> (i32, i32, i32) {
    %c0_i32 = arith.constant 0 : i32
    %c0_i32_0 = arith.constant 0 : i32
    %c0_i32_1 = arith.constant 0 : i32
    %c0_i32_2 = arith.constant 0 : i32
    return %c0_i32, %c0_i32_0, %c0_i32_1 : i32, i32, i32
  }
}

</mosaic_0001>

<bundles_post_ra>
// kernel: encoder_forward.1
= control target key start
LH: loop header
LB: loop body
LE: loop exit
PB: predicated region body
PF: predicated region fallthrough
CT: control target
= control target key end

     0   :  { %s4281_s0 = inlined_call_operand.vmem [shape: s32[16], index: 0, kind: input, shape index: {}]   ;;  %s4282_s1 = inlined_call_operand.vmem [shape: f32[1,16], index: 1, kind: input, shape index: {}]   ;;  %s4283_s2 = inlined_call_operand.vmem [shape: f32[64,1,128], index: 2, kind: input, shape index: {}]   ;;  %s4284_s3 = inlined_call_operand.vmem [shape: f32[8,128], index: 3, kind: input, shape index: {}]   ;;  %s4285_s4 = inlined_call_operand.vmem [shape: f32[2,128], index: 4, kind: input, shape index: {}]   ;;  %s4286_s5 = inlined_call_operand.hbm [shape: bf16[2,128,768], index: 5, kind: input, shape index: {}]   ;;  %s4287_s6 = inlined_call_operand.vmem [shape: f32[2,1,768], index: 6, kind: input, shape index: {}]   ;;  %s4288_s7 = inlined_call_operand.hbm [shape: bf16[2,2,128,128], index: 7, kind: input, shape index: {}]   ;;  %s4289_s8 = inlined_call_operand.hbm [shape: bf16[2,128,128], index: 8, kind: input, shape index: {}]   ;;  %s4290_s9 = inlined_call_operand.hbm [shape: bf16[2,128,128], index: 9, kind: input, shape index: {}]   ;;  %s4291_s10 = inlined_call_operand.vmem [shape: f32[2,6,128], index: 10, kind: input, shape index: {}]   ;;  %s4292_s11 = inlined_call_operand.vmem [shape: f32[2,1,128], index: 11, kind: input, shape index: {}]   ;;  %s4293_s12 = inlined_call_operand.vmem [shape: f32[3,16,128], index: 12, kind: output, shape index: {}]  }
   0x1   :  { %4295 = sst [smem:[#allocation16_spill]] %s4292_s11  ;;  %s17_s23 = sshll.u32 %s4281_s0, 4  ;;  %s18_s23 = int_to_ptr.vmem [resolvable:$true] %s17_s23 }
   0x2   :  { %s3566_s24 = scalar_lea.vmem %s18_s23, 16  ;;  %p3571_p1 = scmp.lt.s32.totalorder %s18_s23, %s18_s23 }
   0x3   :  { %p3567_p0 = scmp.ne.s32.totalorder %s18_s23, %s3566_s24  ;;  %p3572_p2 = scmp.lt.s32.totalorder %s3566_s24, %s3566_s24 }
   0x5   :  { %p3573_p3 = por %p3572_p2, %p3571_p1 }
   0x7   :  { %p3574_p4 = pnand %p3573_p3, %p3567_p0 }
   0x9   :  { %3577 = shalt.err (!%p3574_p4)  }
   0xa   :  { %s3674_s25 = smov [#allocation4]  }
   0xb   :  { %20 = dma.vmem_to_smem %s18_s23, 16, %s3674_s25, [#allocation3] }
   0xc   :  { %3666 = dma.done.wait [#allocation3], 16 }
   0xd   :  { %3667 = vsyncadd [#allocation3], 4294967280 }
   0xe   :  { %22 = sfence }
   0xf   :  { %23 = vsyncpa [#allocation6], 0 }
  0x10   :  { %24 = vsyncpa [#allocation8], 0 }
  0x11   :  { %25 = vsyncpa [#allocation11], 0  ;;  %s3675_s26 = smov [#allocation7]   ;;  %s3578_s29 = scalar_lea.hbm %s4288_s7, 4096 }
  0x12   :  { %s53_s27 = sshll.u32 %s3675_s26, 4  ;;  %p3579_p5 = scmp.ne.s32.totalorder %s4288_s7, %s3578_s29  ;;  %s54_s27 = int_to_ptr.vmem [resolvable:$true] %s53_s27 }
  0x13   :  { %p3582_p6 = scmp.lt.u32.totalorder %s3578_s29, %s4288_s7 }
  0x15   :  { %p3584_p7 = pnand %p3582_p6, %p3579_p5 }
  0x17   :  { %3587 = shalt.err (!%p3584_p7)
}
  0x18   :  { %s3588_s16 = scalar_lea.vmem %s54_s27, 4096  ;;  %p3593_p9 = scmp.lt.s32.totalorder %s54_s27, %s54_s27 }
  0x19   :  { %p3589_p8 = scmp.ne.s32.totalorder %s54_s27, %s3588_s16  ;;  %p3594_p10 = scmp.lt.s32.totalorder %s3588_s16, %s3588_s16 }
  0x1b   :  { %p3595_p11 = por %p3594_p10, %p3593_p9 }
  0x1d   :  { %p3596_p12 = pnand %p3595_p11, %p3589_p8 }
  0x1f   :  { %3599 = shalt.err (!%p3596_p12)
}
  0x20   :  { %s3676_s17 = smov 64   ;;  %s3677_s18 = smov 4  }
  0x21   :  { %59 = dma.hbm_to_vmem [thread:$0]  %s4288_s7, 4096, %s54_s27, [#allocation8], %s3676_s17, %s3676_s17, %s3677_s18  }
  0x22   :  { %s3678_s21 = smov [#allocation5]   ;;  %s3600_s25 = scalar_lea.hbm %s4286_s5, 12288 }
  0x23   :  { %s39_s22 = sshll.u32 %s3678_s21, 4  ;;  %p3601_p13 = scmp.ne.s32.totalorder %s4286_s5, %s3600_s25  ;;  %s40_s22 = int_to_ptr.vmem [resolvable:$true] %s39_s22 }
  0x24   :  { %p3604_p0 = scmp.lt.u32.totalorder %s3600_s25, %s4286_s5 }
  0x26   :  { %p3606_p1 = pnand %p3604_p0, %p3601_p13 }
  0x28   :  { %3609 = shalt.err (!%p3606_p1)
}
  0x29   :  { %s3610_s30 = scalar_lea.vmem %s40_s22, 12288  ;;  %p3615_p3 = scmp.lt.s32.totalorder %s40_s22, %s40_s22 }
  0x2a   :  { %p3611_p2 = scmp.ne.s32.totalorder %s40_s22, %s3610_s30  ;;  %p3616_p4 = scmp.lt.s32.totalorder %s3610_s30, %s3610_s30 }
  0x2c   :  { %p3617_p5 = por %p3616_p4, %p3615_p3 }
  0x2e   :  { %p3618_p6 = pnand %p3617_p5, %p3611_p2 }
  0x30   :  { %3621 = shalt.err (!%p3618_p6)
}
  0x31   :  { %s3679_s7 = smov 384   ;;  %s3680_s27 = smov 24  }
  0x32   :  { %45 = dma.hbm_to_vmem [thread:$0]  %s4286_s5, 12288, %s40_s22, [#allocation6], %s3679_s7, %s3679_s7, %s3680_s27  }
  0x33   :  { %s3681_s15 = smov [#allocation9]   ;;  %s3682_s19 = smov [#allocation10]  }
  0x34   :  { %s65_s16 = sshll.u32 %s3681_s15, 4  ;;  %s77_s20 = sshll.u32 %s3682_s19, 4  ;;  %s66_s16 = int_to_ptr.vmem [resolvable:$true] %s65_s16  ;;  %s3781_s20 = int_to_ptr.vmem [resolvable:$true] %s77_s20 }
  0x35   :  { %s3622_s24 = scalar_lea.hbm %s4289_s8, 2048 }
  0x36   :  { %p3623_p7 = scmp.ne.s32.totalorder %s4289_s8, %s3622_s24  ;;  %p3626_p8 = scmp.lt.u32.totalorder %s3622_s24, %s4289_s8 }
  0x38   :  { %p3628_p9 = pnand %p3626_p8, %p3623_p7 }
  0x3a   :  { %3631 = shalt.err (!%p3628_p9)
}
  0x3b   :  { %s3632_s5 = scalar_lea.vmem %s66_s16, 2048  ;;  %p3637_p11 = scmp.lt.s32.totalorder %s66_s16, %s66_s16 }
  0x3c   :  { %p3633_p10 = scmp.ne.s32.totalorder %s66_s16, %s3632_s5  ;;  %p3638_p12 = scmp.lt.s32.totalorder %s3632_s5, %s3632_s5 }
  0x3e   :  { %p3639_p13 = por %p3638_p12, %p3637_p11 }
  0x40   :  { %p3640_p0 = pnand %p3639_p13, %p3633_p10 }
  0x42   :  { %3643 = shalt.err (!%p3640_p0)
}
  0x43   :  { %71 = dma.hbm_to_vmem [thread:$0]  %s4289_s8, 2048, %s66_s16, [#allocation8], %s3676_s17, %s3676_s17, %s3677_s18  }
  0x44   :  { %s3644_s27 = scalar_lea.hbm %s4290_s9, 2048 }
  0x45   :  { %p3645_p1 = scmp.ne.s32.totalorder %s4290_s9, %s3644_s27  ;;  %p3648_p2 = scmp.lt.u32.totalorder %s3644_s27, %s4290_s9 }
  0x47   :  { %p3650_p3 = pnand %p3648_p2, %p3645_p1 }
  0x49   :  { %3653 = shalt.err (!%p3650_p3)
}
  0x4a   :  { %s3654_s21 = scalar_lea.vmem %s3781_s20, 2048  ;;  %p3659_p5 = scmp.lt.s32.totalorder %s3781_s20, %s3781_s20 }
  0x4b   :  { %p3655_p4 = scmp.ne.s32.totalorder %s3781_s20, %s3654_s21  ;;  %p3660_p6 = scmp.lt.s32.totalorder %s3654_s21, %s3654_s21 }
  0x4d   :  { %p3661_p7 = por %p3660_p6, %p3659_p5 }
  0x4f   :  { %p3662_p8 = pnand %p3661_p7, %p3655_p4 }
  0x51   :  { %3665 = shalt.err (!%p3662_p8)
}
  0x52   :  { %83 = dma.hbm_to_vmem [thread:$0]  %s4290_s9, 2048, %s3781_s20, [#allocation11], %s3676_s17, %s3676_s17, %s3677_s18  }
  0x53   :  { %3668 = dma.done.wait [#allocation6], 12288  }
  0x54   :  { %3669 = vsyncadd [#allocation6], 4294955008 }
  0x55   :  { %3670 = dma.done.wait [#allocation8], 6144  }
  0x56   :  { %3671 = vsyncadd [#allocation8], 4294961152 }
  0x57   :  { %3672 = dma.done.wait [#allocation11], 2048  }
  0x58   :  { %3673 = vsyncadd [#allocation11], 4294965248  ;;  %s101_s23 = sld [smem:[#allocation4]]  ;;  %s2782_s24 = sld [smem:[#allocation4 + $0x1]]  ;;  %v104_v0 = vld [vmem:[%s4284_s3] sm:$0x1] }
  0x59   :  { %s2783_s25 = sld [smem:[#allocation4 + $0x2]]  ;;  %s2784_s26 = sld [smem:[#allocation4 + $0x3]]  ;;  %v110_v1 = vld [vmem:[%s4284_s3 + $0x1] sm:$0x1]  ;;  %v116_v2 = vld [vmem:[%s4284_s3 + $0x2] sm:$0x1] }
  0x5a   :  { %s2785_s0 = sld [smem:[#allocation4 + $0x4]]  ;;  %s2786_s28 = sld [smem:[#allocation4 + $0x5]]  ;;  %v122_v5 = vld [vmem:[%s4284_s3 + $0x3] sm:$0x1]  ;;  %v128_v10 = vld [vmem:[%s4284_s3 + $0x4] sm:$0x1] }
  0x5b   :  { %s3818_s5 = sld [smem:[#allocation4 + $0x6]]  ;;  %s3820_s22 = sld [smem:[#allocation4 + $0x7]]  ;;  %v134_v15 = vld [vmem:[%s4284_s3 + $0x5] sm:$0x1]  ;;  %v140_v19 = vld [vmem:[%s4284_s3 + $0x6] sm:$0x1] }
  0x5c   :  { %s3822_s29 = sld [smem:[#allocation4 + $0x8]]  ;;  %s3824_s30 = sld [smem:[#allocation4 + $0x9]]  ;;  %v146_v22 = vld [vmem:[%s4284_s3 + $0x7] sm:$0x1]  ;;  %v152_v24 = vld [vmem:[%s4284_s3] sm:$0x1] }
  0x5d   :  { %s3826_s9 = sld [smem:[#allocation4 + $0xa]]  ;;  %s3828_s17 = sld [smem:[#allocation4 + $0xb]]  ;;  %v158_v28 = vld [vmem:[%s4284_s3 + $0x1] sm:$0x1]  ;;  %v164_v31 = vld [vmem:[%s4284_s3 + $0x2] sm:$0x1] }
  0x5e   :  { %s102_s7 = scalar_lea.vmem %s4283_s2, %s101_s23  ;;  %s108_s19 = scalar_lea.vmem %s4283_s2, %s2782_s24  ;;  %v170_v33 = vld [vmem:[%s4284_s3 + $0x3] sm:$0x1]  ;;  %v176_v36 = vld [vmem:[%s4284_s3 + $0x4] sm:$0x1]  ;;  %v182_v37 = vld [vmem:[%s4284_s3 + $0x5] sm:$0x1] }
  0x5f   :  { %v103_v3 = vld [vmem:[%s102_s7] sm:$0x1]  ;;  %s114_s20 = scalar_lea.vmem %s4283_s2, %s2783_s25  ;;  %s120_s24 = scalar_lea.vmem %s4283_s2, %s2784_s26  ;;  %v188_v38 = vld [vmem:[%s4284_s3 + $0x6] sm:$0x1]  ;;  %v194_v39 = vld [vmem:[%s4284_s3 + $0x7] sm:$0x1] }
  0x60   :  { %v109_v4 = vld [vmem:[%s108_s19] sm:$0x1]  ;;  %v105_v6 = vadd.f32 %v104_v0, %v103_v3  ;;  %s126_s19 = scalar_lea.vmem %s4283_s2, %s2785_s0  ;;  %s132_s26 = scalar_lea.vmem %s4283_s2, %s2786_s28  ;;  %v3298_v52 = vld [vmem:[#allocation5 + $0x4] ss:$24 sps:$4 sm:$0xff]   ;;  %v3300_v53 = vld [vmem:[#allocation5] ss:$24 sps:$4 sm:$0xff]  }
  0x61   :  { %v111_v7 = vadd.f32 %v110_v1, %v109_v4  ;;  %v115_v8 = vld [vmem:[%s114_s20] sm:$0x1]  ;;  %s138_s27 = scalar_lea.vmem %s4283_s2, %s3818_s5  ;;  %s144_s14 = scalar_lea.vmem %s4283_s2, %s3820_s22  ;;  %v3301_v54 = vld [vmem:[#allocation5 + $0xc] ss:$24 sps:$4 sm:$0xff]   ;;  %614 = vmatprep.subr.bf16.mxu0 %v3298_v52  ;;  %v3303_v55 = vld [vmem:[#allocation5 + $0x8] ss:$24 sps:$4 sm:$0xff]  }
  0x62   :  { %v121_v9 = vld [vmem:[%s120_s24] sm:$0x1]  ;;  %v117_v11 = vadd.f32 %v116_v2, %v115_v8  ;;  %106 = vst [vmem:[#allocation2] sm:$0x1] %v105_v6  ;;  %s150_s5 = scalar_lea.vmem %s4283_s2, %s3822_s29  ;;  %s156_s22 = scalar_lea.vmem %s4283_s2, %s3824_s30  ;;  %657 = vmatprep.subr.bf16.mxu1 %v3301_v54  ;;  %615 = vmatpush1.bf16.msra.mxu0 %v3300_v53  ;;  %v3304_v56 = vld [vmem:[#allocation5 + $0x34] ss:$24 sps:$4 sm:$0xff]  }
  0x63   :  { %v123_v12 = vadd.f32 %v122_v5, %v121_v9  ;;  %v127_v13 = vld [vmem:[%s126_s19] sm:$0x1]  ;;  %112 = vst [vmem:[#allocation2 + $0x1] sm:$0x1] %v111_v7  ;;  %s162_s29 = scalar_lea.vmem %s4283_s2, %s3826_s9  ;;  %s168_s30 = scalar_lea.vmem %s4283_s2, %s3828_s17  ;;  %658 = vmatpush1.bf16.msra.mxu1 %v3303_v55  ;;  %v3307_v58 = vld [vmem:[#allocation5 + $0x3c] ss:$24 sps:$4 sm:$0xff]   ;;  %616 = vmatprep.subr.bf16.mxu0 %v3304_v56 }
  0x64   :  { %v133_v14 = vld [vmem:[%s132_s26] sm:$0x1]  ;;  %v129_v16 = vadd.f32 %v128_v10, %v127_v13  ;;  %118 = vst [vmem:[#allocation2 + $0x2] sm:$0x1] %v117_v11  ;;  %s2793_s17 = sld [smem:[#allocation4 + $0xc]]  ;;  %s2794_s15 = sld [smem:[#allocation4 + $0xd]]  ;;  %659 = vmatprep.subr.bf16.mxu1 %v3307_v58 }
  0x65   :  { %v135_v17 = vadd.f32 %v134_v15, %v133_v14  ;;  %v139_v18 = vld [vmem:[%s138_s27] sm:$0x1]  ;;  %124 = vst [vmem:[#allocation2 + $0x3] sm:$0x1] %v123_v12  ;;  %s2795_s11 = sld [smem:[#allocation4 + $0xe]]  ;;  %s2796_s7 = sld [smem:[#allocation4 + $0xf]] }
  0x66   :  { %v145_v20 = vld [vmem:[%s144_s14] sm:$0x1]  ;;  %v141_v21 = vadd.f32 %v140_v19, %v139_v18  ;;  %130 = vst [vmem:[#allocation2 + $0x4] sm:$0x1] %v129_v16  ;;  %v3310_v60 = vld [vmem:[#allocation5 + $0x64] ss:$24 sps:$4 sm:$0xff]  }
  0x67   :  { %v151_v23 = vld [vmem:[%s150_s5] sm:$0x1]  ;;  %136 = vst [vmem:[#allocation2 + $0x5] sm:$0x1] %v135_v17  ;;  %v147_v25 = vadd.f32 %v146_v22, %v145_v20  ;;  %v3312_v61 = vld [vmem:[#allocation5 + $0x60] ss:$24 sps:$4 sm:$0xff]  }
  0x68   :  { %v153_v26 = vadd.f32 %v152_v24, %v151_v23  ;;  %v157_v27 = vld [vmem:[%s156_s22] sm:$0x1]  ;;  %142 = vst [vmem:[#allocation2 + $0x6] sm:$0x1] %v141_v21  ;;  %v3313_v62 = vld [vmem:[#allocation5 + $0x6c] ss:$24 sps:$4 sm:$0xff]  }
  0x69   :  { %v163_v29 = vld [vmem:[%s162_s29] sm:$0x1]  ;;  %v159_v30 = vadd.f32 %v158_v28, %v157_v27  ;;  %148 = vst [vmem:[#allocation2 + $0x7] sm:$0x1] %v147_v25  ;;  %v3315_v63 = vld [vmem:[#allocation5 + $0x68] ss:$24 sps:$4 sm:$0xff]  }
  0x6a   :  { %v169_v32 = vld [vmem:[%s168_s30] sm:$0x1]  ;;  %154 = vst [vmem:[#allocation2 + $0x8] sm:$0x1] %v153_v26  ;;  %v165_v34 = vadd.f32 %v164_v31, %v163_v29  ;;  %s174_s29 = scalar_lea.vmem %s4283_s2, %s2793_s17  ;;  %s180_s30 = scalar_lea.vmem %s4283_s2, %s2794_s15  ;;  %v3316_v0 = vld [vmem:[#allocation5 + $0x94] ss:$24 sps:$4 sm:$0xff]  }
  0x6b   :  { %v171_v35 = vadd.f32 %v170_v33, %v169_v32  ;;  %160 = vst [vmem:[#allocation2 + $0x9] sm:$0x1] %v159_v30  ;;  %v175_v41 = vld [vmem:[%s174_s29] sm:$0x1]  ;;  %s186_s24 = scalar_lea.vmem %s4283_s2, %s2795_s11  ;;  %s192_s9 = scalar_lea.vmem %s4283_s2, %s2796_s7  ;;  %v3319_v2 = vld [vmem:[#allocation5 + $0x9c] ss:$24 sps:$4 sm:$0xff]  }
  0x6c   :  { %166 = vst [vmem:[#allocation2 + $0xa] sm:$0x1] %v165_v34  ;;  %v181_v42 = vld [vmem:[%s180_s30] sm:$0x1]  ;;  %v177_v44 = vadd.f32 %v176_v36, %v175_v41  ;;  %v3322_v4 = vld [vmem:[#allocation5 + $0xc4] ss:$24 sps:$4 sm:$0xff]  }
  0x6d   :  { %172 = vst [vmem:[#allocation2 + $0xb] sm:$0x1] %v171_v35  ;;  %v183_v45 = vadd.f32 %v182_v37, %v181_v42  ;;  %v187_v46 = vld [vmem:[%s186_s24] sm:$0x1]  ;;  %v3324_v5 = vld [vmem:[#allocation5 + $0xc0] ss:$24 sps:$4 sm:$0xff]  }
  0x6e   :  { %v189_v47 = vadd.f32 %v188_v38, %v187_v46  ;;  %v193_v48 = vld [vmem:[%s192_s9] sm:$0x1]  ;;  %178 = vst [vmem:[#allocation2 + $0xc] sm:$0x1] %v177_v44  ;;  %v3325_v6 = vld [vmem:[#allocation5 + $0xcc] ss:$24 sps:$4 sm:$0xff]  }
  0x6f   :  { %184 = vst [vmem:[#allocation2 + $0xd] sm:$0x1] %v183_v45  ;;  %v195_v49 = vadd.f32 %v194_v39, %v193_v48  ;;  %v3306_v57 = vld [vmem:[#allocation5 + $0x30] ss:$24 sps:$4 sm:$0xff]   ;;  %v3328_v8 = vld [vmem:[#allocation5 + $0xf4] ss:$24 sps:$4 sm:$0xff]  }
  0x70   :  { %v3926_v40 = vld [vmem:[#allocation2] sm:$0xff]  ;;  %190 = vst [vmem:[#allocation2 + $0xe] sm:$0x1] %v189_v47  ;;  %617 = vmatpush1.bf16.msra.mxu0 %v3306_v57  ;;  %v3327_v7 = vld [vmem:[#allocation5 + $0xc8] ss:$24 sps:$4 sm:$0xff]   ;;  %v3683_v17 = vmov 0  }
  0x71   :  { %201 = vadd.xlane.f32.xlu0 %v3926_v40  ;;  %v207_v43 = vmul.f32 %v3926_v40, %v3926_v40  ;;  %196 = vst [vmem:[#allocation2 + $0xf] sm:$0x1] %v195_v49  ;;  %v3309_v59 = vld [vmem:[#allocation5 + $0x38] ss:$24 sps:$4 sm:$0xff]   ;;  %618 = vmatprep.subr.bf16.mxu0 %v3310_v60  ;;  %v3331_v9 = vld [vmem:[#allocation5 + $0xfc] ss:$24 sps:$4 sm:$0xff]  }
  0x72   :  { %660 = vmatpush1.bf16.msra.mxu1 %v3309_v59  ;;  %v3318_v1 = vld [vmem:[#allocation5 + $0x90] ss:$24 sps:$4 sm:$0xff]   ;;  %v3334_v12 = vld [vmem:[#allocation5 + $0x124] ss:$24 sps:$4 sm:$0xff]   ;;  %v3336_v14 = vld [vmem:[#allocation5 + $0x120] ss:$24 sps:$4 sm:$0xff]   ;;  %646 = vmatprep.mubr.bf16.mxu0 %v3683_v17 }
  0x73   :  { %209 = vadd.xlane.f32.xlu1 %v207_v43  ;;  %661 = vmatprep.subr.bf16.mxu1 %v3313_v62  ;;  %v3321_v3 = vld [vmem:[#allocation5 + $0x98] ss:$24 sps:$4 sm:$0xff]   ;;  %v3337_v13 = vld [vmem:[#allocation5 + $0x12c] ss:$24 sps:$4 sm:$0xff]   ;;  %v3339_v15 = vld [vmem:[#allocation5 + $0x128] ss:$24 sps:$4 sm:$0xff]  }
  0x74   :  { %619 = vmatpush1.bf16.msra.mxu0 %v3312_v61  ;;  %v3330_v10 = vld [vmem:[#allocation5 + $0xf0] ss:$24 sps:$4 sm:$0xff]   ;;  %v3340_v16 = vld [vmem:[#allocation5 + $0x154] ss:$24 sps:$4 sm:$0xff]   ;;  %689 = vmatprep.mubr.bf16.mxu1 %v3683_v17  ;;  %v3351_v53 = vld [vmem:[#allocation5 + $0x44] ss:$24 sps:$4 sm:$0xff]  }
  0x75   :  { %620 = vmatprep.subr.bf16.mxu0 %v3316_v0  ;;  %v3333_v11 = vld [vmem:[#allocation5 + $0xf8] ss:$24 sps:$4 sm:$0xff]   ;;  %v3343_v18 = vld [vmem:[#allocation5 + $0x15c] ss:$24 sps:$4 sm:$0xff]   ;;  %vm3685_vm0 = vmmov 0   ;;  %vm794_vm5 = vcmask 130048  }
  0x76   :  { %662 = vmatpush1.bf16.msra.mxu1 %v3315_v63  ;;  %v3342_v19 = vld [vmem:[#allocation5 + $0x150] ss:$24 sps:$4 sm:$0xff]   ;;  %v3348_v21 = vld [vmem:[#allocation5 + $0x14] ss:$24 sps:$4 sm:$0xff]   ;;  %v3349_v54 = vld [vmem:[#allocation5 + $0x40] ss:$24 sps:$4 sm:$0xff]  }
  0x77   :  { %663 = vmatprep.subr.bf16.mxu1 %v3319_v2  ;;  %v3345_v20 = vld [vmem:[#allocation5 + $0x158] ss:$24 sps:$4 sm:$0xff]   ;;  %v3357_v56 = vld [vmem:[#allocation5 + $0xa4] ss:$24 sps:$4 sm:$0xff]   ;;  %v3360_v58 = vld [vmem:[#allocation5 + $0xd4] ss:$24 sps:$4 sm:$0xff]  }
  0x78   :  { %v3937_v50 = vld [vmem:[#allocation2 + $0x8] sm:$0xff]  ;;  %621 = vmatpush1.bf16.msra.mxu0 %v3318_v1  ;;  %v2797_v41 = vld [vmem:[%s4285_s4] ss:$0 sm:$0xff]  ;;  %v2798_v43 = vld [vmem:[%s4285_s4 + $0x1] ss:$0 sm:$0xff]  ;;  %v3684_v2 = vmov 0.0  }
  0x79   :  { %203 = vadd.xlane.f32.xlu0 %v3937_v50  ;;  %v208_v51 = vmul.f32 %v3937_v50, %v3937_v50  ;;  %622 = vmatprep.subr.bf16.mxu0 %v3322_v4  ;;  %v3352_v55 = vld [vmem:[#allocation5 + $0x70] ss:$24 sps:$4 sm:$0xff]   ;;  %v3355_v57 = vld [vmem:[#allocation5 + $0xa0] ss:$24 sps:$4 sm:$0xff]   ;;  %v3363_v60 = vld [vmem:[#allocation5 + $0x104] ss:$24 sps:$4 sm:$0xff]  }
  0x7a   :  { %664 = vmatpush1.bf16.msra.mxu1 %v3321_v3  ;;  %v3358_v59 = vld [vmem:[#allocation5 + $0xd0] ss:$24 sps:$4 sm:$0xff]   ;;  %v3361_v61 = vld [vmem:[#allocation5 + $0x100] ss:$24 sps:$4 sm:$0xff]   ;;  %v3366_v62 = vld [vmem:[#allocation5 + $0x134] ss:$24 sps:$4 sm:$0xff]   ;;  %v246_v3 = vlaneseq }
  0x7b   :  { %211 = vadd.xlane.f32.xlu1 %v208_v51  ;;  %665 = vmatprep.subr.bf16.mxu1 %v3325_v6  ;;  %v3346_v51 = vld [vmem:[#allocation5 + $0x10] ss:$24 sps:$4 sm:$0xff]   ;;  %v3369_v0 = vld [vmem:[#allocation5 + $0x164] ss:$24 sps:$4 sm:$0xff]   ;;  %v3367_v1 = vld [vmem:[#allocation5 + $0x160] ss:$24 sps:$4 sm:$0xff]  }
  0x7c   :  { %623 = vmatpush1.bf16.msra.mxu0 %v3324_v5  ;;  %v3364_v63 = vld [vmem:[#allocation5 + $0x130] ss:$24 sps:$4 sm:$0xff]   ;;  %v3973_v4 = vshrl.u32 %v246_v3, 7  ;;  %s4296_s0 = sld [smem:[#allocation16_spill]] }
  0x7d   :  { %624 = vmatprep.subr.bf16.mxu0 %v3328_v8  ;;  %v342_v6 = vld [vmem:[%s4287_s6] sm:$0x3f] }
  0x7e   :  { %666 = vmatpush1.bf16.msra.mxu1 %v3327_v7  ;;  %v346_v5 = vsub.s32 0, %v3973_v4  ;;  %v350_v7 = vsub.s32 1, %v3973_v4  ;;  %v354_v8 = vsub.s32 2, %v3973_v4 }
  0x7f   :  { %667 = vmatprep.subr.bf16.mxu1 %v3331_v9  ;;  %v358_v9 = vsub.s32 3, %v3973_v4 }
  0x80   :  { %625 = vmatpush1.bf16.msra.mxu0 %v3330_v10  ;;  %v347_v10 = vrot.slane %v342_v6, %v346_v5 }
  0x81   :  { %626 = vmatprep.subr.bf16.mxu0 %v3334_v12  ;;  %v355_v12 = vrot.slane %v342_v6, %v354_v8 }
  0x82   :  { %668 = vmatpush1.bf16.msra.mxu1 %v3333_v11  ;;  %v351_v11 = vrot.slane %v342_v6, %v350_v7 }
  0x83   :  { %669 = vmatprep.subr.bf16.mxu1 %v3337_v13 }
  0x84   :  { %627 = vmatpush1.bf16.msra.mxu0 %v3336_v14 }
  0x85   :  { %628 = vmatprep.subr.bf16.mxu0 %v3340_v16 }
  0x86   :  { %670 = vmatpush1.bf16.msra.mxu1 %v3339_v15  ;;  %v359_v15 = vrot.slane %v342_v6, %v358_v9 }
  0x87   :  { %671 = vmatprep.subr.bf16.mxu1 %v3343_v18 }
  0x88   :  { %629 = vmatpush1.bf16.msra.mxu0 %v3342_v19 }
  0x89   :  { %700 = vmatprep.subr.bf16.mxu0 %v3348_v21 }
  0x8a   :  { %672 = vmatpush1.bf16.msra.mxu1 %v3345_v20 }
  0x8b   :  { %3078 = vmatprep.subr.bf16.mxu1 %v3684_v2 }
  0xfe   :  { %v202_v22 = vpop.xlane.xlu0 %201 }
  0xff   :  { %v205_v23 = vmul.f32 0.03125, %v202_v22 }
 0x100   :  { %v210_v24 = vpop.xlane.xlu1 %209 }
 0x101   :  { %v215_v25 = vmul.f32 %v205_v23, %v205_v23  ;;  %v213_v26 = vmul.f32 0.03125, %v210_v24  ;;  %v221_v37 = vsub.f32 %v3926_v40, %v205_v23 }
 0x103   :  { %v217_v27 = vsub.f32 %v213_v26, %v215_v25 }
 0x105   :  { %v219_v28 = vmax.f32 %v217_v27, 0.0 }
 0x106   :  { %v204_v30 = vpop.xlane.xlu0 %203 }
 0x107   :  { %v223_v29 = vadd.f32 1e-12, %v219_v28  ;;  %v206_v31 = vmul.f32 0.03125, %v204_v30 }
 0x108   :  { %v212_v32 = vpop.xlane.xlu1 %211 }
 0x109   :  { %3506 = vrsqrt.f32 %v223_v29  ;;  %v216_v33 = vmul.f32 %v206_v31, %v206_v31  ;;  %v214_v34 = vmul.f32 0.03125, %v212_v32  ;;  %v222_v40 = vsub.f32 %v3937_v50, %v206_v31  ;;  %v3354_v50 = vld [vmem:[#allocation5 + $0x74] ss:$24 sps:$4 sm:$0xff]  }
 0x10b   :  { %v218_v35 = vsub.f32 %v214_v34, %v216_v33 }
 0x10d   :  { %v220_v36 = vmax.f32 %v218_v35, 0.0 }
 0x10f   :  { %v224_v39 = vadd.f32 1e-12, %v220_v36 }
 0x111   :  { %3508 = vrsqrt.f32 %v224_v39  ;;  %v362_v39 = vsub.s32 4, %v3973_v4 }
 0x113   :  { %v3507_v38 = vpop.eup %3506 }
 0x114   :  { %v227_v42 = vmul.f32 %v3507_v38, %v221_v37 }
 0x116   :  { %v233_v44 = vmul.f32 %v2797_v41, %v227_v42  ;;  %v363_v42 = vrot.slane %v342_v6, %v362_v39 }
 0x118   :  { %v3951_v45 = vadd.f32 %v2798_v43, %v233_v44 }
 0x11a   :  { %241 = vst [vmem:[%s4293_s12] sm:$0xff] %v3951_v45 }
 0x11b   :  { %v3509_v46 = vpop.eup %3508 }
 0x11c   :  { %v228_v47 = vmul.f32 %v3509_v46, %v222_v40 }
 0x11e   :  { %v234_v48 = vmul.f32 %v2797_v41, %v228_v47  ;;  %v366_v41 = vsub.s32 5, %v3973_v4 }
 0x120   :  { %v3958_v49 = vadd.f32 %v2798_v43, %v234_v48  ;;  %v367_v44 = vrot.slane %v342_v6, %v366_v41 }
 0x122   :  { %242 = vst [vmem:[%s4293_s12 + $0x8] sm:$0xff] %v3958_v49  ;;  %v293_v52 = vpack.c.bf16 %v3958_v49, %v3951_v45 }
 0x124   :  { %647 = vmatmul.mubr.bf16.vlgmr.msra.gmra.mrb[0].mxu0 %v293_v52  ;;  %690 = vmatmul.mubr.bf16.vlgmr.msra.gmra.mrb[0].mxu1 %v293_v52 }
 0x125   :  { %701 = vmatpush1.bf16.msra.mxu0 %v3346_v51  ;;  %732 = vmatprep.mubr.bf16.mxu0 %v3683_v17 }
 0x126   :  { %702 = vmatprep.subr.bf16.mxu0 %v3351_v53  ;;  %3080 = vmatprep.mubr.msk.bf16.mxu1 %vm3685_vm0, %v3684_v2 }
 0x129   :  { %703 = vmatpush1.bf16.msra.mxu0 %v3349_v54 }
 0x12a   :  { %704 = vmatprep.subr.bf16.mxu0 %v3354_v50 }
 0x12d   :  { %705 = vmatpush1.bf16.msra.mxu0 %v3352_v55  ;;  %v247_v55 = vand.u32 127, %v246_v3 }
 0x12e   :  { %706 = vmatprep.subr.bf16.mxu0 %v3357_v56 }
 0x12f   :  { %vm272_vm1 = vcmp.ge.s32.totalorder %v247_v55, 8  ;;  %vm273_vm2 = vcmp.lt.s32.totalorder %v247_v55, 16  ;;  %vm257_vm4 = vcmp.lt.s32.totalorder %v247_v55, 8 }
 0x130   :  { %vm274_vm3 = vmand %vm272_vm1, %vm273_vm2 }
 0x131   :  { %707 = vmatpush1.bf16.msra.mxu0 %v3355_v57  ;;  %v275_v56 = vsel %vm274_vm3, 1.0, %v3684_v2  ;;  %v259_v57 = vsel %vm257_vm4, 1.0, %v3684_v2 }
 0x132   :  { %708 = vmatprep.subr.bf16.mxu0 %v3360_v58  ;;  %v276_v58 = vmul.f32 0.0, %v275_v56 }
 0x135   :  { %709 = vmatpush1.bf16.msra.mxu0 %v3358_v59  ;;  %v261_v59 = vmul.f32 0.0, %v259_v57 }
 0x136   :  { %710 = vmatprep.subr.bf16.mxu0 %v3363_v60  ;;  %v278_v60 = vadd.f32 %v276_v58, %v259_v57 }
 0x139   :  { %711 = vmatpush1.bf16.msra.mxu0 %v3361_v61  ;;  %v2799_v61 = vld [vmem:[%s4282_s1] ss:$0 sm:$0xff] }
 0x13a   :  { %712 = vmatprep.subr.bf16.mxu0 %v3366_v62  ;;  %v279_v62 = vadd.f32 %v275_v56, %v261_v59 }
 0x13d   :  { %713 = vmatpush1.bf16.msra.mxu0 %v3364_v63  ;;  %v287_v63 = vmul.f32 %v2799_v61, %v278_v60 }
 0x13e   :  { %714 = vmatprep.subr.bf16.mxu0 %v3369_v0  ;;  %v288_v0 = vmul.f32 %v2799_v61, %v279_v62 }
 0x140   :  { %v290_v3 = vsub.f32 1.0, %v288_v0  ;;  %v3378_v0 = vld [vmem:[#allocation7 + $0x40] sm:$0xff]  }
 0x141   :  { %715 = vmatpush1.bf16.msra.mxu0 %v3367_v1  ;;  %v289_v1 = vsub.f32 1.0, %v287_v63 }
 0x142   :  { %3102 = vmatprep.subr.bf16.mxu0 %v3684_v2 }
 0x143   :  { %v4020_v6 = vmul.f32 -1e+09, %v289_v1  ;;  %v3379_v1 = vld [vmem:[#allocation7 + $0x48] sm:$0xff]  }
 0x144   :  { %733 = vmatmul.mubr.bf16.vlgmr.msra.gmra.mrb[4].mxu0 %v293_v52 }
 0x145   :  { %3118 = vmatprep.mubr.msk.bf16.mxu0 %vm3685_vm0, %v3684_v2  ;;  %3103 = vmatpush3.bf16.msra.mxu0 %v3378_v0 }
 0x146   :  { %3104 = vmatprep.subr.bf16.mxu0 %v3684_v2 }
 0x149   :  { %3105 = vmatpush3.bf16.msra.mxu0 %v3379_v1 }
 0x14a   :  { %3106 = vmatprep.subr.bf16.mxu0 %v3684_v2 }
 0x1f7   :  { %v648_v13 = vpop.f32.mrb[0].mxu0  ;;  %v691_v14 = vpop.f32.mrb[0].mxu1 }
 0x1f8   :  { %v649_v16 = vadd.f32 %v648_v13, %v347_v10  ;;  %v650_v18 = vpop.f32.mrb[1].mxu0  ;;  %v693_v19 = vpop.f32.mrb[1].mxu1  ;;  %v692_v23 = vadd.f32 %v691_v14, %v355_v12 }
 0x1f9   :  { %v651_v20 = vadd.f32 %v650_v18, %v351_v11  ;;  %v652_v21 = vpop.f32.mrb[2].mxu0  ;;  %v695_v22 = vpop.f32.mrb[2].mxu1  ;;  %v3990_v28 = vadd.f32 %v693_v19, %v359_v15 }
 0x1fa   :  { %v653_v24 = vadd.f32 %v652_v21, %v347_v10  ;;  %v696_v25 = vadd.f32 %v695_v22, %v355_v12  ;;  %v654_v26 = vpop.f32.mrb[3].mxu0  ;;  %v697_v27 = vpop.f32.mrb[3].mxu1  ;;  %v743_v31 = vmul.f32 0.25, %v649_v16  ;;  %v4022_v10 = vmul.f32 -1e+09, %v290_v3  ;;  %v3380_v3 = vld [vmem:[#allocation7 + $0x50] sm:$0xff]  }
 0x1fb   :  { %v655_v29 = vadd.f32 %v654_v26, %v351_v11  ;;  %v3992_v30 = vadd.f32 %v697_v27, %v359_v15  ;;  %v3994_v34 = vmul.f32 0.25, %v651_v20  ;;  %3107 = vmatpush3.bf16.msra.mxu0 %v3380_v3 }
 0x1fc   :  { %v745_v32 = vmul.f32 0.25, %v653_v24  ;;  %v749_v33 = vpack.c.bf16 %v696_v25, %v692_v23  ;;  %3108 = vmatprep.subr.bf16.mxu0 %v3684_v2 }
 0x1fd   :  { %v3996_v35 = vmul.f32 0.25, %v655_v29  ;;  %v750_v36 = vpack.c.bf16 %v3992_v30, %v3990_v28 }
 0x1fe   :  { %v747_v37 = vpack.c.bf16 %v745_v32, %v743_v31  ;;  %3079 = vmatpush3.bf16.xpose.msra.mxu1 %v749_v33 }
 0x1ff   :  { %v748_v38 = vpack.c.bf16 %v3996_v35, %v3994_v34  ;;  %3084 = vmatprep.subr.bf16.mxu1 %v3684_v2 }
 0x205   :  { %3081 = vmatmul.mubr.bf16.vlgmr.msra.gmra.mrb[4].mxu1 %v747_v37 }
 0x206   :  { %3086 = vmatprep.mubr.msk.bf16.mxu1 %vm3685_vm0, %v3684_v2 }
 0x217   :  { %v734_v43 = vpop.f32.mrb[4].mxu0 }
 0x218   :  { %v736_v40 = vpop.f32.mrb[5].mxu0  ;;  %v735_v47 = vadd.f32 %v734_v43, %v363_v42 }
 0x219   :  { %v738_v46 = vpop.f32.mrb[6].mxu0  ;;  %v4011_v52 = vadd.f32 %v736_v40, %v367_v44 }
 0x21a   :  { %v739_v48 = vadd.f32 %v738_v46, %v363_v42  ;;  %v740_v51 = vpop.f32.mrb[7].mxu0 }
 0x21b   :  { %v741_v53 = vadd.f32 %v740_v51, %v367_v44 }
 0x21c   :  { %v751_v54 = vpack.c.bf16 %v739_v48, %v735_v47 }
 0x21d   :  { %v752_v50 = vpack.c.bf16 %v741_v53, %v4011_v52 }
 0x21e   :  { %3085 = vmatpush3.bf16.msra.mxu1 %v751_v54 }
 0x21f   :  { %3090 = vmatprep.subr.bf16.mxu1 %v3684_v2 }
 0x2d8   :  { %v787_v11 = vpop.f32.mrb[4].mxu1 }
 0x2d9   :  { %v788_v12 = vadd.f32 %v787_v11, %v4020_v6  ;;  %v3082_v13 = vpop.f32.mrb[5].mxu1  ;;  %v3381_v11 = vld [vmem:[#allocation7 + $0x58] sm:$0xff]  }
 0x2da   :  { %v790_v14 = vpop.f32.mrb[6].mxu1  ;;  %3109 = vmatpush3.bf16.msra.mxu0 %v3381_v11  ;;  %v3383_v13 = vld [vmem:[#allocation7 + $0x68] sm:$0xff]  }
 0x2db   :  { %v791_v15 = vadd.f32 %v790_v14, %v4022_v10  ;;  %v3083_v16 = vpop.f32.mrb[7].mxu1  ;;  %v795_v18 = vsel %vm794_vm5, %v788_v12, -inf  ;;  %3110 = vmatprep.subr.bf16.mxu0 %v3684_v2  ;;  %v3384_v14 = vld [vmem:[#allocation7 + $0x70] sm:$0xff]  }
 0x2dc   :  { %796 = vmax.xlane.f32.xlu0 %v795_v18 }
 0x2dd   :  { %v798_v19 = vsel %vm794_vm5, %v791_v15, -inf }
 0x2de   :  { %799 = vmax.xlane.f32.xlu1 %v798_v19 }
 0x369   :  { %v797_v20 = vpop.xlane.xlu0 %796 }
 0x36a   :  { %v801_v21 = vsub.f32 %v788_v12, %v797_v20  ;;  %v3382_v12 = vld [vmem:[#allocation7 + $0x60] sm:$0xff]  }
 0x36b   :  { %v800_v22 = vpop.xlane.xlu1 %799  ;;  %3111 = vmatpush3.bf16.msra.mxu0 %v3382_v12 }
 0x36c   :  { %v803_v23 = vmul.f32 1.442695, %v801_v21  ;;  %v802_v24 = vsub.f32 %v791_v15, %v800_v22  ;;  %3112 = vmatprep.subr.bf16.mxu0 %v3684_v2  ;;  %v3370_v22 = vld [vmem:[#allocation7] sm:$0xff]  }
 0x36e   :  { %3510 = vpow2.f32 %v803_v23  ;;  %v805_v25 = vmul.f32 1.442695, %v802_v24  ;;  %v3371_v24 = vld [vmem:[#allocation7 + $0x8] sm:$0xff]  }
 0x36f   :  { %3113 = vmatpush3.bf16.msra.mxu0 %v3383_v13 }
 0x370   :  { %3512 = vpow2.f32 %v805_v25  ;;  %3114 = vmatprep.subr.bf16.mxu0 %v3684_v2  ;;  %v3372_v25 = vld [vmem:[#allocation7 + $0x10] sm:$0xff]  }
 0x373   :  { %3115 = vmatpush3.bf16.msra.mxu0 %v3384_v14 }
 0x374   :  { %3116 = vmatprep.subr.bf16.mxu0 %v3684_v2 }
 0x378   :  { %v3511_v26 = vpop.eup %3510 }
 0x379   :  { %v807_v27 = vsel %vm794_vm5, %v3511_v26, 0.0 }
 0x37a   :  { %v3513_v29 = vpop.eup %3512  ;;  %808 = vadd.xlane.f32.xlu0 %v807_v27  ;;  %v3374_v27 = vld [vmem:[#allocation7 + $0x20] sm:$0xff]  }
 0x37b   :  { %v810_v31 = vsel %vm794_vm5, %v3513_v29, 0.0 }
 0x37c   :  { %811 = vadd.xlane.f32.xlu1 %v810_v31  ;;  %v3376_v31 = vld [vmem:[#allocation7 + $0x30] sm:$0xff]  }
 0x407   :  { %v809_v32 = vpop.xlane.xlu0 %808 }
 0x408   :  { %3514 = vrcp.f32 %v809_v32  ;;  %v3377_v32 = vld [vmem:[#allocation7 + $0x38] sm:$0xff]  }
 0x409   :  { %v812_v33 = vpop.xlane.xlu1 %811 }
 0x40a   :  { %3516 = vrcp.f32 %v812_v33  ;;  %v3385_v33 = vld [vmem:[#allocation7 + $0x78] sm:$0xff]  }
 0x40b   :  { %3117 = vmatpush3.bf16.msra.mxu0 %v3385_v33 }
 0x40c   :  { %3142 = vmatprep.subr.bf16.mxu0 %v3684_v2 }
 0x412   :  { %v3515_v37 = vpop.eup %3514 }
 0x413   :  { %v815_v43 = vmul.f32 %v3515_v37, %v3511_v26  ;;  %v3373_v26 = vld [vmem:[#allocation7 + $0x18] sm:$0xff]  }
 0x414   :  { %v3517_v42 = vpop.eup %3516 }
 0x415   :  { %v816_v44 = vmul.f32 %v3517_v42, %v3513_v29  ;;  %v3375_v29 = vld [vmem:[#allocation7 + $0x28] sm:$0xff]  }
 0x417   :  { %v817_v40 = vpack.c.bf16 %v816_v44, %v815_v43 }
 0x419   :  { %3087 = vmatmul.mubr.msk.bf16.vlgmr.msra.gmra.mrb[8].mxu1 %vm794_vm5, %v817_v40 }
 0x41a   :  { %3091 = vmatpush3.bf16.xpose.msra.mxu1 %v750_v36  ;;  %3092 = vmatprep.mubr.msk.bf16.mxu1 %vm3685_vm0, %v3684_v2 }
 0x41b   :  { %3096 = vmatprep.subr.bf16.mxu1 %v3684_v2 }
 0x421   :  { %3093 = vmatmul.mubr.bf16.vlgmr.msra.gmra.mrb[12].mxu1 %v748_v38 }
 0x422   :  { %3097 = vmatpush3.bf16.msra.mxu1 %v752_v50  ;;  %3098 = vmatprep.mubr.msk.bf16.mxu1 %vm3685_vm0, %v3684_v2 }
 0x423   :  { %3122 = vmatprep.subr.bf16.mxu1 %v3684_v2 }
 0x4ec   :  { %v4043_v46 = vpop.f32.mrb[8].mxu1 }
 0x4ed   :  { %v3088_v47 = vpop.f32.mrb[9].mxu1 }
 0x4ee   :  { %v4045_v28 = vpop.f32.mrb[10].mxu1 }
 0x4ef   :  { %v862_v30 = vpack.c.bf16 %v4045_v28, %v4043_v46  ;;  %v3089_v36 = vpop.f32.mrb[11].mxu1 }
 0x4f4   :  { %v913_v48 = vpop.f32.mrb[12].mxu1 }
 0x4f5   :  { %v914_v51 = vadd.f32 %v913_v48, %v4020_v6  ;;  %v3094_v34 = vpop.f32.mrb[13].mxu1  ;;  %v2866_v48 = vld [vmem:[%s4291_s10] ss:$0 sm:$0xff] }
 0x4f6   :  { %v916_v35 = vpop.f32.mrb[14].mxu1 }
 0x4f7   :  { %v917_v38 = vadd.f32 %v916_v35, %v4022_v10  ;;  %v3095_v52 = vpop.f32.mrb[15].mxu1  ;;  %v920_v53 = vsel %vm794_vm5, %v914_v51, -inf }
 0x4f8   :  { %921 = vmax.xlane.f32.xlu0 %v920_v53 }
 0x4f9   :  { %v923_v54 = vsel %vm794_vm5, %v917_v38, -inf }
 0x4fa   :  { %924 = vmax.xlane.f32.xlu1 %v923_v54 }
 0x585   :  { %v922_v50 = vpop.xlane.xlu0 %921 }
 0x586   :  { %v926_v55 = vsub.f32 %v914_v51, %v922_v50 }
 0x587   :  { %v925_v56 = vpop.xlane.xlu1 %924 }
 0x588   :  { %v928_v57 = vmul.f32 1.442695, %v926_v55  ;;  %v927_v58 = vsub.f32 %v917_v38, %v925_v56 }
 0x58a   :  { %3518 = vpow2.f32 %v928_v57  ;;  %v930_v59 = vmul.f32 1.442695, %v927_v58  ;;  %v3386_v58 = vld [vmem:[#allocation9] sm:$0xff]  }
 0x58c   :  { %3520 = vpow2.f32 %v930_v59  ;;  %v3387_v59 = vld [vmem:[#allocation9 + $0x8] sm:$0xff]  }
 0x594   :  { %v3519_v60 = vpop.eup %3518 }
 0x595   :  { %v932_v61 = vsel %vm794_vm5, %v3519_v60, 0.0 }
 0x596   :  { %v3521_v62 = vpop.eup %3520  ;;  %933 = vadd.xlane.f32.xlu0 %v932_v61  ;;  %v3391_v61 = vld [vmem:[#allocation9 + $0x28] sm:$0xff]  }
 0x597   :  { %v935_v63 = vsel %vm794_vm5, %v3521_v62, 0.0 }
 0x598   :  { %936 = vadd.xlane.f32.xlu1 %v935_v63  ;;  %v3393_v63 = vld [vmem:[#allocation9 + $0x38] sm:$0xff]  }
 0x623   :  { %v934_v15 = vpop.xlane.xlu0 %933 }
 0x624   :  { %3522 = vrcp.f32 %v934_v15 }
 0x625   :  { %v937_v16 = vpop.xlane.xlu1 %936 }
 0x626   :  { %3524 = vrcp.f32 %v937_v16 }
 0x62e   :  { %v3523_v18 = vpop.eup %3522 }
 0x62f   :  { %v940_v20 = vmul.f32 %v3523_v18, %v3519_v60  ;;  %v3388_v60 = vld [vmem:[#allocation9 + $0x10] sm:$0xff]  }
 0x630   :  { %v3525_v19 = vpop.eup %3524 }
 0x631   :  { %v941_v21 = vmul.f32 %v3525_v19, %v3521_v62  ;;  %v3392_v62 = vld [vmem:[#allocation9 + $0x30] sm:$0xff]  }
 0x633   :  { %v942_v23 = vpack.c.bf16 %v941_v21, %v940_v20 }
 0x635   :  { %3099 = vmatmul.mubr.msk.bf16.vlgmr.msra.gmra.mrb[16].mxu1 %vm794_vm5, %v942_v23 }
 0x636   :  { %3123 = vmatpush3.bf16.msra.mxu1 %v3370_v22  ;;  %3138 = vmatprep.mubr.msk.bf16.mxu1 %vm3685_vm0, %v3684_v2 }
 0x637   :  { %3124 = vmatprep.subr.bf16.mxu1 %v3684_v2 }
 0x63a   :  { %3125 = vmatpush3.bf16.msra.mxu1 %v3371_v24 }
 0x63b   :  { %3126 = vmatprep.subr.bf16.mxu1 %v3684_v2 }
 0x63e   :  { %3127 = vmatpush3.bf16.msra.mxu1 %v3372_v25 }
 0x63f   :  { %3128 = vmatprep.subr.bf16.mxu1 %v3684_v2 }
 0x642   :  { %3129 = vmatpush3.bf16.msra.mxu1 %v3373_v26 }
 0x643   :  { %3130 = vmatprep.subr.bf16.mxu1 %v3684_v2 }
 0x646   :  { %3131 = vmatpush3.bf16.msra.mxu1 %v3374_v27  ;;  %v2867_v27 = vld [vmem:[%s4291_s10 + $0x1] ss:$0 sm:$0xff] }
 0x647   :  { %3132 = vmatprep.subr.bf16.mxu1 %v3684_v2 }
 0x64a   :  { %3133 = vmatpush3.bf16.msra.mxu1 %v3375_v29 }
 0x64b   :  { %3134 = vmatprep.subr.bf16.mxu1 %v3684_v2 }
 0x64e   :  { %3135 = vmatpush3.bf16.msra.mxu1 %v3376_v31 }
 0x64f   :  { %3136 = vmatprep.subr.bf16.mxu1 %v3684_v2 }
 0x652   :  { %3137 = vmatpush3.bf16.msra.mxu1 %v3377_v32 }
 0x653   :  { %3162 = vmatprep.subr.bf16.mxu1 %v3684_v2 }
 0x655   :  { %3139 = vmatmul.mubr.bf16.vlgmr.msra.gmra.mrb[20].mxu1 %v862_v30 }
 0x656   :  { %3178 = vmatprep.mubr.msk.bf16.mxu1 %vm3685_vm0, %v3684_v2 }
 0x708   :  { %v980_v37 = vpop.f32.mrb[16].mxu1 }
 0x709   :  { %v3100_v42 = vpop.f32.mrb[17].mxu1 }
 0x70a   :  { %v983_v43 = vpop.f32.mrb[18].mxu1  ;;  %v2868_v42 = vld [vmem:[%s4291_s10 + $0x2] ss:$0 sm:$0xff] }
 0x70b   :  { %v987_v44 = vpack.c.bf16 %v983_v43, %v980_v37  ;;  %v3101_v40 = vpop.f32.mrb[19].mxu1 }
 0x70d   :  { %3119 = vmatmul.mubr.bf16.vlgmr.msra.gmra.mrb[8].mxu0 %v987_v44 }
 0x70e   :  { %3158 = vmatprep.mubr.msk.bf16.mxu0 %vm3685_vm0, %v3684_v2  ;;  %3143 = vmatpush3.bf16.msra.mxu0 %v3386_v58 }
 0x70f   :  { %3144 = vmatprep.subr.bf16.mxu0 %v3684_v2 }
 0x712   :  { %3145 = vmatpush3.bf16.msra.mxu0 %v3387_v59 }
 0x713   :  { %3146 = vmatprep.subr.bf16.mxu0 %v3684_v2 }
 0x716   :  { %3147 = vmatpush3.bf16.msra.mxu0 %v3388_v60 }
 0x717   :  { %3148 = vmatprep.subr.bf16.mxu0 %v3684_v2 }
 0x728   :  { %v1176_v47 = vpop.f32.mrb[20].mxu1 }
 0x729   :  { %v3140_v36 = vpop.f32.mrb[21].mxu1 }
 0x72a   :  { %v1179_v46 = vpop.f32.mrb[22].mxu1  ;;  %v3394_v36 = vld [vmem:[#allocation10] sm:$0xff]  }
 0x72b   :  { %v3141_v28 = vpop.f32.mrb[23].mxu1  ;;  %3163 = vmatpush3.bf16.msra.mxu1 %v3394_v36  ;;  %v3416_v36 = vld [vmem:[#allocation5 + $0x1e4] ss:$24 sps:$4 sm:$0xff]  }
 0x72c   :  { %3164 = vmatprep.subr.bf16.mxu1 %v3684_v2  ;;  %v3396_v28 = vld [vmem:[#allocation10 + $0x10] sm:$0xff]  }
 0x7e0   :  { %v1087_v30 = vpop.f32.mrb[8].mxu0 }
 0x7e1   :  { %v1177_v51 = vadd.f32 %v1176_v47, %v1087_v30  ;;  %v3120_v34 = vpop.f32.mrb[9].mxu0  ;;  %v3397_v30 = vld [vmem:[#allocation10 + $0x18] sm:$0xff]  }
 0x7e2   :  { %v1090_v35 = vpop.f32.mrb[10].mxu0  ;;  %v3400_v34 = vld [vmem:[#allocation10 + $0x30] sm:$0xff]  }
 0x7e3   :  { %v1188_v38 = vadd.f32 %v2866_v48, %v1177_v51  ;;  %v1180_v52 = vadd.f32 %v1179_v46, %v1090_v35  ;;  %v3121_v53 = vpop.f32.mrb[11].mxu0  ;;  %v3395_v46 = vld [vmem:[#allocation10 + $0x8] sm:$0xff]   ;;  %v3401_v35 = vld [vmem:[#allocation10 + $0x38] sm:$0xff]  }
 0x7e4   :  { %3165 = vmatpush3.bf16.msra.mxu1 %v3395_v46  ;;  %v3399_v51 = vld [vmem:[#allocation10 + $0x28] sm:$0xff]   ;;  %v3414_v46 = vld [vmem:[#allocation5 + $0x1e0] ss:$24 sps:$4 sm:$0xff]  }
 0x7e5   :  { %v1189_v54 = vadd.f32 %v2866_v48, %v1180_v52  ;;  %v1190_v50 = vadd.f32 %v1188_v38, %v3951_v45  ;;  %v3389_v45 = vld [vmem:[#allocation9 + $0x18] sm:$0xff]   ;;  %3166 = vmatprep.subr.bf16.mxu1 %v3684_v2  ;;  %v3398_v48 = vld [vmem:[#allocation10 + $0x20] sm:$0xff]   ;;  %v2869_v38 = vld [vmem:[%s4296_s0] ss:$0 sm:$0xff] }
 0x7e6   :  { %3149 = vmatpush3.bf16.msra.mxu0 %v3389_v45 }
 0x7e7   :  { %1194 = vadd.xlane.f32.xlu0 %v1190_v50  ;;  %v1191_v55 = vadd.f32 %v1189_v54, %v3958_v49  ;;  %v1200_v56 = vmul.f32 %v1190_v50, %v1190_v50  ;;  %v3390_v49 = vld [vmem:[#allocation9 + $0x20] sm:$0xff]   ;;  %3150 = vmatprep.subr.bf16.mxu0 %v3684_v2 }
 0x7e8   :  { %3167 = vmatpush3.bf16.msra.mxu1 %v3396_v28  ;;  %v3419_v28 = vld [vmem:[#allocation5 + $0x1ec] ss:$24 sps:$4 sm:$0xff]  }
 0x7e9   :  { %1196 = vadd.xlane.f32.xlu1 %v1191_v55  ;;  %v1201_v57 = vmul.f32 %v1191_v55, %v1191_v55  ;;  %3168 = vmatprep.subr.bf16.mxu1 %v3684_v2 }
 0x7ea   :  { %3151 = vmatpush3.bf16.msra.mxu0 %v3390_v49 }
 0x7eb   :  { %1202 = vadd.xlane.f32.xlu0 %v1200_v56  ;;  %3152 = vmatprep.subr.bf16.mxu0 %v3684_v2 }
 0x7ec   :  { %3169 = vmatpush3.bf16.msra.mxu1 %v3397_v30  ;;  %v3417_v30 = vld [vmem:[#allocation5 + $0x1e8] ss:$24 sps:$4 sm:$0xff]  }
 0x7ed   :  { %1204 = vadd.xlane.f32.xlu1 %v1201_v57  ;;  %3170 = vmatprep.subr.bf16.mxu1 %v3684_v2 }
 0x7ee   :  { %3153 = vmatpush3.bf16.msra.mxu0 %v3391_v61 }
 0x7ef   :  { %3154 = vmatprep.subr.bf16.mxu0 %v3684_v2 }
 0x7f0   :  { %3171 = vmatpush3.bf16.msra.mxu1 %v3398_v48  ;;  %v3422_v48 = vld [vmem:[#allocation5 + $0x214] ss:$24 sps:$4 sm:$0xff]  }
 0x7f1   :  { %3172 = vmatprep.subr.bf16.mxu1 %v3684_v2 }
 0x7f2   :  { %3155 = vmatpush3.bf16.msra.mxu0 %v3392_v62 }
 0x7f3   :  { %3156 = vmatprep.subr.bf16.mxu0 %v3684_v2 }
 0x7f4   :  { %3173 = vmatpush3.bf16.msra.mxu1 %v3399_v51  ;;  %v3420_v51 = vld [vmem:[#allocation5 + $0x210] ss:$24 sps:$4 sm:$0xff]  }
 0x7f5   :  { %3174 = vmatprep.subr.bf16.mxu1 %v3684_v2 }
 0x7f6   :  { %3157 = vmatpush3.bf16.msra.mxu0 %v3393_v63 }
 0x7f8   :  { %3175 = vmatpush3.bf16.msra.mxu1 %v3400_v34  ;;  %v3425_v34 = vld [vmem:[#allocation5 + $0x21c] ss:$24 sps:$4 sm:$0xff]  }
 0x7f9   :  { %3176 = vmatprep.subr.bf16.mxu1 %v3684_v2 }
 0x7fc   :  { %3177 = vmatpush3.bf16.msra.mxu1 %v3401_v35  ;;  %v3423_v35 = vld [vmem:[#allocation5 + $0x218] ss:$24 sps:$4 sm:$0xff]  }
 0x874   :  { %v1195_v0 = vpop.xlane.xlu0 %1194 }
 0x875   :  { %v1198_v1 = vmul.f32 0.03125, %v1195_v0 }
 0x876   :  { %v1197_v3 = vpop.xlane.xlu1 %1196 }
 0x877   :  { %v1199_v11 = vmul.f32 0.03125, %v1197_v3  ;;  %v1208_v13 = vmul.f32 %v1198_v1, %v1198_v1  ;;  %v1214_v25 = vsub.f32 %v1190_v50, %v1198_v1 }
 0x878   :  { %v1203_v12 = vpop.xlane.xlu0 %1202 }
 0x879   :  { %v1206_v14 = vmul.f32 0.03125, %v1203_v12  ;;  %v1209_v16 = vmul.f32 %v1199_v11, %v1199_v11  ;;  %v1215_v29 = vsub.f32 %v1191_v55, %v1199_v11 }
 0x87a   :  { %v1205_v15 = vpop.xlane.xlu1 %1204 }
 0x87b   :  { %v1210_v18 = vsub.f32 %v1206_v14, %v1208_v13  ;;  %v1207_v19 = vmul.f32 0.03125, %v1205_v15 }
 0x87d   :  { %v1212_v20 = vmax.f32 %v1210_v18, 0.0  ;;  %v1211_v21 = vsub.f32 %v1207_v19, %v1209_v16  ;;  %v2878_v19 = vld [vmem:[%s4291_s10 + $0x3] ss:$0 sm:$0xff] }
 0x87f   :  { %v1216_v22 = vadd.f32 1e-12, %v1212_v20  ;;  %v1213_v23 = vmax.f32 %v1211_v21, 0.0 }
 0x881   :  { %3526 = vrsqrt.f32 %v1216_v22  ;;  %v1217_v24 = vadd.f32 1e-12, %v1213_v23 }
 0x883   :  { %3528 = vrsqrt.f32 %v1217_v24 }
 0x88b   :  { %v3527_v26 = vpop.eup %3526 }
 0x88c   :  { %v1220_v31 = vmul.f32 %v3527_v26, %v1214_v25 }
 0x88d   :  { %v3529_v32 = vpop.eup %3528 }
 0x88e   :  { %v1221_v33 = vmul.f32 %v3529_v32, %v1215_v29  ;;  %v1226_v37 = vmul.f32 %v2867_v27, %v1220_v31  ;;  %v3404_v32 = vld [vmem:[#allocation5 + $0x184] ss:$24 sps:$4 sm:$0xff]  }
 0x88f   :  { %1846 = vmatprep.subr.bf16.mxu0 %v3404_v32  ;;  %v2887_v32 = vld [vmem:[%s4291_s10 + $0x4] ss:$0 sm:$0xff] }
 0x890   :  { %v1227_v43 = vmul.f32 %v2867_v27, %v1221_v33  ;;  %v4099_v44 = vadd.f32 %v2868_v42, %v1226_v37  ;;  %v3402_v33 = vld [vmem:[#allocation5 + $0x180] ss:$24 sps:$4 sm:$0xff]   ;;  %v3407_v37 = vld [vmem:[#allocation5 + $0x18c] ss:$24 sps:$4 sm:$0xff]  }
 0x891   :  { %1889 = vmatprep.subr.bf16.mxu1 %v3407_v37 }
 0x892   :  { %v4101_v40 = vadd.f32 %v2868_v42, %v1227_v43  ;;  %v3405_v42 = vld [vmem:[#allocation5 + $0x188] ss:$24 sps:$4 sm:$0xff]   ;;  %v3410_v43 = vld [vmem:[#allocation5 + $0x1b4] ss:$24 sps:$4 sm:$0xff]  }
 0x894   :  { %v1234_v47 = vpack.c.bf16 %v4101_v40, %v4099_v44 }
 0x896   :  { %3159 = vmatmul.mubr.bf16.vlgmr.msra.gmra.mrb[12].mxu0 %v1234_v47  ;;  %v3411_v47 = vld [vmem:[#allocation5 + $0x1b8] ss:$24 sps:$4 sm:$0xff]  }
 0x897   :  { %1878 = vmatprep.mubr.bf16.mxu0 %v3683_v17  ;;  %1847 = vmatpush1.bf16.msra.mxu0 %v3402_v33 }
 0x898   :  { %1848 = vmatprep.subr.bf16.mxu0 %v3410_v43  ;;  %v2888_v43 = vld [vmem:[%s4291_s10 + $0x5] ss:$0 sm:$0xff] }
 0x969   :  { %v1340_v52 = vpop.f32.mrb[12].mxu0 }
 0x96a   :  { %v1341_v53 = vadd.f32 %v2869_v38, %v1340_v52  ;;  %v3160_v54 = vpop.f32.mrb[13].mxu0  ;;  %v3426_v52 = vld [vmem:[#allocation5 + $0x240] ss:$24 sps:$4 sm:$0xff]  }
 0x96b   :  { %v1343_v50 = vpop.f32.mrb[14].mxu0  ;;  %v3429_v54 = vld [vmem:[#allocation5 + $0x248] ss:$24 sps:$4 sm:$0xff]  }
 0x96c   :  { %v1349_v55 = vmul.f32 0.044715, %v1341_v53  ;;  %v1344_v56 = vadd.f32 %v2869_v38, %v1343_v50  ;;  %v3161_v57 = vpop.f32.mrb[15].mxu0  ;;  %v1347_v12 = vmul.f32 0.5, %v1341_v53  ;;  %v3428_v38 = vld [vmem:[#allocation5 + $0x244] ss:$24 sps:$4 sm:$0xff]  }
 0x96d   :  { %v3434_v50 = vld [vmem:[#allocation5 + $0x274] ss:$24 sps:$4 sm:$0xff]   ;;  %v3435_v57 = vld [vmem:[#allocation5 + $0x278] ss:$24 sps:$4 sm:$0xff]  }
 0x96e   :  { %v1351_v58 = vmul.f32 %v1349_v55, %v1341_v53  ;;  %v1350_v59 = vmul.f32 0.044715, %v1344_v56  ;;  %v1348_v13 = vmul.f32 0.5, %v1344_v56  ;;  %v3432_v55 = vld [vmem:[#allocation5 + $0x270] ss:$24 sps:$4 sm:$0xff]  }
 0x970   :  { %v1353_v60 = vmul.f32 %v1351_v58, %v1341_v53  ;;  %v1352_v45 = vmul.f32 %v1350_v59, %v1344_v56  ;;  %v3440_v58 = vld [vmem:[#allocation5 + $0x2a4] ss:$24 sps:$4 sm:$0xff]   ;;  %v3438_v59 = vld [vmem:[#allocation5 + $0x2a0] ss:$24 sps:$4 sm:$0xff]  }
 0x972   :  { %v1355_v49 = vadd.f32 %v1353_v60, %v1341_v53  ;;  %v1354_v61 = vmul.f32 %v1352_v45, %v1344_v56  ;;  %v3431_v53 = vld [vmem:[#allocation5 + $0x24c] ss:$24 sps:$4 sm:$0xff]   ;;  %v3441_v45 = vld [vmem:[#allocation5 + $0x2a8] ss:$24 sps:$4 sm:$0xff]  }
 0x973   :  { %v3443_v60 = vld [vmem:[#allocation5 + $0x2ac] ss:$24 sps:$4 sm:$0xff]  }
 0x974   :  { %v1357_v62 = vmul.f32 0.7978846, %v1355_v49  ;;  %v1356_v63 = vadd.f32 %v1354_v61, %v1344_v56  ;;  %v3437_v56 = vld [vmem:[#allocation5 + $0x27c] ss:$24 sps:$4 sm:$0xff]   ;;  %v3444_v61 = vld [vmem:[#allocation5 + $0x2d0] ss:$24 sps:$4 sm:$0xff]  }
 0x975   :  { %v3446_v49 = vld [vmem:[#allocation5 + $0x2d4] ss:$24 sps:$4 sm:$0xff]  }
 0x976   :  { %3530 = vtanh.f32 %v1357_v62  ;;  %v1358_v0 = vmul.f32 0.7978846, %v1356_v63  ;;  %v3449_v62 = vld [vmem:[#allocation5 + $0x2dc] ss:$24 sps:$4 sm:$0xff]   ;;  %v3447_v63 = vld [vmem:[#allocation5 + $0x2d8] ss:$24 sps:$4 sm:$0xff]  }
 0x978   :  { %3532 = vtanh.f32 %v1358_v0  ;;  %v3452_v0 = vld [vmem:[#allocation5 + $0x194] ss:$24 sps:$4 sm:$0xff]  }
 0x980   :  { %v3531_v1 = vpop.eup %3530 }
 0x981   :  { %v1361_v3 = vadd.f32 1.0, %v3531_v1 }
 0x982   :  { %v3533_v11 = vpop.eup %3532 }
 0x983   :  { %v1362_v14 = vadd.f32 1.0, %v3533_v11  ;;  %v1363_v15 = vmul.f32 %v1361_v3, %v1347_v12 }
 0x985   :  { %v1364_v16 = vmul.f32 %v1362_v14, %v1348_v13 }
 0x987   :  { %v1365_v18 = vpack.c.bf16 %v1364_v16, %v1363_v15 }
 0x989   :  { %3179 = vmatmul.mubr.bf16.vlgmr.msra.gmra.mrb[24].mxu1 %v1365_v18 }
 0x98a   :  { %1921 = vmatprep.mubr.bf16.mxu1 %v3683_v17  ;;  %1890 = vmatpush1.bf16.msra.mxu1 %v3405_v42 }
 0xa5c   :  { %v1469_v20 = vpop.f32.mrb[24].mxu1 }
 0xa5d   :  { %v1470_v21 = vadd.f32 %v2878_v19, %v1469_v20  ;;  %v3180_v22 = vpop.f32.mrb[25].mxu1 }
 0xa5e   :  { %v1472_v23 = vpop.f32.mrb[26].mxu1 }
 0xa5f   :  { %v4121_v24 = vadd.f32 %v1470_v21, %v4099_v44  ;;  %v1473_v25 = vadd.f32 %v2878_v19, %v1472_v23  ;;  %v3181_v26 = vpop.f32.mrb[27].mxu1  ;;  %v3408_v44 = vld [vmem:[#allocation5 + $0x1b0] ss:$24 sps:$4 sm:$0xff]  }
 0xa60   :  { %1849 = vmatpush1.bf16.msra.mxu0 %v3408_v44 }
 0xa61   :  { %v4124_v27 = vadd.f32 %v1473_v25, %v4101_v40  ;;  %1480 = vadd.xlane.f32.xlu0 %v4121_v24  ;;  %v1486_v29 = vmul.f32 %v4121_v24, %v4121_v24  ;;  %v3413_v40 = vld [vmem:[#allocation5 + $0x1bc] ss:$24 sps:$4 sm:$0xff]   ;;  %1850 = vmatprep.subr.bf16.mxu0 %v3416_v36 }
 0xa62   :  { %1891 = vmatprep.subr.bf16.mxu1 %v3413_v40 }
 0xa63   :  { %1482 = vadd.xlane.f32.xlu1 %v4124_v27  ;;  %v1487_v31 = vmul.f32 %v4124_v27, %v4124_v27  ;;  %1892 = vmatpush1.bf16.msra.mxu1 %v3411_v47 }
 0xa64   :  { %1851 = vmatpush1.bf16.msra.mxu0 %v3414_v46  ;;  %1893 = vmatprep.subr.bf16.mxu1 %v3419_v28  ;;  %v3455_v28 = vld [vmem:[#allocation5 + $0x1c4] ss:$24 sps:$4 sm:$0xff]  }
 0xa65   :  { %1488 = vadd.xlane.f32.xlu0 %v1486_v29  ;;  %1852 = vmatprep.subr.bf16.mxu0 %v3422_v48  ;;  %v3458_v48 = vld [vmem:[#allocation5 + $0x1f4] ss:$24 sps:$4 sm:$0xff]  }
 0xa67   :  { %1490 = vadd.xlane.f32.xlu1 %v1487_v31  ;;  %1894 = vmatpush1.bf16.msra.mxu1 %v3417_v30  ;;  %v3453_v30 = vld [vmem:[#allocation5 + $0x1c0] ss:$24 sps:$4 sm:$0xff]  }
 0xa68   :  { %1853 = vmatpush1.bf16.msra.mxu0 %v3420_v51  ;;  %1895 = vmatprep.subr.bf16.mxu1 %v3425_v34  ;;  %v3456_v51 = vld [vmem:[#allocation5 + $0x1f0] ss:$24 sps:$4 sm:$0xff]   ;;  %v3461_v34 = vld [vmem:[#allocation5 + $0x224] ss:$24 sps:$4 sm:$0xff]  }
 0xa69   :  { %1854 = vmatprep.subr.bf16.mxu0 %v3428_v38  ;;  %v3464_v38 = vld [vmem:[#allocation5 + $0x254] ss:$24 sps:$4 sm:$0xff]  }
 0xa6b   :  { %1896 = vmatpush1.bf16.msra.mxu1 %v3423_v35  ;;  %v3459_v35 = vld [vmem:[#allocation5 + $0x220] ss:$24 sps:$4 sm:$0xff]  }
 0xa6c   :  { %1855 = vmatpush1.bf16.msra.mxu0 %v3426_v52  ;;  %1897 = vmatprep.subr.bf16.mxu1 %v3431_v53  ;;  %v3462_v52 = vld [vmem:[#allocation5 + $0x250] ss:$24 sps:$4 sm:$0xff]   ;;  %v3467_v53 = vld [vmem:[#allocation5 + $0x284] ss:$24 sps:$4 sm:$0xff]  }
 0xa6d   :  { %1856 = vmatprep.subr.bf16.mxu0 %v3434_v50  ;;  %v3468_v50 = vld [vmem:[#allocation5 + $0x2b0] ss:$24 sps:$4 sm:$0xff]  }
 0xa6f   :  { %1898 = vmatpush1.bf16.msra.mxu1 %v3429_v54  ;;  %v3465_v54 = vld [vmem:[#allocation5 + $0x280] ss:$24 sps:$4 sm:$0xff]  }
 0xa70   :  { %1857 = vmatpush1.bf16.msra.mxu0 %v3432_v55  ;;  %1899 = vmatprep.subr.bf16.mxu1 %v3437_v56  ;;  %v3473_v55 = vld [vmem:[#allocation5 + $0x2e4] ss:$24 sps:$4 sm:$0xff]   ;;  %v3471_v56 = vld [vmem:[#allocation5 + $0x2e0] ss:$24 sps:$4 sm:$0xff]  }
 0xa71   :  { %1858 = vmatprep.subr.bf16.mxu0 %v3440_v58 }
 0xa73   :  { %1900 = vmatpush1.bf16.msra.mxu1 %v3435_v57  ;;  %v2891_v57 = vld [vmem:[%s4287_s6 + $0x6] sm:$0x3f] }
 0xa74   :  { %1859 = vmatpush1.bf16.msra.mxu0 %v3438_v59  ;;  %1901 = vmatprep.subr.bf16.mxu1 %v3443_v60  ;;  %v1579_v58 = vrot.slane %v2891_v57, %v346_v5  ;;  %v1583_v59 = vrot.slane %v2891_v57, %v350_v7  ;;  %v1587_v60 = vrot.slane %v2891_v57, %v354_v8 }
 0xa75   :  { %1860 = vmatprep.subr.bf16.mxu0 %v3446_v49 }
 0xa77   :  { %1902 = vmatpush1.bf16.msra.mxu1 %v3441_v45 }
 0xa78   :  { %1903 = vmatprep.subr.bf16.mxu1 %v3449_v62  ;;  %1861 = vmatpush1.bf16.msra.mxu0 %v3444_v61  ;;  %v1591_v61 = vrot.slane %v2891_v57, %v358_v9 }
 0xa79   :  { %1932 = vmatprep.subr.bf16.mxu0 %v3452_v0 }
 0xa7b   :  { %1904 = vmatpush1.bf16.msra.mxu1 %v3447_v63 }
 0xa7c   :  { %3182 = vmatprep.subr.bf16.mxu1 %v3684_v2 }
 0xaee   :  { %v1481_v1 = vpop.xlane.xlu0 %1480 }
 0xaef   :  { %v1484_v3 = vmul.f32 0.03125, %v1481_v1 }
 0xaf0   :  { %v1483_v11 = vpop.xlane.xlu1 %1482 }
 0xaf1   :  { %v1485_v12 = vmul.f32 0.03125, %v1483_v11  ;;  %v1494_v14 = vmul.f32 %v1484_v3, %v1484_v3  ;;  %v1500_v29 = vsub.f32 %v4121_v24, %v1484_v3  ;;  %v3450_v24 = vld [vmem:[#allocation5 + $0x190] ss:$24 sps:$4 sm:$0xff]  }
 0xaf2   :  { %v1489_v13 = vpop.xlane.xlu0 %1488 }
 0xaf3   :  { %v1492_v15 = vmul.f32 0.03125, %v1489_v13  ;;  %v1495_v18 = vmul.f32 %v1485_v12, %v1485_v12  ;;  %v1501_v33 = vsub.f32 %v4124_v27, %v1485_v12 }
 0xaf4   :  { %v1491_v16 = vpop.xlane.xlu1 %1490 }
 0xaf5   :  { %v1496_v19 = vsub.f32 %v1492_v15, %v1494_v14  ;;  %v1493_v20 = vmul.f32 0.03125, %v1491_v16 }
 0xaf7   :  { %v1498_v21 = vmax.f32 %v1496_v19, 0.0  ;;  %v1497_v22 = vsub.f32 %v1493_v20, %v1495_v18 }
 0xaf9   :  { %v1502_v23 = vadd.f32 1e-12, %v1498_v21  ;;  %v1499_v25 = vmax.f32 %v1497_v22, 0.0 }
 0xafb   :  { %3534 = vrsqrt.f32 %v1502_v23  ;;  %v1503_v26 = vadd.f32 1e-12, %v1499_v25 }
 0xafd   :  { %3536 = vrsqrt.f32 %v1503_v26  ;;  %v1595_v26 = vrot.slane %v2891_v57, %v362_v39 }
 0xb05   :  { %v3535_v31 = vpop.eup %3534 }
 0xb06   :  { %v1506_v37 = vmul.f32 %v3535_v31, %v1500_v29  ;;  %v1599_v31 = vrot.slane %v2891_v57, %v366_v41 }
 0xb07   :  { %v3537_v42 = vpop.eup %3536 }
 0xb08   :  { %v1507_v44 = vmul.f32 %v3537_v42, %v1501_v33  ;;  %v1512_v40 = vmul.f32 %v2887_v32, %v1506_v37 }
 0xb0a   :  { %v1513_v47 = vmul.f32 %v2887_v32, %v1507_v44  ;;  %v4141_v36 = vadd.f32 %v2888_v43, %v1512_v40 }
 0xb0c   :  { %v4143_v46 = vadd.f32 %v2888_v43, %v1513_v47  ;;  %2889 = vst [vmem:[%s4293_s12 + $0x10] sm:$0xff] %v4141_v36 }
 0xb0e   :  { %2890 = vst [vmem:[%s4293_s12 + $0x18] sm:$0xff] %v4143_v46  ;;  %v1523_v27 = vpack.c.bf16 %v4143_v46, %v4141_v36 }
 0xb10   :  { %1879 = vmatmul.mubr.bf16.vlgmr.msra.gmra.mrb[16].mxu0 %v1523_v27  ;;  %1922 = vmatmul.mubr.bf16.vlgmr.msra.gmra.mrb[28].mxu1 %v1523_v27 }
 0xb11   :  { %1933 = vmatpush1.bf16.msra.mxu0 %v3450_v24  ;;  %1964 = vmatprep.mubr.bf16.mxu0 %v3683_v17  ;;  %v3470_v17 = vld [vmem:[#allocation5 + $0x2b4] ss:$24 sps:$4 sm:$0xff]  }
 0xb12   :  { %1934 = vmatprep.subr.bf16.mxu0 %v3455_v28  ;;  %3184 = vmatprep.mubr.msk.bf16.mxu1 %vm3685_vm0, %v3684_v2 }
 0xb15   :  { %1935 = vmatpush1.bf16.msra.mxu0 %v3453_v30 }
 0xb16   :  { %1936 = vmatprep.subr.bf16.mxu0 %v3458_v48 }
 0xb19   :  { %1937 = vmatpush1.bf16.msra.mxu0 %v3456_v51 }
 0xb1a   :  { %1938 = vmatprep.subr.bf16.mxu0 %v3461_v34 }
 0xb1d   :  { %1939 = vmatpush1.bf16.msra.mxu0 %v3459_v35 }
 0xb1e   :  { %1940 = vmatprep.subr.bf16.mxu0 %v3464_v38 }
 0xb21   :  { %1941 = vmatpush1.bf16.msra.mxu0 %v3462_v52 }
 0xb22   :  { %1942 = vmatprep.subr.bf16.mxu0 %v3467_v53 }
 0xb25   :  { %1943 = vmatpush1.bf16.msra.mxu0 %v3465_v54 }
 0xb26   :  { %1944 = vmatprep.subr.bf16.mxu0 %v3470_v17 }
 0xb29   :  { %1945 = vmatpush1.bf16.msra.mxu0 %v3468_v50 }
 0xb2a   :  { %1946 = vmatprep.subr.bf16.mxu0 %v3473_v55 }
 0xb2d   :  { %1947 = vmatpush1.bf16.msra.mxu0 %v3471_v56 }
 0xb2e   :  { %3206 = vmatprep.subr.bf16.mxu0 %v3684_v2 }
 0xb30   :  { %1965 = vmatmul.mubr.bf16.vlgmr.msra.gmra.mrb[20].mxu0 %v1523_v27 }
 0xb31   :  { %3222 = vmatprep.mubr.msk.bf16.mxu0 %vm3685_vm0, %v3684_v2 }
 0xbe3   :  { %v1880_v45 = vpop.f32.mrb[16].mxu0  ;;  %v1923_v49 = vpop.f32.mrb[28].mxu1 }
 0xbe4   :  { %v1881_v62 = vadd.f32 %v1880_v45, %v1579_v58  ;;  %v1882_v63 = vpop.f32.mrb[17].mxu0  ;;  %v1925_v0 = vpop.f32.mrb[29].mxu1  ;;  %v1924_v12 = vadd.f32 %v1923_v49, %v1587_v60 }
 0xbe5   :  { %v1883_v1 = vadd.f32 %v1882_v63, %v1583_v59  ;;  %v1884_v3 = vpop.f32.mrb[18].mxu0  ;;  %v1927_v11 = vpop.f32.mrb[30].mxu1  ;;  %v4172_v7 = vadd.f32 %v1925_v0, %v1591_v61 }
 0xbe6   :  { %v1885_v13 = vadd.f32 %v1884_v3, %v1579_v58  ;;  %v1928_v5 = vadd.f32 %v1927_v11, %v1587_v60  ;;  %v1886_v14 = vpop.f32.mrb[19].mxu0  ;;  %v1929_v15 = vpop.f32.mrb[31].mxu1  ;;  %v1975_v18 = vmul.f32 0.25, %v1881_v62 }
 0xbe7   :  { %v1887_v16 = vadd.f32 %v1886_v14, %v1583_v59  ;;  %v1930_v8 = vadd.f32 %v1929_v15, %v1591_v61  ;;  %v1976_v21 = vmul.f32 0.25, %v1883_v1 }
 0xbe8   :  { %v1977_v19 = vmul.f32 0.25, %v1885_v13  ;;  %v1981_v20 = vpack.c.bf16 %v1928_v5, %v1924_v12 }
 0xbe9   :  { %v1978_v9 = vmul.f32 0.25, %v1887_v16  ;;  %v1982_v22 = vpack.c.bf16 %v1930_v8, %v4172_v7 }
 0xbea   :  { %v1979_v23 = vpack.c.bf16 %v1977_v19, %v1975_v18  ;;  %3183 = vmatpush3.bf16.xpose.msra.mxu1 %v1981_v20 }
 0xbeb   :  { %v1980_v25 = vpack.c.bf16 %v1978_v9, %v1976_v21  ;;  %3188 = vmatprep.subr.bf16.mxu1 %v3684_v2 }
 0xbf1   :  { %3185 = vmatmul.mubr.bf16.vlgmr.msra.gmra.mrb[32].mxu1 %v1979_v23 }
 0xbf2   :  { %3190 = vmatprep.mubr.msk.bf16.mxu1 %vm3685_vm0, %v3684_v2 }
 0xc03   :  { %v1966_v29 = vpop.f32.mrb[20].mxu0 }
 0xc04   :  { %v1968_v32 = vpop.f32.mrb[21].mxu0  ;;  %v1967_v37 = vadd.f32 %v1966_v29, %v1595_v26  ;;  %v3484_v29 = vld [vmem:[#allocation7 + $0xd0] sm:$0xff]  }
 0xc05   :  { %v1970_v33 = vpop.f32.mrb[22].mxu0  ;;  %v1969_v44 = vadd.f32 %v1968_v32, %v1599_v31  ;;  %v3486_v32 = vld [vmem:[#allocation7 + $0xe0] sm:$0xff]  }
 0xc06   :  { %v1971_v42 = vadd.f32 %v1970_v33, %v1595_v26  ;;  %v1972_v43 = vpop.f32.mrb[23].mxu0  ;;  %v3483_v26 = vld [vmem:[#allocation7 + $0xc8] sm:$0xff]  }
 0xc07   :  { %v1973_v40 = vadd.f32 %v1972_v43, %v1599_v31  ;;  %v3485_v31 = vld [vmem:[#allocation7 + $0xd8] sm:$0xff]   ;;  %v3487_v33 = vld [vmem:[#allocation7 + $0xe8] sm:$0xff]  }
 0xc08   :  { %v1983_v47 = vpack.c.bf16 %v1971_v42, %v1967_v37  ;;  %v3488_v37 = vld [vmem:[#allocation7 + $0xf0] sm:$0xff]  }
 0xc09   :  { %v1984_v24 = vpack.c.bf16 %v1973_v40, %v1969_v44 }
 0xc0a   :  { %3189 = vmatpush3.bf16.msra.mxu1 %v1983_v47 }
 0xc0b   :  { %3194 = vmatprep.subr.bf16.mxu1 %v3684_v2 }
 0xcc4   :  { %v2019_v27 = vpop.f32.mrb[32].mxu1 }
 0xcc5   :  { %v2020_v28 = vadd.f32 %v2019_v27, %v4020_v6  ;;  %v3186_v39 = vpop.f32.mrb[33].mxu1  ;;  %v3474_v27 = vld [vmem:[#allocation7 + $0x80] sm:$0xff]  }
 0xcc6   :  { %v2022_v30 = vpop.f32.mrb[34].mxu1  ;;  %v3475_v39 = vld [vmem:[#allocation7 + $0x88] sm:$0xff]  }
 0xcc7   :  { %v2023_v4 = vadd.f32 %v2022_v30, %v4022_v10  ;;  %v3187_v41 = vpop.f32.mrb[35].mxu1  ;;  %v2026_v48 = vsel %vm794_vm5, %v2020_v28, -inf  ;;  %v3476_v30 = vld [vmem:[#allocation7 + $0x90] sm:$0xff]  }
 0xcc8   :  { %2027 = vmax.xlane.f32.xlu0 %v2026_v48  ;;  %v3478_v41 = vld [vmem:[#allocation7 + $0xa0] sm:$0xff]   ;;  %v3479_v48 = vld [vmem:[#allocation7 + $0xa8] sm:$0xff]  }
 0xcc9   :  { %v2029_v51 = vsel %vm794_vm5, %v2023_v4, -inf }
 0xcca   :  { %2030 = vmax.xlane.f32.xlu1 %v2029_v51  ;;  %v3480_v51 = vld [vmem:[#allocation7 + $0xb0] sm:$0xff]  }
 0xd55   :  { %v2028_v34 = vpop.xlane.xlu0 %2027 }
 0xd56   :  { %v2032_v35 = vsub.f32 %v2020_v28, %v2028_v34  ;;  %v3481_v34 = vld [vmem:[#allocation7 + $0xb8] sm:$0xff]  }
 0xd57   :  { %v2031_v38 = vpop.xlane.xlu1 %2030 }
 0xd58   :  { %v2034_v52 = vmul.f32 1.442695, %v2032_v35  ;;  %v2033_v53 = vsub.f32 %v2023_v4, %v2031_v38  ;;  %v3477_v4 = vld [vmem:[#allocation7 + $0x98] sm:$0xff]  }
 0xd59   :  { %v3489_v35 = vld [vmem:[#allocation7 + $0xf8] sm:$0xff]  }
 0xd5a   :  { %3538 = vpow2.f32 %v2034_v52  ;;  %v2036_v54 = vmul.f32 1.442695, %v2033_v53 }
 0xd5c   :  { %3540 = vpow2.f32 %v2036_v54 }
 0xd64   :  { %v3539_v17 = vpop.eup %3538 }
 0xd65   :  { %v2038_v50 = vsel %vm794_vm5, %v3539_v17, 0.0 }
 0xd66   :  { %v3541_v55 = vpop.eup %3540  ;;  %2039 = vadd.xlane.f32.xlu0 %v2038_v50 }
 0xd67   :  { %v2041_v56 = vsel %vm794_vm5, %v3541_v55, 0.0 }
 0xd68   :  { %2042 = vadd.xlane.f32.xlu1 %v2041_v56 }
 0xdf3   :  { %v2040_v57 = vpop.xlane.xlu0 %2039 }
 0xdf4   :  { %3542 = vrcp.f32 %v2040_v57 }
 0xdf5   :  { %v2043_v58 = vpop.xlane.xlu1 %2042 }
 0xdf6   :  { %3544 = vrcp.f32 %v2043_v58 }
 0xdfe   :  { %v3543_v59 = vpop.eup %3542 }
 0xdff   :  { %v2046_v45 = vmul.f32 %v3543_v59, %v3539_v17  ;;  %v2959_v59 = vld [vmem:[%s4291_s10 + $0x8] ss:$0 sm:$0xff] }
 0xe00   :  { %v3545_v60 = vpop.eup %3544 }
 0xe01   :  { %v2047_v49 = vmul.f32 %v3545_v60, %v3541_v55 }
 0xe03   :  { %v2048_v61 = vpack.c.bf16 %v2047_v49, %v2046_v45 }
 0xe05   :  { %3191 = vmatmul.mubr.msk.bf16.vlgmr.msra.gmra.mrb[36].mxu1 %vm794_vm5, %v2048_v61 }
 0xe06   :  { %3195 = vmatpush3.bf16.xpose.msra.mxu1 %v1982_v22  ;;  %3196 = vmatprep.mubr.msk.bf16.mxu1 %vm3685_vm0, %v3684_v2 }
 0xe07   :  { %3200 = vmatprep.subr.bf16.mxu1 %v3684_v2 }
 0xe0d   :  { %3197 = vmatmul.mubr.bf16.vlgmr.msra.gmra.mrb[40].mxu1 %v1980_v25  ;;  %v3482_v25 = vld [vmem:[#allocation7 + $0xc0] sm:$0xff]  }
 0xe0e   :  { %3201 = vmatpush3.bf16.msra.mxu1 %v1984_v24  ;;  %3202 = vmatprep.mubr.msk.bf16.mxu1 %vm3685_vm0, %v3684_v2 }
 0xe0f   :  { %3226 = vmatprep.subr.bf16.mxu1 %v3684_v2  ;;  %3207 = vmatpush3.bf16.msra.mxu0 %v3482_v25 }
 0xe10   :  { %3208 = vmatprep.subr.bf16.mxu0 %v3684_v2 }
 0xe13   :  { %3209 = vmatpush3.bf16.msra.mxu0 %v3483_v26 }
 0xe14   :  { %3210 = vmatprep.subr.bf16.mxu0 %v3684_v2 }
 0xe17   :  { %3211 = vmatpush3.bf16.msra.mxu0 %v3484_v29 }
 0xe18   :  { %3212 = vmatprep.subr.bf16.mxu0 %v3684_v2 }
 0xe1b   :  { %3213 = vmatpush3.bf16.msra.mxu0 %v3485_v31 }
 0xe1c   :  { %3214 = vmatprep.subr.bf16.mxu0 %v3684_v2 }
 0xe1f   :  { %3215 = vmatpush3.bf16.msra.mxu0 %v3486_v32 }
 0xe20   :  { %3216 = vmatprep.subr.bf16.mxu0 %v3684_v2 }
 0xe23   :  { %3217 = vmatpush3.bf16.msra.mxu0 %v3487_v33 }
 0xe24   :  { %3218 = vmatprep.subr.bf16.mxu0 %v3684_v2 }
 0xe27   :  { %3219 = vmatpush3.bf16.msra.mxu0 %v3488_v37 }
 0xe28   :  { %3220 = vmatprep.subr.bf16.mxu0 %v3684_v2 }
 0xe2b   :  { %3221 = vmatpush3.bf16.msra.mxu0 %v3489_v35  ;;  %v3501_v35 = vld [vmem:[#allocation10 + $0x58] sm:$0xff]  }
 0xe2c   :  { %3246 = vmatprep.subr.bf16.mxu0 %v3684_v2 }
 0xed8   :  { %v4196_v62 = vpop.f32.mrb[36].mxu1 }
 0xed9   :  { %v3192_v63 = vpop.f32.mrb[37].mxu1 }
 0xeda   :  { %v4198_v0 = vpop.f32.mrb[38].mxu1 }
 0xedb   :  { %v2093_v1 = vpack.c.bf16 %v4198_v0, %v4196_v62  ;;  %v3193_v3 = vpop.f32.mrb[39].mxu1 }
 0xee0   :  { %v2145_v11 = vpop.f32.mrb[40].mxu1 }
 0xee1   :  { %v2146_v12 = vadd.f32 %v2145_v11, %v4020_v6  ;;  %v3198_v13 = vpop.f32.mrb[41].mxu1 }
 0xee2   :  { %v2148_v5 = vpop.f32.mrb[42].mxu1  ;;  %v3490_v13 = vld [vmem:[#allocation9 + $0x40] sm:$0xff]  }
 0xee3   :  { %v2149_v14 = vadd.f32 %v2148_v5, %v4022_v10  ;;  %v3199_v15 = vpop.f32.mrb[43].mxu1  ;;  %v2152_v7 = vsel %vm794_vm5, %v2146_v12, -inf  ;;  %v3491_v5 = vld [vmem:[#allocation9 + $0x48] sm:$0xff]  }
 0xee4   :  { %2153 = vmax.xlane.f32.xlu0 %v2152_v7  ;;  %v3495_v15 = vld [vmem:[#allocation9 + $0x68] sm:$0xff]   ;;  %v3496_v7 = vld [vmem:[#allocation9 + $0x70] sm:$0xff]  }
 0xee5   :  { %v2155_v16 = vsel %vm794_vm5, %v2149_v14, -inf }
 0xee6   :  { %2156 = vmax.xlane.f32.xlu1 %v2155_v16  ;;  %v3497_v16 = vld [vmem:[#allocation9 + $0x78] sm:$0xff]  }
 0xf71   :  { %v2154_v8 = vpop.xlane.xlu0 %2153 }
 0xf72   :  { %v2158_v18 = vsub.f32 %v2146_v12, %v2154_v8 }
 0xf73   :  { %v2157_v19 = vpop.xlane.xlu1 %2156 }
 0xf74   :  { %v2160_v20 = vmul.f32 1.442695, %v2158_v18  ;;  %v2159_v21 = vsub.f32 %v2149_v14, %v2157_v19  ;;  %v3492_v14 = vld [vmem:[#allocation9 + $0x50] sm:$0xff]  }
 0xf76   :  { %3546 = vpow2.f32 %v2160_v20  ;;  %v2162_v9 = vmul.f32 1.442695, %v2159_v21 }
 0xf78   :  { %3548 = vpow2.f32 %v2162_v9 }
 0xf80   :  { %v3547_v6 = vpop.eup %3546 }
 0xf81   :  { %v2164_v22 = vsel %vm794_vm5, %v3547_v6, 0.0 }
 0xf82   :  { %v3549_v23 = vpop.eup %3548  ;;  %2165 = vadd.xlane.f32.xlu0 %v2164_v22 }
 0xf83   :  { %v2167_v10 = vsel %vm794_vm5, %v3549_v23, 0.0 }
 0xf84   :  { %2168 = vadd.xlane.f32.xlu1 %v2167_v10 }
0x100f   :  { %v2166_v42 = vpop.xlane.xlu0 %2165 }
0x1010   :  { %3550 = vrcp.f32 %v2166_v42 }
0x1011   :  { %v2169_v43 = vpop.xlane.xlu1 %2168 }
0x1012   :  { %3552 = vrcp.f32 %v2169_v43  ;;  %v2962_v43 = vld [vmem:[%s4291_s10 + $0x9] ss:$0 sm:$0xff] }
0x101a   :  { %v3551_v44 = vpop.eup %3550 }
0x101b   :  { %v2172_v47 = vmul.f32 %v3551_v44, %v3547_v6 }
0x101c   :  { %v3553_v40 = vpop.eup %3552 }
0x101d   :  { %v2173_v24 = vmul.f32 %v3553_v40, %v3549_v23 }
0x101f   :  { %v2174_v28 = vpack.c.bf16 %v2173_v24, %v2172_v47 }
0x1021   :  { %3203 = vmatmul.mubr.msk.bf16.vlgmr.msra.gmra.mrb[44].mxu1 %vm794_vm5, %v2174_v28  ;;  %v2963_v28 = vld [vmem:[%s4291_s10 + $0xa] ss:$0 sm:$0xff] }
0x1022   :  { %3227 = vmatpush3.bf16.msra.mxu1 %v3474_v27  ;;  %3242 = vmatprep.mubr.msk.bf16.mxu1 %vm3685_vm0, %v3684_v2 }
0x1023   :  { %3228 = vmatprep.subr.bf16.mxu1 %v3684_v2 }
0x1026   :  { %3229 = vmatpush3.bf16.msra.mxu1 %v3475_v39 }
0x1027   :  { %3230 = vmatprep.subr.bf16.mxu1 %v3684_v2 }
0x102a   :  { %3231 = vmatpush3.bf16.msra.mxu1 %v3476_v30 }
0x102b   :  { %3232 = vmatprep.subr.bf16.mxu1 %v3684_v2 }
0x102e   :  { %3233 = vmatpush3.bf16.msra.mxu1 %v3477_v4 }
0x102f   :  { %3234 = vmatprep.subr.bf16.mxu1 %v3684_v2 }
0x1032   :  { %3235 = vmatpush3.bf16.msra.mxu1 %v3478_v41 }
0x1033   :  { %3236 = vmatprep.subr.bf16.mxu1 %v3684_v2 }
0x1036   :  { %3237 = vmatpush3.bf16.msra.mxu1 %v3479_v48  ;;  %v3498_v48 = vld [vmem:[#allocation10 + $0x40] sm:$0xff]  }
0x1037   :  { %3238 = vmatprep.subr.bf16.mxu1 %v3684_v2 }
0x103a   :  { %3239 = vmatpush3.bf16.msra.mxu1 %v3480_v51  ;;  %v3499_v51 = vld [vmem:[#allocation10 + $0x48] sm:$0xff]  }
0x103b   :  { %3240 = vmatprep.subr.bf16.mxu1 %v3684_v2 }
0x103e   :  { %3241 = vmatpush3.bf16.msra.mxu1 %v3481_v34  ;;  %v3500_v34 = vld [vmem:[#allocation10 + $0x50] sm:$0xff]  }
0x103f   :  { %3266 = vmatprep.subr.bf16.mxu1 %v3684_v2 }
0x1041   :  { %3243 = vmatmul.mubr.bf16.vlgmr.msra.gmra.mrb[48].mxu1 %v2093_v1 }
0x1042   :  { %3282 = vmatprep.mubr.msk.bf16.mxu1 %vm3685_vm0, %v3684_v2  ;;  %3267 = vmatpush3.bf16.msra.mxu1 %v3498_v48 }
0x1043   :  { %3268 = vmatprep.subr.bf16.mxu1 %v3684_v2 }
0x1046   :  { %3269 = vmatpush3.bf16.msra.mxu1 %v3499_v51 }
0x1047   :  { %3270 = vmatprep.subr.bf16.mxu1 %v3684_v2 }
0x104a   :  { %3271 = vmatpush3.bf16.msra.mxu1 %v3500_v34 }
0x104b   :  { %3272 = vmatprep.subr.bf16.mxu1 %v3684_v2 }
0x104e   :  { %3273 = vmatpush3.bf16.msra.mxu1 %v3501_v35  ;;  %v2987_v35 = vld [vmem:[%s4291_s10 + $0xd] ss:$0 sm:$0xff] }
0x104f   :  { %3274 = vmatprep.subr.bf16.mxu1 %v3684_v2 }
0x10f4   :  { %v2212_v38 = vpop.f32.mrb[44].mxu1 }
0x10f5   :  { %v3204_v52 = vpop.f32.mrb[45].mxu1 }
0x10f6   :  { %v2215_v53 = vpop.f32.mrb[46].mxu1  ;;  %v3503_v52 = vld [vmem:[#allocation10 + $0x68] sm:$0xff]  }
0x10f7   :  { %v2219_v54 = vpack.c.bf16 %v2215_v53, %v2212_v38  ;;  %v3205_v17 = vpop.f32.mrb[47].mxu1  ;;  %v3502_v38 = vld [vmem:[#allocation10 + $0x60] sm:$0xff]   ;;  %v3504_v53 = vld [vmem:[#allocation10 + $0x70] sm:$0xff]  }
0x10f8   :  { %3275 = vmatpush3.bf16.msra.mxu1 %v3502_v38  ;;  %v2965_v17 = vld [vmem:[%s4296_s0 + $0x1] ss:$0 sm:$0xff] }
0x10f9   :  { %3223 = vmatmul.mubr.bf16.vlgmr.msra.gmra.mrb[24].mxu0 %v2219_v54  ;;  %3276 = vmatprep.subr.bf16.mxu1 %v3684_v2  ;;  %v3505_v54 = vld [vmem:[#allocation10 + $0x78] sm:$0xff]  }
0x10fa   :  { %3262 = vmatprep.mubr.msk.bf16.mxu0 %vm3685_vm0, %v3684_v2  ;;  %3247 = vmatpush3.bf16.msra.mxu0 %v3490_v13 }
0x10fb   :  { %3248 = vmatprep.subr.bf16.mxu0 %v3684_v2 }
0x10fc   :  { %3277 = vmatpush3.bf16.msra.mxu1 %v3503_v52 }
0x10fd   :  { %3278 = vmatprep.subr.bf16.mxu1 %v3684_v2 }
0x10fe   :  { %3249 = vmatpush3.bf16.msra.mxu0 %v3491_v5 }
0x10ff   :  { %3250 = vmatprep.subr.bf16.mxu0 %v3684_v2 }
0x1100   :  { %3279 = vmatpush3.bf16.msra.mxu1 %v3504_v53 }
0x1101   :  { %3280 = vmatprep.subr.bf16.mxu1 %v3684_v2 }
0x1102   :  { %3251 = vmatpush3.bf16.msra.mxu0 %v3492_v14 }
0x1103   :  { %3252 = vmatprep.subr.bf16.mxu0 %v3684_v2 }
0x1104   :  { %3281 = vmatpush3.bf16.msra.mxu1 %v3505_v54 }
0x1114   :  { %v2408_v50 = vpop.f32.mrb[48].mxu1 }
0x1115   :  { %v3244_v55 = vpop.f32.mrb[49].mxu1 }
0x1116   :  { %v2411_v56 = vpop.f32.mrb[50].mxu1 }
0x1117   :  { %v3245_v57 = vpop.f32.mrb[51].mxu1 }
0x11cc   :  { %v2319_v58 = vpop.f32.mrb[24].mxu0 }
0x11cd   :  { %v2409_v60 = vadd.f32 %v2408_v50, %v2319_v58  ;;  %v3224_v45 = vpop.f32.mrb[25].mxu0 }
0x11ce   :  { %v2322_v49 = vpop.f32.mrb[26].mxu0 }
0x11cf   :  { %v2421_v61 = vadd.f32 %v2959_v59, %v2409_v60  ;;  %v2412_v62 = vadd.f32 %v2411_v56, %v2322_v49  ;;  %v3225_v63 = vpop.f32.mrb[27].mxu0 }
0x11d1   :  { %v2422_v0 = vadd.f32 %v2959_v59, %v2412_v62  ;;  %v2423_v1 = vadd.f32 %v2421_v61, %v4141_v36  ;;  %v3493_v36 = vld [vmem:[#allocation9 + $0x58] sm:$0xff]  }
0x11d2   :  { %3253 = vmatpush3.bf16.msra.mxu0 %v3493_v36 }
0x11d3   :  { %2427 = vadd.xlane.f32.xlu0 %v2423_v1  ;;  %v2424_v3 = vadd.f32 %v2422_v0, %v4143_v46  ;;  %v2433_v11 = vmul.f32 %v2423_v1, %v2423_v1  ;;  %v3494_v46 = vld [vmem:[#allocation9 + $0x60] sm:$0xff]   ;;  %3254 = vmatprep.subr.bf16.mxu0 %v3684_v2 }
0x11d5   :  { %2429 = vadd.xlane.f32.xlu1 %v2424_v3  ;;  %v2434_v12 = vmul.f32 %v2424_v3, %v2424_v3 }
0x11d6   :  { %3255 = vmatpush3.bf16.msra.mxu0 %v3494_v46 }
0x11d7   :  { %2435 = vadd.xlane.f32.xlu0 %v2433_v11  ;;  %3256 = vmatprep.subr.bf16.mxu0 %v3684_v2 }
0x11d9   :  { %2437 = vadd.xlane.f32.xlu1 %v2434_v12 }
0x11da   :  { %3257 = vmatpush3.bf16.msra.mxu0 %v3495_v15 }
0x11db   :  { %3258 = vmatprep.subr.bf16.mxu0 %v3684_v2 }
0x11de   :  { %3259 = vmatpush3.bf16.msra.mxu0 %v3496_v7 }
0x11df   :  { %3260 = vmatprep.subr.bf16.mxu0 %v3684_v2 }
0x11e2   :  { %3261 = vmatpush3.bf16.msra.mxu0 %v3497_v16  ;;  %v2975_v16 = vld [vmem:[%s4291_s10 + $0xb] ss:$0 sm:$0xff] }
0x1260   :  { %v2428_v8 = vpop.xlane.xlu0 %2427 }
0x1261   :  { %v2431_v18 = vmul.f32 0.03125, %v2428_v8 }
0x1262   :  { %v2430_v19 = vpop.xlane.xlu1 %2429 }
0x1263   :  { %v2432_v20 = vmul.f32 0.03125, %v2430_v19  ;;  %v2441_v9 = vmul.f32 %v2431_v18, %v2431_v18  ;;  %v2447_v37 = vsub.f32 %v2423_v1, %v2431_v18 }
0x1264   :  { %v2436_v21 = vpop.xlane.xlu0 %2435 }
0x1265   :  { %v2439_v6 = vmul.f32 0.03125, %v2436_v21  ;;  %v2442_v23 = vmul.f32 %v2432_v20, %v2432_v20  ;;  %v2448_v44 = vsub.f32 %v2424_v3, %v2432_v20 }
0x1266   :  { %v2438_v22 = vpop.xlane.xlu1 %2437 }
0x1267   :  { %v2443_v10 = vsub.f32 %v2439_v6, %v2441_v9  ;;  %v2440_v25 = vmul.f32 0.03125, %v2438_v22 }
0x1269   :  { %v2445_v26 = vmax.f32 %v2443_v10, 0.0  ;;  %v2444_v29 = vsub.f32 %v2440_v25, %v2442_v23 }
0x126b   :  { %v2449_v31 = vadd.f32 1e-12, %v2445_v26  ;;  %v2446_v32 = vmax.f32 %v2444_v29, 0.0 }
0x126d   :  { %3554 = vrsqrt.f32 %v2449_v31  ;;  %v2450_v33 = vadd.f32 1e-12, %v2446_v32 }
0x126f   :  { %3556 = vrsqrt.f32 %v2450_v33 }
0x1277   :  { %v3555_v42 = vpop.eup %3554 }
0x1278   :  { %v2453_v40 = vmul.f32 %v3555_v42, %v2447_v37 }
0x1279   :  { %v3557_v47 = vpop.eup %3556 }
0x127a   :  { %v2454_v24 = vmul.f32 %v3557_v47, %v2448_v44  ;;  %v2459_v27 = vmul.f32 %v2962_v43, %v2453_v40 }
0x127c   :  { %v2460_v39 = vmul.f32 %v2962_v43, %v2454_v24  ;;  %v2465_v30 = vadd.f32 %v2963_v28, %v2459_v27 }
0x127e   :  { %v4252_v4 = vadd.f32 %v2963_v28, %v2460_v39 }
0x1280   :  { %v2467_v41 = vpack.c.bf16 %v4252_v4, %v2465_v30 }
0x1282   :  { %3263 = vmatmul.mubr.bf16.vlgmr.msra.gmra.mrb[28].mxu0 %v2467_v41  ;;  %v2986_v41 = vld [vmem:[%s4291_s10 + $0xc] ss:$0 sm:$0xff] }
0x1355   :  { %v2575_v50 = vpop.f32.mrb[28].mxu0 }
0x1356   :  { %v2576_v55 = vadd.f32 %v2965_v17, %v2575_v50  ;;  %v3264_v56 = vpop.f32.mrb[29].mxu0 }
0x1357   :  { %v2578_v57 = vpop.f32.mrb[30].mxu0 }
0x1358   :  { %v2584_v58 = vmul.f32 0.044715, %v2576_v55  ;;  %v2579_v59 = vadd.f32 %v2965_v17, %v2578_v57  ;;  %v3265_v60 = vpop.f32.mrb[31].mxu0  ;;  %v2582_v5 = vmul.f32 0.5, %v2576_v55 }
0x135a   :  { %v2586_v45 = vmul.f32 %v2584_v58, %v2576_v55  ;;  %v2585_v49 = vmul.f32 0.044715, %v2579_v59  ;;  %v2583_v14 = vmul.f32 0.5, %v2579_v59 }
0x135c   :  { %v2588_v61 = vmul.f32 %v2586_v45, %v2576_v55  ;;  %v2587_v62 = vmul.f32 %v2585_v49, %v2579_v59 }
0x135e   :  { %v2590_v63 = vadd.f32 %v2588_v61, %v2576_v55  ;;  %v2589_v0 = vmul.f32 %v2587_v62, %v2579_v59 }
0x1360   :  { %v2592_v1 = vmul.f32 0.7978846, %v2590_v63  ;;  %v2591_v2 = vadd.f32 %v2589_v0, %v2579_v59 }
0x1362   :  { %3558 = vtanh.f32 %v2592_v1  ;;  %v2593_v3 = vmul.f32 0.7978846, %v2591_v2 }
0x1364   :  { %3560 = vtanh.f32 %v2593_v3 }
0x136c   :  { %v3559_v11 = vpop.eup %3558 }
0x136d   :  { %v2596_v12 = vadd.f32 1.0, %v3559_v11 }
0x136e   :  { %v3561_v13 = vpop.eup %3560 }
0x136f   :  { %v2597_v36 = vadd.f32 1.0, %v3561_v13  ;;  %v2598_v46 = vmul.f32 %v2596_v12, %v2582_v5 }
0x1371   :  { %v2599_v15 = vmul.f32 %v2597_v36, %v2583_v14 }
0x1373   :  { %v2600_v7 = vpack.c.bf16 %v2599_v15, %v2598_v46 }
0x1375   :  { %3283 = vmatmul.mubr.bf16.vlgmr.msra.gmra.mrb[52].mxu1 %v2600_v7 }
0x1448   :  { %v2705_v8 = vpop.f32.mrb[52].mxu1 }
0x1449   :  { %v2706_v18 = vadd.f32 %v2975_v16, %v2705_v8  ;;  %v3284_v19 = vpop.f32.mrb[53].mxu1 }
0x144a   :  { %v2708_v20 = vpop.f32.mrb[54].mxu1 }
0x144b   :  { %v2712_v21 = vadd.f32 %v2706_v18, %v2465_v30  ;;  %v2709_v9 = vadd.f32 %v2975_v16, %v2708_v20  ;;  %v3285_v6 = vpop.f32.mrb[55].mxu1 }
0x144d   :  { %v2713_v22 = vadd.f32 %v2709_v9, %v4252_v4  ;;  %2716 = vadd.xlane.f32.xlu0 %v2712_v21  ;;  %v2722_v23 = vmul.f32 %v2712_v21, %v2712_v21 }
0x144f   :  { %2718 = vadd.xlane.f32.xlu1 %v2713_v22  ;;  %v2723_v10 = vmul.f32 %v2713_v22, %v2713_v22 }
0x1451   :  { %2724 = vadd.xlane.f32.xlu0 %v2722_v23 }
0x1453   :  { %2726 = vadd.xlane.f32.xlu1 %v2723_v10 }
0x14da   :  { %v2717_v25 = vpop.xlane.xlu0 %2716 }
0x14db   :  { %v2720_v26 = vmul.f32 0.03125, %v2717_v25 }
0x14dc   :  { %v2719_v29 = vpop.xlane.xlu1 %2718 }
0x14dd   :  { %v2721_v31 = vmul.f32 0.03125, %v2719_v29  ;;  %v2730_v33 = vmul.f32 %v2720_v26, %v2720_v26  ;;  %v2736_v30 = vsub.f32 %v2712_v21, %v2720_v26 }
0x14de   :  { %v2725_v32 = vpop.xlane.xlu0 %2724 }
0x14df   :  { %v2728_v37 = vmul.f32 0.03125, %v2725_v32  ;;  %v2731_v43 = vmul.f32 %v2721_v31, %v2721_v31  ;;  %v2737_v48 = vsub.f32 %v2713_v22, %v2721_v31 }
0x14e0   :  { %v2727_v42 = vpop.xlane.xlu1 %2726 }
0x14e1   :  { %v2732_v44 = vsub.f32 %v2728_v37, %v2730_v33  ;;  %v2729_v40 = vmul.f32 0.03125, %v2727_v42 }
0x14e3   :  { %v2734_v47 = vmax.f32 %v2732_v44, 0.0  ;;  %v2733_v24 = vsub.f32 %v2729_v40, %v2731_v43 }
0x14e5   :  { %v2738_v27 = vadd.f32 1e-12, %v2734_v47  ;;  %v2735_v28 = vmax.f32 %v2733_v24, 0.0 }
0x14e7   :  { %3562 = vrsqrt.f32 %v2738_v27  ;;  %v2739_v39 = vadd.f32 1e-12, %v2735_v28 }
0x14e9   :  { %3564 = vrsqrt.f32 %v2739_v39 }
0x14f1   :  { %v3563_v4 = vpop.eup %3562 }
0x14f2   :  { %v2742_v51 = vmul.f32 %v3563_v4, %v2736_v30 }
0x14f3   :  { %v3565_v34 = vpop.eup %3564 }
0x14f4   :  { %v2748_v38 = vmul.f32 %v2986_v41, %v2742_v51  ;;  %v2743_v52 = vmul.f32 %v3565_v34, %v2737_v48 }
0x14f6   :  { %v2754_v53 = vadd.f32 %v2987_v35, %v2748_v38  ;;  %v2749_v54 = vmul.f32 %v2986_v41, %v2743_v52 }
0x14f8   :  { %2988 = vst [vmem:[%s4293_s12 + $0x20] sm:$0xff] %v2754_v53  ;;  %v2755_v17 = vadd.f32 %v2987_v35, %v2749_v54 }
0x14fa   :  { %2989 = vst [vmem:[%s4293_s12 + $0x28] sm:$0xff] %v2755_v17 }
0x14fb   :  { %2763 = vsyncpa [#allocation6], 1 }
0x14fc   :  { %2764 = vsyncpa [#allocation8], 1 }
0x14fd   :  { %2765 = vsyncpa [#allocation11], 1 }

</bundles_post_ra>
